<compile_context>
chip_gen: v6e
topology: v6e:2x2x1
jax: 0.10.0
libtpu: 0.0.40
codegen_flags: <defaults>
</compile_context>

<pallas_src>
import jax
import jax.numpy as jnp
from jax import lax
from jax.experimental import pallas as pl
from jax.experimental.pallas import tpu as pltpu


def _round_up(n, m):
    return ((n + m - 1) // m) * m


# ----------------------------- Pallas kernels ------------------------------

def _conv_relu_pool_kernel(a_ref, b_ref, c_ref, d_ref, w_ref, bias_ref, o_ref):
    """Fused conv (im2col GEMM) + bias + ReLU + 2x2 max-pool.

    a/b/c/d are im2col patch matrices for the four positions inside each 2x2
    pooling window, so pooling is a 4-way elementwise max of the GEMM results
    (max commutes with the shared bias add and with ReLU)."""
    w = w_ref[...]                                              # bf16, VMEM-resident
    ya = jnp.dot(a_ref[...], w, preferred_element_type=jnp.float32)
    yb = jnp.dot(b_ref[...], w, preferred_element_type=jnp.float32)
    yc = jnp.dot(c_ref[...], w, preferred_element_type=jnp.float32)
    yd = jnp.dot(d_ref[...], w, preferred_element_type=jnp.float32)
    m = jnp.maximum(jnp.maximum(ya, yb), jnp.maximum(yc, yd))
    o_ref[...] = jnp.maximum(m + bias_ref[...], 0.0).astype(o_ref.dtype)


def _fused_fc_kernel(h_ref, w1_ref, b1_ref, w2_ref, b2_ref, w3_ref, b3_ref,
                     feat_ref, logit_ref):
    """fc1 -> ReLU -> head1 -> ReLU -> head2 in one kernel.

    Intermediates stay on-chip; weights (bf16, padded to lane-dense 512-wide)
    are resident for the whole call.  f32 accumulation on the MXU."""
    h = h_ref[...]                                              # bf16 [tm, 800]
    y1 = jnp.dot(h, w1_ref[...], preferred_element_type=jnp.float32) + b1_ref[...]
    y1 = jnp.maximum(y1, 0.0)
    feat_ref[...] = y1
    y2 = jnp.dot(y1.astype(jnp.bfloat16), w2_ref[...],
                 preferred_element_type=jnp.float32) + b2_ref[...]
    y2 = jnp.maximum(y2, 0.0)
    y3 = jnp.dot(y2.astype(jnp.bfloat16), w3_ref[...],
                 preferred_element_type=jnp.float32) + b3_ref[...]
    logit_ref[...] = y3


# ------------------------------ Pallas wrappers -----------------------------

def _im2col_pooled(x, k, k_pad):
    """x: [B,H,W,C] (f32) -> four bf16 patch matrices [B*Hp*Wp, k_pad], one per
    2x2 pool-window offset (dh, dw).  K ordering is (kh, kw, cin)."""
    B, H, W, C = x.shape
    Ho, Wo = H - k + 1, W - k + 1
    Hp, Wp = Ho // 2, Wo // 2
    K = k * k * C
    mats = []
    for dh in (0, 1):
        for dw in (0, 1):
            cols = []
            for i in range(k):
                for j in range(k):
                    r0, c0 = dh + i, dw + j
                    cols.append(x[:, r0:r0 + 2 * Hp - 1:2, c0:c0 + 2 * Wp - 1:2, :])
            p = jnp.stack(cols, axis=-2).reshape(B * Hp * Wp, K)
            if k_pad > K:
                p = jnp.pad(p, ((0, 0), (0, k_pad - K)))
            mats.append(p.astype(jnp.bfloat16))
    return mats, Hp, Wp


def conv_relu_pool(x, w_kc, bias, k):
    """VALID conv (stride 1) + ReLU + MaxPool2d(2,2), fully fused.
    x: [B,H,W,Cin] f32.  w_kc: [Kpad, Cout] bf16 (pre-transposed, pre-padded).
    bias: [1, Cout] f32.  Returns [B, Hp, Wp, Cout] f32."""
    B = x.shape[0]
    k_pad, cout = w_kc.shape
    mats, Hp, Wp = _im2col_pooled(x, k, k_pad)
    M = B * Hp * Wp
    tm = Hp * Wp                                  # one image per grid step

    out = pl.pallas_call(
        _conv_relu_pool_kernel,
        out_shape=jax.ShapeDtypeStruct((M, cout), jnp.float32),
        grid=(B,),
        in_specs=[pl.BlockSpec((tm, k_pad), lambda i: (i, 0)),
                  pl.BlockSpec((tm, k_pad), lambda i: (i, 0)),
                  pl.BlockSpec((tm, k_pad), lambda i: (i, 0)),
                  pl.BlockSpec((tm, k_pad), lambda i: (i, 0)),
                  pl.BlockSpec((k_pad, cout), lambda i: (0, 0)),
                  pl.BlockSpec((1, cout), lambda i: (0, 0))],
        out_specs=pl.BlockSpec((tm, cout), lambda i: (i, 0)),
        compiler_params=pltpu.CompilerParams(
            dimension_semantics=("parallel",)),
    )(*mats, w_kc, bias)
    return out.reshape(B, Hp, Wp, cout)


def fused_fc(h, prep):
    """h: [B, 800] f32 (NHWC-flattened).  Returns padded (feat, logits) f32."""
    B, K = h.shape
    if B <= 128:                                  # single tile, padded to 8 sublanes
        tm = _round_up(B, 8)
        m_pad = tm
    else:                                         # bounded 128-row tiles for big batch
        tm = 128
        m_pad = _round_up(B, 128)
    if m_pad != B:
        h = jnp.pad(h, ((0, m_pad - B), (0, 0)))
    h = h.astype(jnp.bfloat16)

    n1 = prep["fc1_w"].shape[1]                   # 512
    n3 = prep["head2_w"].shape[1]                 # 512 (feat_dim padded)

    feat, logits = pl.pallas_call(
        _fused_fc_kernel,
        out_shape=(jax.ShapeDtypeStruct((m_pad, n1), jnp.float32),
                   jax.ShapeDtypeStruct((m_pad, n3), jnp.float32)),
        grid=(m_pad // tm,),
        in_specs=[pl.BlockSpec((tm, K), lambda i: (i, 0)),
                  pl.BlockSpec((K, n1), lambda i: (0, 0)),
                  pl.BlockSpec((1, n1), lambda i: (0, 0)),
                  pl.BlockSpec((n1, n1), lambda i: (0, 0)),
                  pl.BlockSpec((1, n1), lambda i: (0, 0)),
                  pl.BlockSpec((n1, n3), lambda i: (0, 0)),
                  pl.BlockSpec((1, n3), lambda i: (0, 0))],
        out_specs=(pl.BlockSpec((tm, n1), lambda i: (i, 0)),
                   pl.BlockSpec((tm, n3), lambda i: (i, 0))),
        compiler_params=pltpu.CompilerParams(
            dimension_semantics=("parallel",)),
    )(h, prep["fc1_w"], prep["fc1_b"], prep["head1_w"], prep["head1_b"],
      prep["head2_w"], prep["head2_b"])
    return feat, logits


# --------------------------- params & preparation ---------------------------

def init_params(key, feat_dim=500):
    """PyTorch-layout f32 parameters (same init scheme as nn.Conv2d / nn.Linear)."""
    ks = jax.random.split(key, 12)

    def uni(k, shape, fan_in):
        s = 1.0 / jnp.sqrt(jnp.float32(fan_in))
        return jax.random.uniform(k, shape, jnp.float32, -s, s)

    return {
        "conv1_w": uni(ks[0], (20, 1, 5, 5), 1 * 5 * 5),
        "conv1_b": uni(ks[1], (20,), 1 * 5 * 5),
        "conv2_w": uni(ks[2], (50, 20, 5, 5), 20 * 5 * 5),
        "conv2_b": uni(ks[3], (50,), 20 * 5 * 5),
        "fc1_w": uni(ks[4], (500, 800), 800),
        "fc1_b": uni(ks[5], (500,), 800),
        "head1_w": uni(ks[6], (500, 500), 500),
        "head1_b": uni(ks[7], (500,), 500),
        "head2_w": uni(ks[8], (feat_dim, 500), 500),
        "head2_b": uni(ks[9], (feat_dim,), 500),
    }


def prepare_params(params):
    """One-time (outside jit) weight preparation: transpose to [K, N], fold the
    NCHW-flatten permutation into fc1's columns, zero-pad to TPU-friendly dims,
    cast GEMM weights to bf16.  All padding is with zeros -> numerics unchanged."""
    def pad_to(a, shape):
        return jnp.pad(a, [(0, s - d) for d, s in zip(a.shape, shape)])

    def conv_w(w, k_pad):
        cout, cin, kh, kw = w.shape
        wm = jnp.transpose(w, (2, 3, 1, 0)).reshape(kh * kw * cin, cout)
        return pad_to(wm, (k_pad, cout)).astype(jnp.bfloat16)

    n_hid = 512                                   # 500 padded to lane-dense 512
    feat_dim = params["head2_w"].shape[0]
    n3 = _round_up(feat_dim, 128)

    # fc1: columns are (C=50,H=4,W=4)-ordered (NCHW flatten); permute once to the
    # NHWC-flatten order produced by the fused conv kernels.
    fc1 = params["fc1_w"].reshape(500, 50, 4, 4).transpose(0, 2, 3, 1).reshape(500, 800)

    return {
        "conv1_w": conv_w(params["conv1_w"], 32),          # K 25 -> 32
        "conv1_b": params["conv1_b"].reshape(1, -1),
        "conv2_w": conv_w(params["conv2_w"], 512),         # K 500 -> 512
        "conv2_b": params["conv2_b"].reshape(1, -1),
        "fc1_w": pad_to(fc1.T, (800, n_hid)).astype(jnp.bfloat16),
        "fc1_b": pad_to(params["fc1_b"], (n_hid,)).reshape(1, n_hid),
        "head1_w": pad_to(params["head1_w"].T, (n_hid, n_hid)).astype(jnp.bfloat16),
        "head1_b": pad_to(params["head1_b"], (n_hid,)).reshape(1, n_hid),
        "head2_w": pad_to(params["head2_w"].T, (n_hid, n3)).astype(jnp.bfloat16),
        "head2_b": pad_to(params["head2_b"], (n3,)).reshape(1, n3),
    }


# --------------------------------- forward ----------------------------------

def supcon_mlp_forward(prep, x_nchw, feat_dim=500):
    """SupConMLP.forward: returns (feat [B,500], logits [B,feat_dim])."""
    B = x_nchw.shape[0]
    x = jnp.transpose(x_nchw, (0, 2, 3, 1))                     # NCHW -> NHWC (once)
    h = conv_relu_pool(x, prep["conv1_w"], prep["conv1_b"], 5)  # [B,12,12,20]
    h = conv_relu_pool(h, prep["conv2_w"], prep["conv2_b"], 5)  # [B, 4, 4,50]
    # NHWC flatten is a pure reshape; the NCHW permutation lives in fc1_w already.
    h = h.reshape(B, 4 * 4 * 50)                                # [B, 800]
    feat_p, logit_p = fused_fc(h, prep)
    return feat_p[:B, :500], logit_p[:B, :feat_dim]
    # TODO(synk): conv outputs keep their natural 20/50-lane width (tiny tensors);
    # widening them to 128 lanes was judged not worth the extra im2col/MXU work.


# ------------------------------ JAX reference --------------------------------

def reference_forward(params, x_nchw, feat_dim=500):
    """Pure-JAX reference using the same bf16-input / f32-accumulate GEMM precision."""
    x = jnp.transpose(x_nchw, (0, 2, 3, 1))

    def conv(x, w, b):
        w_hwio = jnp.transpose(w, (2, 3, 1, 0)).astype(jnp.bfloat16)
        y = lax.conv_general_dilated(
            x.astype(jnp.bfloat16), w_hwio, (1, 1), "VALID",
            dimension_numbers=("NHWC", "HWIO", "NHWC"),
            preferred_element_type=jnp.float32)
        return jax.nn.relu(y + b)

    def pool(x):
        return lax.reduce_window(x, -jnp.inf, lax.max,
                                 (1, 2, 2, 1), (1, 2, 2, 1), "VALID")

    def lin(a, w, b):
        return jnp.dot(a.astype(jnp.bfloat16), w.T.astype(jnp.bfloat16),
                       preferred_element_type=jnp.float32) + b

    h = pool(conv(x, params["conv1_w"], params["conv1_b"]))
    h = pool(conv(h, params["conv2_w"], params["conv2_b"]))
    B = x.shape[0]
    h = jnp.transpose(h, (0, 3, 1, 2)).reshape(B, 800)          # NCHW flatten
    feat = jax.nn.relu(lin(h, params["fc1_w"], params["fc1_b"]))
    z = jax.nn.relu(lin(feat, params["head1_w"], params["head1_b"]))
    logits = lin(z, params["head2_w"], params["head2_b"])
    return feat, logits[:, :feat_dim]


if __name__ == "__main__":
    key = jax.random.PRNGKey(0)
    k_param, k_x = jax.random.split(key)
    params = init_params(k_param, feat_dim=500)
    prep = prepare_params(params)          # one-time weight transpose/pad/bf16
    # MNIST-shaped input (required by the 4*4*50 flatten): batch=2, 1x28x28, NCHW.
    x = jax.random.normal(k_x, (2, 1, 28, 28), dtype=jnp.float32)

    fwd = jax.jit(supcon_mlp_forward)
    feat, logits = fwd(prep, x)
    jax.block_until_ready((feat, logits))

    feat_ref, logits_ref = reference_forward(params, x)
    assert feat.shape == (2, 500) and logits.shape == (2, 500)
    assert jnp.allclose(feat, feat_ref, rtol=2e-2, atol=2e-2), \
        float(jnp.max(jnp.abs(feat - feat_ref)))
    assert jnp.allclose(logits, logits_ref, rtol=2e-2, atol=2e-2), \
        float(jnp.max(jnp.abs(logits - logits_ref)))

    print("KERNEL_OK")
</pallas_src>

<mosaic_0001>
module attributes {stable_mosaic.version = 11 : i64} {
  func.func @_conv_relu_pool_kernel(%arg0: i32, %arg1: memref<144x32xbf16, #tpu.memory_space<vmem>>, %arg2: memref<144x32xbf16, #tpu.memory_space<vmem>>, %arg3: memref<144x32xbf16, #tpu.memory_space<vmem>>, %arg4: memref<144x32xbf16, #tpu.memory_space<vmem>>, %arg5: memref<32x20xbf16, #tpu.memory_space<vmem>>, %arg6: memref<1x20xf32, #tpu.memory_space<vmem>>, %arg7: memref<144x20xf32, #tpu.memory_space<vmem>>) attributes {dimension_semantics = [#tpu.dimension_semantics<parallel>], iteration_bounds = array<i64: 2>, scalar_prefetch = 0 : i64, scratch_operands = 0 : i64, tpu.core_type = #tpu.core_type<tc>, window_params = [{transform_indices = @transform_0, window_bounds = array<i64: 144, 32>}, {transform_indices = @transform_1, window_bounds = array<i64: 144, 32>}, {transform_indices = @transform_2, window_bounds = array<i64: 144, 32>}, {transform_indices = @transform_3, window_bounds = array<i64: 144, 32>}, {pipeline_mode = #tpu.pipeline_mode<synchronous>, transform_indices = @transform_4, window_bounds = array<i64: 32, 20>}, {pipeline_mode = #tpu.pipeline_mode<synchronous>, transform_indices = @transform_5, window_bounds = array<i64: 1, 20>}, {transform_indices = @transform_6, window_bounds = array<i64: 144, 20>}]} {
    %c0 = arith.constant 0 : index
    %c0_0 = arith.constant 0 : index
    %0 = vector.load %arg5[%c0, %c0_0] : memref<32x20xbf16, #tpu.memory_space<vmem>>, vector<32x20xbf16>
    %c0_1 = arith.constant 0 : index
    %c0_2 = arith.constant 0 : index
    %1 = vector.load %arg1[%c0_1, %c0_2] : memref<144x32xbf16, #tpu.memory_space<vmem>>, vector<144x32xbf16>
    %cst = arith.constant dense<0.000000e+00> : vector<144x20xf32>
    %2 = tpu.matmul %1, %0, %cst {dimension_numbers = #tpu.dot_dimension_numbers<[1], [0], [0], [1], [0, 0, 1, 1], [], []>} : vector<144x32xbf16>, vector<32x20xbf16>, vector<144x20xf32> -> vector<144x20xf32>
    %c0_3 = arith.constant 0 : index
    %c0_4 = arith.constant 0 : index
    %3 = vector.load %arg2[%c0_3, %c0_4] : memref<144x32xbf16, #tpu.memory_space<vmem>>, vector<144x32xbf16>
    %cst_5 = arith.constant dense<0.000000e+00> : vector<144x20xf32>
    %4 = tpu.matmul %3, %0, %cst_5 {dimension_numbers = #tpu.dot_dimension_numbers<[1], [0], [0], [1], [0, 0, 1, 1], [], []>} : vector<144x32xbf16>, vector<32x20xbf16>, vector<144x20xf32> -> vector<144x20xf32>
    %c0_6 = arith.constant 0 : index
    %c0_7 = arith.constant 0 : index
    %5 = vector.load %arg3[%c0_6, %c0_7] : memref<144x32xbf16, #tpu.memory_space<vmem>>, vector<144x32xbf16>
    %cst_8 = arith.constant dense<0.000000e+00> : vector<144x20xf32>
    %6 = tpu.matmul %5, %0, %cst_8 {dimension_numbers = #tpu.dot_dimension_numbers<[1], [0], [0], [1], [0, 0, 1, 1], [], []>} : vector<144x32xbf16>, vector<32x20xbf16>, vector<144x20xf32> -> vector<144x20xf32>
    %c0_9 = arith.constant 0 : index
    %c0_10 = arith.constant 0 : index
    %7 = vector.load %arg4[%c0_9, %c0_10] : memref<144x32xbf16, #tpu.memory_space<vmem>>, vector<144x32xbf16>
    %cst_11 = arith.constant dense<0.000000e+00> : vector<144x20xf32>
    %8 = tpu.matmul %7, %0, %cst_11 {dimension_numbers = #tpu.dot_dimension_numbers<[1], [0], [0], [1], [0, 0, 1, 1], [], []>} : vector<144x32xbf16>, vector<32x20xbf16>, vector<144x20xf32> -> vector<144x20xf32>
    %9 = arith.maximumf %2, %4 : vector<144x20xf32>
    %10 = arith.maximumf %6, %8 : vector<144x20xf32>
    %11 = arith.maximumf %9, %10 : vector<144x20xf32>
    %c0_12 = arith.constant 0 : index
    %c0_13 = arith.constant 0 : index
    %12 = vector.load %arg6[%c0_12, %c0_13] : memref<1x20xf32, #tpu.memory_space<vmem>>, vector<1x20xf32>
    %13 = vector.broadcast %12 : vector<1x20xf32> to vector<144x20xf32>
    %14 = arith.addf %11, %13 : vector<144x20xf32>
    %cst_14 = arith.constant 0.000000e+00 : f32
    %15 = vector.broadcast %cst_14 : f32 to vector<144x20xf32>
    %16 = arith.maximumf %14, %15 : vector<144x20xf32>
    %c0_15 = arith.constant 0 : index
    %c0_16 = arith.constant 0 : index
    %17 = vector.load %arg7[%c0_15, %c0_16] : memref<144x20xf32, #tpu.memory_space<vmem>>, vector<144x20xf32>
    tpu.vector_store %arg7[%c0_15, %c0_16], %16 {strides = array<i32>} : memref<144x20xf32, #tpu.memory_space<vmem>>, vector<144x20xf32>,
    return
  }
  func.func @transform_0(%arg0: i32) -> (i32, i32) {
    %c0_i32 = arith.constant 0 : i32
    %c0_i32_0 = arith.constant 0 : i32
    return %arg0, %c0_i32 : i32, i32
  }
  func.func @transform_1(%arg0: i32) -> (i32, i32) {
    %c0_i32 = arith.constant 0 : i32
    %c0_i32_0 = arith.constant 0 : i32
    return %arg0, %c0_i32 : i32, i32
  }
  func.func @transform_2(%arg0: i32) -> (i32, i32) {
    %c0_i32 = arith.constant 0 : i32
    %c0_i32_0 = arith.constant 0 : i32
    return %arg0, %c0_i32 : i32, i32
  }
  func.func @transform_3(%arg0: i32) -> (i32, i32) {
    %c0_i32 = arith.constant 0 : i32
    %c0_i32_0 = arith.constant 0 : i32
    return %arg0, %c0_i32 : i32, i32
  }
  func.func @transform_4(%arg0: i32) -> (i32, i32) {
    %c0_i32 = arith.constant 0 : i32
    %c0_i32_0 = arith.constant 0 : i32
    %c0_i32_1 = arith.constant 0 : i32
    return %c0_i32, %c0_i32_0 : i32, i32
  }
  func.func @transform_5(%arg0: i32) -> (i32, i32) {
    %c0_i32 = arith.constant 0 : i32
    %c0_i32_0 = arith.constant 0 : i32
    %c0_i32_1 = arith.constant 0 : i32
    return %c0_i32, %c0_i32_0 : i32, i32
  }
  func.func @transform_6(%arg0: i32) -> (i32, i32) {
    %c0_i32 = arith.constant 0 : i32
    %c0_i32_0 = arith.constant 0 : i32
    return %arg0, %c0_i32 : i32, i32
  }
}

module attributes {stable_mosaic.version = 11 : i64} {
  func.func @_conv_relu_pool_kernel(%arg0: i32, %arg1: memref<16x512xbf16, #tpu.memory_space<vmem>>, %arg2: memref<16x512xbf16, #tpu.memory_space<vmem>>, %arg3: memref<16x512xbf16, #tpu.memory_space<vmem>>, %arg4: memref<16x512xbf16, #tpu.memory_space<vmem>>, %arg5: memref<512x50xbf16, #tpu.memory_space<vmem>>, %arg6: memref<1x50xf32, #tpu.memory_space<vmem>>, %arg7: memref<16x50xf32, #tpu.memory_space<vmem>>) attributes {dimension_semantics = [#tpu.dimension_semantics<parallel>], iteration_bounds = array<i64: 2>, scalar_prefetch = 0 : i64, scratch_operands = 0 : i64, tpu.core_type = #tpu.core_type<tc>, window_params = [{transform_indices = @transform_0, window_bounds = array<i64: 16, 512>}, {transform_indices = @transform_1, window_bounds = array<i64: 16, 512>}, {transform_indices = @transform_2, window_bounds = array<i64: 16, 512>}, {transform_indices = @transform_3, window_bounds = array<i64: 16, 512>}, {pipeline_mode = #tpu.pipeline_mode<synchronous>, transform_indices = @transform_4, window_bounds = array<i64: 512, 50>}, {pipeline_mode = #tpu.pipeline_mode<synchronous>, transform_indices = @transform_5, window_bounds = array<i64: 1, 50>}, {transform_indices = @transform_6, window_bounds = array<i64: 16, 50>}]} {
    %c0 = arith.constant 0 : index
    %c0_0 = arith.constant 0 : index
    %0 = vector.load %arg5[%c0, %c0_0] : memref<512x50xbf16, #tpu.memory_space<vmem>>, vector<512x50xbf16>
    %c0_1 = arith.constant 0 : index
    %c0_2 = arith.constant 0 : index
    %1 = vector.load %arg1[%c0_1, %c0_2] : memref<16x512xbf16, #tpu.memory_space<vmem>>, vector<16x512xbf16>
    %cst = arith.constant dense<0.000000e+00> : vector<16x50xf32>
    %2 = tpu.matmul %1, %0, %cst {dimension_numbers = #tpu.dot_dimension_numbers<[1], [0], [0], [1], [0, 0, 1, 1], [], []>} : vector<16x512xbf16>, vector<512x50xbf16>, vector<16x50xf32> -> vector<16x50xf32>
    %c0_3 = arith.constant 0 : index
    %c0_4 = arith.constant 0 : index
    %3 = vector.load %arg2[%c0_3, %c0_4] : memref<16x512xbf16, #tpu.memory_space<vmem>>, vector<16x512xbf16>
    %cst_5 = arith.constant dense<0.000000e+00> : vector<16x50xf32>
    %4 = tpu.matmul %3, %0, %cst_5 {dimension_numbers = #tpu.dot_dimension_numbers<[1], [0], [0], [1], [0, 0, 1, 1], [], []>} : vector<16x512xbf16>, vector<512x50xbf16>, vector<16x50xf32> -> vector<16x50xf32>
    %c0_6 = arith.constant 0 : index
    %c0_7 = arith.constant 0 : index
    %5 = vector.load %arg3[%c0_6, %c0_7] : memref<16x512xbf16, #tpu.memory_space<vmem>>, vector<16x512xbf16>
    %cst_8 = arith.constant dense<0.000000e+00> : vector<16x50xf32>
    %6 = tpu.matmul %5, %0, %cst_8 {dimension_numbers = #tpu.dot_dimension_numbers<[1], [0], [0], [1], [0, 0, 1, 1], [], []>} : vector<16x512xbf16>, vector<512x50xbf16>, vector<16x50xf32> -> vector<16x50xf32>
    %c0_9 = arith.constant 0 : index
    %c0_10 = arith.constant 0 : index
    %7 = vector.load %arg4[%c0_9, %c0_10] : memref<16x512xbf16, #tpu.memory_space<vmem>>, vector<16x512xbf16>
    %cst_11 = arith.constant dense<0.000000e+00> : vector<16x50xf32>
    %8 = tpu.matmul %7, %0, %cst_11 {dimension_numbers = #tpu.dot_dimension_numbers<[1], [0], [0], [1], [0, 0, 1, 1], [], []>} : vector<16x512xbf16>, vector<512x50xbf16>, vector<16x50xf32> -> vector<16x50xf32>
    %9 = arith.maximumf %2, %4 : vector<16x50xf32>
    %10 = arith.maximumf %6, %8 : vector<16x50xf32>
    %11 = arith.maximumf %9, %10 : vector<16x50xf32>
    %c0_12 = arith.constant 0 : index
    %c0_13 = arith.constant 0 : index
    %12 = vector.load %arg6[%c0_12, %c0_13] : memref<1x50xf32, #tpu.memory_space<vmem>>, vector<1x50xf32>
    %13 = vector.broadcast %12 : vector<1x50xf32> to vector<16x50xf32>
    %14 = arith.addf %11, %13 : vector<16x50xf32>
    %cst_14 = arith.constant 0.000000e+00 : f32
    %15 = vector.broadcast %cst_14 : f32 to vector<16x50xf32>
    %16 = arith.maximumf %14, %15 : vector<16x50xf32>
    %c0_15 = arith.constant 0 : index
    %c0_16 = arith.constant 0 : index
    %17 = vector.load %arg7[%c0_15, %c0_16] : memref<16x50xf32, #tpu.memory_space<vmem>>, vector<16x50xf32>
    tpu.vector_store %arg7[%c0_15, %c0_16], %16 {strides = array<i32>} : memref<16x50xf32, #tpu.memory_space<vmem>>, vector<16x50xf32>,
    return
  }
  func.func @transform_0(%arg0: i32) -> (i32, i32) {
    %c0_i32 = arith.constant 0 : i32
    %c0_i32_0 = arith.constant 0 : i32
    return %arg0, %c0_i32 : i32, i32
  }
  func.func @transform_1(%arg0: i32) -> (i32, i32) {
    %c0_i32 = arith.constant 0 : i32
    %c0_i32_0 = arith.constant 0 : i32
    return %arg0, %c0_i32 : i32, i32
  }
  func.func @transform_2(%arg0: i32) -> (i32, i32) {
    %c0_i32 = arith.constant 0 : i32
    %c0_i32_0 = arith.constant 0 : i32
    return %arg0, %c0_i32 : i32, i32
  }
  func.func @transform_3(%arg0: i32) -> (i32, i32) {
    %c0_i32 = arith.constant 0 : i32
    %c0_i32_0 = arith.constant 0 : i32
    return %arg0, %c0_i32 : i32, i32
  }
  func.func @transform_4(%arg0: i32) -> (i32, i32) {
    %c0_i32 = arith.constant 0 : i32
    %c0_i32_0 = arith.constant 0 : i32
    %c0_i32_1 = arith.constant 0 : i32
    return %c0_i32, %c0_i32_0 : i32, i32
  }
  func.func @transform_5(%arg0: i32) -> (i32, i32) {
    %c0_i32 = arith.constant 0 : i32
    %c0_i32_0 = arith.constant 0 : i32
    %c0_i32_1 = arith.constant 0 : i32
    return %c0_i32, %c0_i32_0 : i32, i32
  }
  func.func @transform_6(%arg0: i32) -> (i32, i32) {
    %c0_i32 = arith.constant 0 : i32
    %c0_i32_0 = arith.constant 0 : i32
    return %arg0, %c0_i32 : i32, i32
  }
}

module attributes {stable_mosaic.version = 11 : i64} {
  func.func @_fused_fc_kernel(%arg0: i32, %arg1: memref<8x800xbf16, #tpu.memory_space<vmem>>, %arg2: memref<800x512xbf16, #tpu.memory_space<vmem>>, %arg3: memref<1x512xf32, #tpu.memory_space<vmem>>, %arg4: memref<512x512xbf16, #tpu.memory_space<vmem>>, %arg5: memref<1x512xf32, #tpu.memory_space<vmem>>, %arg6: memref<512x512xbf16, #tpu.memory_space<vmem>>, %arg7: memref<1x512xf32, #tpu.memory_space<vmem>>, %arg8: memref<8x512xf32, #tpu.memory_space<vmem>>, %arg9: memref<8x512xf32, #tpu.memory_space<vmem>>) attributes {dimension_semantics = [#tpu.dimension_semantics<parallel>], iteration_bounds = array<i64: 1>, scalar_prefetch = 0 : i64, scratch_operands = 0 : i64, tpu.core_type = #tpu.core_type<tc>, window_params = [{transform_indices = @transform_0, window_bounds = array<i64: 8, 800>}, {pipeline_mode = #tpu.pipeline_mode<synchronous>, transform_indices = @transform_1, window_bounds = array<i64: 800, 512>}, {pipeline_mode = #tpu.pipeline_mode<synchronous>, transform_indices = @transform_2, window_bounds = array<i64: 1, 512>}, {pipeline_mode = #tpu.pipeline_mode<synchronous>, transform_indices = @transform_3, window_bounds = array<i64: 512, 512>}, {pipeline_mode = #tpu.pipeline_mode<synchronous>, transform_indices = @transform_4, window_bounds = array<i64: 1, 512>}, {pipeline_mode = #tpu.pipeline_mode<synchronous>, transform_indices = @transform_5, window_bounds = array<i64: 512, 512>}, {pipeline_mode = #tpu.pipeline_mode<synchronous>, transform_indices = @transform_6, window_bounds = array<i64: 1, 512>}, {transform_indices = @transform_7, window_bounds = array<i64: 8, 512>}, {transform_indices = @transform_8, window_bounds = array<i64: 8, 512>}]} {
    %c0 = arith.constant 0 : index
    %c0_0 = arith.constant 0 : index
    %0 = vector.load %arg1[%c0, %c0_0] : memref<8x800xbf16, #tpu.memory_space<vmem>>, vector<8x800xbf16>
    %c0_1 = arith.constant 0 : index
    %c0_2 = arith.constant 0 : index
    %1 = vector.load %arg2[%c0_1, %c0_2] : memref<800x512xbf16, #tpu.memory_space<vmem>>, vector<800x512xbf16>
    %cst = arith.constant dense<0.000000e+00> : vector<8x512xf32>
    %2 = tpu.matmul %0, %1, %cst {dimension_numbers = #tpu.dot_dimension_numbers<[1], [0], [0], [1], [0, 0, 1, 1], [], []>} : vector<8x800xbf16>, vector<800x512xbf16>, vector<8x512xf32> -> vector<8x512xf32>
    %c0_3 = arith.constant 0 : index
    %c0_4 = arith.constant 0 : index
    %3 = vector.load %arg3[%c0_3, %c0_4] : memref<1x512xf32, #tpu.memory_space<vmem>>, vector<1x512xf32>
    %4 = vector.broadcast %3 : vector<1x512xf32> to vector<8x512xf32>
    %5 = arith.addf %2, %4 : vector<8x512xf32>
    %cst_5 = arith.constant 0.000000e+00 : f32
    %6 = vector.broadcast %cst_5 : f32 to vector<8x512xf32>
    %7 = arith.maximumf %5, %6 : vector<8x512xf32>
    %c0_6 = arith.constant 0 : index
    %c0_7 = arith.constant 0 : index
    %8 = vector.load %arg8[%c0_6, %c0_7] : memref<8x512xf32, #tpu.memory_space<vmem>>, vector<8x512xf32>
    tpu.vector_store %arg8[%c0_6, %c0_7], %7 {strides = array<i32>} : memref<8x512xf32, #tpu.memory_space<vmem>>, vector<8x512xf32>,
    %9 = arith.truncf %7 : vector<8x512xf32> to vector<8x512xbf16>
    %c0_8 = arith.constant 0 : index
    %c0_9 = arith.constant 0 : index
    %10 = vector.load %arg4[%c0_8, %c0_9] : memref<512x512xbf16, #tpu.memory_space<vmem>>, vector<512x512xbf16>
    %cst_10 = arith.constant dense<0.000000e+00> : vector<8x512xf32>
    %11 = tpu.matmul %9, %10, %cst_10 {dimension_numbers = #tpu.dot_dimension_numbers<[1], [0], [0], [1], [0, 0, 1, 1], [], []>} : vector<8x512xbf16>, vector<512x512xbf16>, vector<8x512xf32> -> vector<8x512xf32>
    %c0_11 = arith.constant 0 : index
    %c0_12 = arith.constant 0 : index
    %12 = vector.load %arg5[%c0_11, %c0_12] : memref<1x512xf32, #tpu.memory_space<vmem>>, vector<1x512xf32>
    %13 = vector.broadcast %12 : vector<1x512xf32> to vector<8x512xf32>
    %14 = arith.addf %11, %13 : vector<8x512xf32>
    %cst_13 = arith.constant 0.000000e+00 : f32
    %15 = vector.broadcast %cst_13 : f32 to vector<8x512xf32>
    %16 = arith.maximumf %14, %15 : vector<8x512xf32>
    %17 = arith.truncf %16 : vector<8x512xf32> to vector<8x512xbf16>
    %c0_14 = arith.constant 0 : index
    %c0_15 = arith.constant 0 : index
    %18 = vector.load %arg6[%c0_14, %c0_15] : memref<512x512xbf16, #tpu.memory_space<vmem>>, vector<512x512xbf16>
    %cst_16 = arith.constant dense<0.000000e+00> : vector<8x512xf32>
    %19 = tpu.matmul %17, %18, %cst_16 {dimension_numbers = #tpu.dot_dimension_numbers<[1], [0], [0], [1], [0, 0, 1, 1], [], []>} : vector<8x512xbf16>, vector<512x512xbf16>, vector<8x512xf32> -> vector<8x512xf32>
    %c0_17 = arith.constant 0 : index
    %c0_18 = arith.constant 0 : index
    %20 = vector.load %arg7[%c0_17, %c0_18] : memref<1x512xf32, #tpu.memory_space<vmem>>, vector<1x512xf32>
    %21 = vector.broadcast %20 : vector<1x512xf32> to vector<8x512xf32>
    %22 = arith.addf %19, %21 : vector<8x512xf32>
    %c0_19 = arith.constant 0 : index
    %c0_20 = arith.constant 0 : index
    %23 = vector.load %arg9[%c0_19, %c0_20] : memref<8x512xf32, #tpu.memory_space<vmem>>, vector<8x512xf32>
    tpu.vector_store %arg9[%c0_19, %c0_20], %22 {strides = array<i32>} : memref<8x512xf32, #tpu.memory_space<vmem>>, vector<8x512xf32>,
    return
  }
  func.func @transform_0(%arg0: i32) -> (i32, i32) {
    %c0_i32 = arith.constant 0 : i32
    %c0_i32_0 = arith.constant 0 : i32
    return %arg0, %c0_i32 : i32, i32
  }
  func.func @transform_1(%arg0: i32) -> (i32, i32) {
    %c0_i32 = arith.constant 0 : i32
    %c0_i32_0 = arith.constant 0 : i32
    %c0_i32_1 = arith.constant 0 : i32
    return %c0_i32, %c0_i32_0 : i32, i32
  }
  func.func @transform_2(%arg0: i32) -> (i32, i32) {
    %c0_i32 = arith.constant 0 : i32
    %c0_i32_0 = arith.constant 0 : i32
    %c0_i32_1 = arith.constant 0 : i32
    return %c0_i32, %c0_i32_0 : i32, i32
  }
  func.func @transform_3(%arg0: i32) -> (i32, i32) {
    %c0_i32 = arith.constant 0 : i32
    %c0_i32_0 = arith.constant 0 : i32
    %c0_i32_1 = arith.constant 0 : i32
    return %c0_i32, %c0_i32_0 : i32, i32
  }
  func.func @transform_4(%arg0: i32) -> (i32, i32) {
    %c0_i32 = arith.constant 0 : i32
    %c0_i32_0 = arith.constant 0 : i32
    %c0_i32_1 = arith.constant 0 : i32
    return %c0_i32, %c0_i32_0 : i32, i32
  }
  func.func @transform_5(%arg0: i32) -> (i32, i32) {
    %c0_i32 = arith.constant 0 : i32
    %c0_i32_0 = arith.constant 0 : i32
    %c0_i32_1 = arith.constant 0 : i32
    return %c0_i32, %c0_i32_0 : i32, i32
  }
  func.func @transform_6(%arg0: i32) -> (i32, i32) {
    %c0_i32 = arith.constant 0 : i32
    %c0_i32_0 = arith.constant 0 : i32
    %c0_i32_1 = arith.constant 0 : i32
    return %c0_i32, %c0_i32_0 : i32, i32
  }
  func.func @transform_7(%arg0: i32) -> (i32, i32) {
    %c0_i32 = arith.constant 0 : i32
    %c0_i32_0 = arith.constant 0 : i32
    return %arg0, %c0_i32 : i32, i32
  }
  func.func @transform_8(%arg0: i32) -> (i32, i32) {
    %c0_i32 = arith.constant 0 : i32
    %c0_i32_0 = arith.constant 0 : i32
    return %arg0, %c0_i32 : i32, i32
  }
}

</mosaic_0001>

<bundles_post_ra>
// kernel: supcon_mlp_forward.3
= control target key start
LH: loop header
LB: loop body
LE: loop exit
PB: predicated region body
PF: predicated region fallthrough
CT: control target
= control target key end

     0   :  { %s1711_s21 = smov 0   ;;  %s2130_s0 = inlined_call_operand.vmem [shape: bf16[288,32], index: 0, kind: input, shape index: {}]   ;;  %s2131_s1 = inlined_call_operand.vmem [shape: bf16[288,32], index: 1, kind: input, shape index: {}]   ;;  %s2132_s2 = inlined_call_operand.vmem [shape: bf16[288,32], index: 2, kind: input, shape index: {}]   ;;  %s2133_s3 = inlined_call_operand.vmem [shape: bf16[288,32], index: 3, kind: input, shape index: {}]   ;;  %s2134_s4 = inlined_call_operand.vmem [shape: bf16[32,20], index: 4, kind: input, shape index: {}]   ;;  %s2135_s5 = inlined_call_operand.vmem [shape: f32[1,20], index: 5, kind: input, shape index: {}]   ;;  %s2136_s6 = inlined_call_operand.vmem [shape: f32[288,20], index: 6, kind: output, shape index: {}]  }
   0x1 LB: > { %s1327_s22 = sadd.s32 4294967295, %s1672_s21   ;;  %p1331_p0 = scmp.ge.s32.totalorder %s1672_s21, 1  ;;  %s1672_s21 = sphi %s1711_s21, %s16_s21  }
   0x2   : > { %p246_p1 = scmp.lt.s32.totalorder %s1672_s21, 3 }
   0x4   : > { %p247_p2 = pnand %p1331_p0, %p246_p1 }
   0x5   : > { %s291_s27 = smul.u32 (!%p247_p2), 18, %s1327_s22 }
   0x6   : > { %250 = sbr.rel (%p247_p2) target bundleno = 362 (0x16a), region = 44 }
   0x7   : > { %p292_p3 = scmp.lt.s32.totalorder (!%p247_p2), %s291_s27, 35 }
   0xb   : > { %v1628_v0 = vld [vmem:[%s2134_s4 + $0x8] sm:$0xff]   ;;  %v1674_v1 = vmov 0.0   ;;  %v1629_v2 = vld [vmem:[%s2134_s4] sm:$0xff]   ;;  %vm1675_vm0 = vmmov 0   ;;  %s2140_s27 = smov (!%p292_p3, %s291_s27), 35  ;;  %vm401_vm1 = vcmask 261120  }
   0xc   : > { %1458 = vmatprep.subr.bf16.mxu0 %v1674_v1  ;;  %1498 = vmatprep.subr.bf16.mxu1 %v1674_v1  ;;  %s1332_s28 = sshll.u32 %s2140_s27, 2  ;;  %s1336_s19 = sshll.u32 %s2140_s27, 3  ;;  %vm1216_vm2 = vcmask 162816  }
   0xd   : > { %1459 = vmatpush3.bf16.msra.mxu0 %v1628_v0  ;;  %1499 = vmatpush3.bf16.msra.mxu1 %v1628_v0  ;;  %s1741_s7 = scalar_lea.vmem %s2130_s0, %s1332_s28  ;;  %s1747_s10 = scalar_lea.vmem %s2131_s1, %s1332_s28 }
   0xe   : > { %1460 = vmatprep.subr.bf16.mxu0 %v1674_v1  ;;  %1500 = vmatprep.subr.bf16.mxu1 %v1674_v1  ;;  %v1630_v3 = vld [vmem:[%s1741_s7] sm:$0xff]   ;;  %v1632_v5 = vld [vmem:[%s1741_s7 + $0x8] sm:$0xff]   ;;  %v1634_v7 = vld [vmem:[%s1741_s7 + $0x10] sm:$0xff]   ;;  %s1771_s13 = scalar_lea.vmem %s2132_s2, %s1332_s28  ;;  %s1776_s16 = scalar_lea.vmem %s2133_s3, %s1332_s28 }
   0xf   : > { %1462 = vmatprep.mubr.msk.bf16.mxu0 %vm1675_vm0, %v1674_v1  ;;  %1502 = vmatprep.mubr.msk.bf16.mxu1 %vm1675_vm0, %v1674_v1  ;;  %v1631_v4 = vld [vmem:[%s1747_s10] sm:$0xff]   ;;  %v1633_v6 = vld [vmem:[%s1747_s10 + $0x8] sm:$0xff]   ;;  %v1635_v8 = vld [vmem:[%s1747_s10 + $0x10] sm:$0xff]   ;;  %s2021_s23 = scalar_lea.vmem %s2136_s6, %s1336_s19 }
  0x10   : > { %v1636_v9 = vld [vmem:[%s1741_s7 + $0x18] sm:$0xff]   ;;  %v1638_v11 = vld [vmem:[%s1741_s7 + $0x20] sm:$0xff]   ;;  %v1640_v13 = vld [vmem:[%s1741_s7 + $0x28] sm:$0xff]  }
  0x11   : > { %1461 = vmatpush3.bf16.msra.mxu0 %v1629_v2  ;;  %1501 = vmatpush3.bf16.msra.mxu1 %v1629_v2  ;;  %v1637_v10 = vld [vmem:[%s1747_s10 + $0x18] sm:$0xff]   ;;  %v1639_v12 = vld [vmem:[%s1747_s10 + $0x20] sm:$0xff]   ;;  %v1641_v14 = vld [vmem:[%s1747_s10 + $0x28] sm:$0xff]  }
  0x12   : > { %1538 = vmatprep.subr.bf16.mxu0 %v1674_v1  ;;  %1578 = vmatprep.subr.bf16.mxu1 %v1674_v1  ;;  %v1642_v15 = vld [vmem:[%s1741_s7 + $0x30] sm:$0xff]   ;;  %v1644_v17 = vld [vmem:[%s1741_s7 + $0x38] sm:$0xff]   ;;  %v1646_v19 = vld [vmem:[%s1741_s7 + $0x40] sm:$0xff]  }
  0x13   : > { %v1643_v16 = vld [vmem:[%s1747_s10 + $0x30] sm:$0xff]   ;;  %v1645_v18 = vld [vmem:[%s1747_s10 + $0x38] sm:$0xff]   ;;  %v1647_v20 = vld [vmem:[%s1747_s10 + $0x40] sm:$0xff]  }
  0x14   : > { %1463 = vmatmul.mubr.msk.bf16.vlgmr.msra.gmra.mxu0 %vm401_vm1, %v1630_v3  ;;  %1503 = vmatmul.mubr.msk.bf16.vlgmr.msra.gmra.mxu1 %vm401_vm1, %v1631_v4  ;;  %v1648_v21 = vld [vmem:[%s1771_s13] sm:$0xff]   ;;  %v1650_v23 = vld [vmem:[%s1771_s13 + $0x8] sm:$0xff]   ;;  %v1652_v25 = vld [vmem:[%s1771_s13 + $0x10] sm:$0xff]  }
  0x15   : > { %1539 = vmatpush3.bf16.msra.mxu0 %v1628_v0  ;;  %1579 = vmatpush3.bf16.msra.mxu1 %v1628_v0  ;;  %v1649_v22 = vld [vmem:[%s1776_s16] sm:$0xff]   ;;  %v1651_v24 = vld [vmem:[%s1776_s16 + $0x8] sm:$0xff]   ;;  %v1653_v26 = vld [vmem:[%s1776_s16 + $0x10] sm:$0xff]  }
  0x16   : > { %1466 = vmatprep.mubr.msk.bf16.mxu0 %vm1675_vm0, %v1674_v1  ;;  %1506 = vmatprep.mubr.msk.bf16.mxu1 %vm1675_vm0, %v1674_v1  ;;  %v1654_v27 = vld [vmem:[%s1771_s13 + $0x18] sm:$0xff]   ;;  %v1656_v29 = vld [vmem:[%s1771_s13 + $0x20] sm:$0xff]   ;;  %v1658_v31 = vld [vmem:[%s1771_s13 + $0x28] sm:$0xff]  }
  0x17   : > { %1540 = vmatprep.subr.bf16.mxu0 %v1674_v1  ;;  %1580 = vmatprep.subr.bf16.mxu1 %v1674_v1  ;;  %v1655_v28 = vld [vmem:[%s1776_s16 + $0x18] sm:$0xff]   ;;  %v1657_v30 = vld [vmem:[%s1776_s16 + $0x20] sm:$0xff]   ;;  %v1659_v32 = vld [vmem:[%s1776_s16 + $0x28] sm:$0xff]  }
  0x18   : > { %v1660_v33 = vld [vmem:[%s1771_s13 + $0x30] sm:$0xff]   ;;  %v1662_v35 = vld [vmem:[%s1771_s13 + $0x38] sm:$0xff]   ;;  %v1664_v37 = vld [vmem:[%s1771_s13 + $0x40] sm:$0xff]  }
  0x19   : > { %1541 = vmatpush3.bf16.msra.mxu0 %v1629_v2  ;;  %1581 = vmatpush3.bf16.msra.mxu1 %v1629_v2  ;;  %v1661_v34 = vld [vmem:[%s1776_s16 + $0x30] sm:$0xff]   ;;  %v1663_v36 = vld [vmem:[%s1776_s16 + $0x38] sm:$0xff]   ;;  %v1665_v38 = vld [vmem:[%s1776_s16 + $0x40] sm:$0xff]  }
  0x1c   : > { %1467 = vmatmul.mubr.msk.bf16.gmra.mxu0 %vm401_vm1, %v1632_v5  ;;  %1507 = vmatmul.mubr.msk.bf16.gmra.mxu1 %vm401_vm1, %v1633_v6 }
  0x1d   : > { %1470 = vmatprep.mubr.msk.bf16.mxu0 %vm1675_vm0, %v1674_v1  ;;  %1510 = vmatprep.mubr.msk.bf16.mxu1 %vm1675_vm0, %v1674_v1 }
  0x24   : > { %1471 = vmatmul.mubr.msk.bf16.gmra.mxu0 %vm401_vm1, %v1634_v7  ;;  %1511 = vmatmul.mubr.msk.bf16.gmra.mxu1 %vm401_vm1, %v1635_v8 }
  0x25   : > { %1474 = vmatprep.mubr.msk.bf16.mxu0 %vm1675_vm0, %v1674_v1  ;;  %1514 = vmatprep.mubr.msk.bf16.mxu1 %vm1675_vm0, %v1674_v1 }
  0x2c   : > { %1475 = vmatmul.mubr.msk.bf16.gmra.mxu0 %vm401_vm1, %v1636_v9  ;;  %1515 = vmatmul.mubr.msk.bf16.gmra.mxu1 %vm401_vm1, %v1637_v10 }
  0x2d   : > { %1478 = vmatprep.mubr.msk.bf16.mxu0 %vm1675_vm0, %v1674_v1  ;;  %1518 = vmatprep.mubr.msk.bf16.mxu1 %vm1675_vm0, %v1674_v1 }
  0x34   : > { %1479 = vmatmul.mubr.msk.bf16.gmra.mxu0 %vm401_vm1, %v1638_v11  ;;  %1519 = vmatmul.mubr.msk.bf16.gmra.mxu1 %vm401_vm1, %v1639_v12 }
  0x35   : > { %1482 = vmatprep.mubr.msk.bf16.mxu0 %vm1675_vm0, %v1674_v1  ;;  %1522 = vmatprep.mubr.msk.bf16.mxu1 %vm1675_vm0, %v1674_v1 }
  0x3c   : > { %1483 = vmatmul.mubr.msk.bf16.gmra.mxu0 %vm401_vm1, %v1640_v13  ;;  %1523 = vmatmul.mubr.msk.bf16.gmra.mxu1 %vm401_vm1, %v1641_v14 }
  0x3d   : > { %1486 = vmatprep.mubr.msk.bf16.mxu0 %vm1675_vm0, %v1674_v1  ;;  %1526 = vmatprep.mubr.msk.bf16.mxu1 %vm1675_vm0, %v1674_v1 }
  0x44   : > { %1487 = vmatmul.mubr.msk.bf16.gmra.mxu0 %vm401_vm1, %v1642_v15  ;;  %1527 = vmatmul.mubr.msk.bf16.gmra.mxu1 %vm401_vm1, %v1643_v16 }
  0x45   : > { %1490 = vmatprep.mubr.msk.bf16.mxu0 %vm1675_vm0, %v1674_v1  ;;  %1530 = vmatprep.mubr.msk.bf16.mxu1 %vm1675_vm0, %v1674_v1 }
  0x4c   : > { %1491 = vmatmul.mubr.msk.bf16.gmra.mxu0 %vm401_vm1, %v1644_v17  ;;  %1531 = vmatmul.mubr.msk.bf16.gmra.mxu1 %vm401_vm1, %v1645_v18 }
  0x4d   : > { %1494 = vmatprep.mubr.msk.bf16.mxu0 %vm1675_vm0, %v1674_v1  ;;  %1534 = vmatprep.mubr.msk.bf16.mxu1 %vm1675_vm0, %v1674_v1 }
  0x54   : > { %1495 = vmatmul.mubr.msk.bf16.gmra.mxu0 %vm401_vm1, %v1646_v19  ;;  %1535 = vmatmul.mubr.msk.bf16.gmra.mxu1 %vm401_vm1, %v1647_v20 }
  0x55   : > { %1542 = vmatprep.mubr.msk.bf16.mxu0 %vm1675_vm0, %v1674_v1  ;;  %1582 = vmatprep.mubr.msk.bf16.mxu1 %vm1675_vm0, %v1674_v1 }
  0x5c   : > { %1543 = vmatmul.mubr.msk.bf16.vlgmr.msra.gmra.mxu0 %vm401_vm1, %v1648_v21  ;;  %1583 = vmatmul.mubr.msk.bf16.vlgmr.msra.gmra.mxu1 %vm401_vm1, %v1649_v22 }
  0x5d   : > { %1546 = vmatprep.mubr.msk.bf16.mxu0 %vm1675_vm0, %v1674_v1  ;;  %1586 = vmatprep.mubr.msk.bf16.mxu1 %vm1675_vm0, %v1674_v1 }
  0x64   : > { %1547 = vmatmul.mubr.msk.bf16.gmra.mxu0 %vm401_vm1, %v1650_v23  ;;  %1587 = vmatmul.mubr.msk.bf16.gmra.mxu1 %vm401_vm1, %v1651_v24 }
  0x65   : > { %1550 = vmatprep.mubr.msk.bf16.mxu0 %vm1675_vm0, %v1674_v1  ;;  %1590 = vmatprep.mubr.msk.bf16.mxu1 %vm1675_vm0, %v1674_v1 }
  0x6c   : > { %1551 = vmatmul.mubr.msk.bf16.gmra.mxu0 %vm401_vm1, %v1652_v25  ;;  %1591 = vmatmul.mubr.msk.bf16.gmra.mxu1 %vm401_vm1, %v1653_v26 }
  0x6d   : > { %1554 = vmatprep.mubr.msk.bf16.mxu0 %vm1675_vm0, %v1674_v1  ;;  %1594 = vmatprep.mubr.msk.bf16.mxu1 %vm1675_vm0, %v1674_v1 }
  0x74   : > { %1555 = vmatmul.mubr.msk.bf16.gmra.mxu0 %vm401_vm1, %v1654_v27  ;;  %1595 = vmatmul.mubr.msk.bf16.gmra.mxu1 %vm401_vm1, %v1655_v28 }
  0x75   : > { %1558 = vmatprep.mubr.msk.bf16.mxu0 %vm1675_vm0, %v1674_v1  ;;  %1598 = vmatprep.mubr.msk.bf16.mxu1 %vm1675_vm0, %v1674_v1 }
  0x7c   : > { %1559 = vmatmul.mubr.msk.bf16.gmra.mxu0 %vm401_vm1, %v1656_v29  ;;  %1599 = vmatmul.mubr.msk.bf16.gmra.mxu1 %vm401_vm1, %v1657_v30 }
  0x7d   : > { %1562 = vmatprep.mubr.msk.bf16.mxu0 %vm1675_vm0, %v1674_v1  ;;  %1602 = vmatprep.mubr.msk.bf16.mxu1 %vm1675_vm0, %v1674_v1 }
  0x84   : > { %1563 = vmatmul.mubr.msk.bf16.gmra.mxu0 %vm401_vm1, %v1658_v31  ;;  %1603 = vmatmul.mubr.msk.bf16.gmra.mxu1 %vm401_vm1, %v1659_v32 }
  0x85   : > { %1566 = vmatprep.mubr.msk.bf16.mxu0 %vm1675_vm0, %v1674_v1  ;;  %1606 = vmatprep.mubr.msk.bf16.mxu1 %vm1675_vm0, %v1674_v1 }
  0x8c   : > { %1567 = vmatmul.mubr.msk.bf16.gmra.mxu0 %vm401_vm1, %v1660_v33  ;;  %1607 = vmatmul.mubr.msk.bf16.gmra.mxu1 %vm401_vm1, %v1661_v34 }
  0x8d   : > { %1570 = vmatprep.mubr.msk.bf16.mxu0 %vm1675_vm0, %v1674_v1  ;;  %1610 = vmatprep.mubr.msk.bf16.mxu1 %vm1675_vm0, %v1674_v1 }
  0x94   : > { %1571 = vmatmul.mubr.msk.bf16.gmra.mxu0 %vm401_vm1, %v1662_v35  ;;  %1611 = vmatmul.mubr.msk.bf16.gmra.mxu1 %vm401_vm1, %v1663_v36 }
  0x95   : > { %1574 = vmatprep.mubr.msk.bf16.mxu0 %vm1675_vm0, %v1674_v1  ;;  %1614 = vmatprep.mubr.msk.bf16.mxu1 %vm1675_vm0, %v1674_v1 }
  0x9c   : > { %1575 = vmatmul.mubr.msk.bf16.gmra.mxu0 %vm401_vm1, %v1664_v37  ;;  %1615 = vmatmul.mubr.msk.bf16.gmra.mxu1 %vm401_vm1, %v1665_v38 }
  0xd4   : > { %v1900_v39 = vpop.f32.mrf.mxu0  ;;  %v1902_v40 = vpop.f32.mrf.mxu1 }
  0xd5   : > { %v1119_v41 = vmax.f32 %v1900_v39, %v1902_v40 }
  0xd6   : > { %v1464_v42 = vpop.f32.mrf.mxu0  ;;  %v1504_v43 = vpop.f32.mrf.mxu1 }
  0xd8   : > { %v1906_v44 = vpop.f32.mrf.mxu0  ;;  %v1908_v45 = vpop.f32.mrf.mxu1 }
  0xd9   : > { %v1120_v46 = vmax.f32 %v1906_v44, %v1908_v45 }
  0xda   : > { %v1465_v47 = vpop.f32.mrf.mxu0  ;;  %v1505_v48 = vpop.f32.mrf.mxu1 }
  0xdc   : > { %v1912_v49 = vpop.f32.mrf.mxu0  ;;  %v1914_v50 = vpop.f32.mrf.mxu1 }
  0xdd   : > { %v1121_v51 = vmax.f32 %v1912_v49, %v1914_v50 }
  0xde   : > { %v1468_v52 = vpop.f32.mrf.mxu0  ;;  %v1508_v53 = vpop.f32.mrf.mxu1 }
  0xe0   : > { %v1918_v54 = vpop.f32.mrf.mxu0  ;;  %v1920_v55 = vpop.f32.mrf.mxu1 }
  0xe1   : > { %v1122_v56 = vmax.f32 %v1918_v54, %v1920_v55 }
  0xe2   : > { %v1469_v57 = vpop.f32.mrf.mxu0  ;;  %v1509_v58 = vpop.f32.mrf.mxu1 }
  0xe4   : > { %v1924_v59 = vpop.f32.mrf.mxu0  ;;  %v1926_v60 = vpop.f32.mrf.mxu1 }
  0xe5   : > { %v1123_v61 = vmax.f32 %v1924_v59, %v1926_v60 }
  0xe6   : > { %v1472_v62 = vpop.f32.mrf.mxu0  ;;  %v1512_v63 = vpop.f32.mrf.mxu1 }
  0xe8   : > { %v1930_v0 = vpop.f32.mrf.mxu0  ;;  %v1932_v1 = vpop.f32.mrf.mxu1 }
  0xe9   : > { %v1124_v2 = vmax.f32 %v1930_v0, %v1932_v1 }
  0xea   : > { %v1473_v3 = vpop.f32.mrf.mxu0  ;;  %v1513_v4 = vpop.f32.mrf.mxu1 }
  0xec   : > { %v1936_v5 = vpop.f32.mrf.mxu0  ;;  %v1938_v6 = vpop.f32.mrf.mxu1 }
  0xed   : > { %v1125_v7 = vmax.f32 %v1936_v5, %v1938_v6 }
  0xee   : > { %v1476_v8 = vpop.f32.mrf.mxu0  ;;  %v1516_v9 = vpop.f32.mrf.mxu1 }
  0xf0   : > { %v1942_v10 = vpop.f32.mrf.mxu0  ;;  %v1944_v11 = vpop.f32.mrf.mxu1 }
  0xf1   : > { %v1126_v12 = vmax.f32 %v1942_v10, %v1944_v11 }
  0xf2   : > { %v1477_v13 = vpop.f32.mrf.mxu0  ;;  %v1517_v14 = vpop.f32.mrf.mxu1 }
  0xf4   : > { %v1948_v15 = vpop.f32.mrf.mxu0  ;;  %v1950_v16 = vpop.f32.mrf.mxu1 }
  0xf5   : > { %v1127_v17 = vmax.f32 %v1948_v15, %v1950_v16 }
  0xf6   : > { %v1480_v18 = vpop.f32.mrf.mxu0  ;;  %v1520_v19 = vpop.f32.mrf.mxu1 }
  0xf8   : > { %v1954_v20 = vpop.f32.mrf.mxu0  ;;  %v1956_v21 = vpop.f32.mrf.mxu1 }
  0xf9   : > { %v1128_v22 = vmax.f32 %v1954_v20, %v1956_v21 }
  0xfa   : > { %v1481_v23 = vpop.f32.mrf.mxu0  ;;  %v1521_v24 = vpop.f32.mrf.mxu1 }
  0xfc   : > { %v1960_v25 = vpop.f32.mrf.mxu0  ;;  %v1962_v26 = vpop.f32.mrf.mxu1 }
  0xfd   : > { %v1129_v27 = vmax.f32 %v1960_v25, %v1962_v26 }
  0xfe   : > { %v1484_v28 = vpop.f32.mrf.mxu0  ;;  %v1524_v29 = vpop.f32.mrf.mxu1 }
 0x100   : > { %v1966_v30 = vpop.f32.mrf.mxu0  ;;  %v1968_v31 = vpop.f32.mrf.mxu1 }
 0x101   : > { %v1130_v32 = vmax.f32 %v1966_v30, %v1968_v31 }
 0x102   : > { %v1485_v33 = vpop.f32.mrf.mxu0  ;;  %v1525_v34 = vpop.f32.mrf.mxu1 }
 0x104   : > { %v1972_v35 = vpop.f32.mrf.mxu0  ;;  %v1974_v36 = vpop.f32.mrf.mxu1 }
 0x105   : > { %v1131_v37 = vmax.f32 %v1972_v35, %v1974_v36 }
 0x106   : > { %v1488_v38 = vpop.f32.mrf.mxu0  ;;  %v1528_v42 = vpop.f32.mrf.mxu1 }
 0x108   : > { %v1978_v43 = vpop.f32.mrf.mxu0  ;;  %v1980_v47 = vpop.f32.mrf.mxu1 }
 0x109   : > { %v1132_v48 = vmax.f32 %v1978_v43, %v1980_v47 }
 0x10a   : > { %v1489_v52 = vpop.f32.mrf.mxu0  ;;  %v1529_v53 = vpop.f32.mrf.mxu1 }
 0x10c   : > { %v1984_v57 = vpop.f32.mrf.mxu0  ;;  %v1986_v58 = vpop.f32.mrf.mxu1 }
 0x10d   : > { %v1133_v62 = vmax.f32 %v1984_v57, %v1986_v58 }
 0x10e   : > { %v1492_v63 = vpop.f32.mrf.mxu0  ;;  %v1532_v3 = vpop.f32.mrf.mxu1 }
 0x110   : > { %v1990_v4 = vpop.f32.mrf.mxu0  ;;  %v1992_v8 = vpop.f32.mrf.mxu1 }
 0x111   : > { %v1134_v9 = vmax.f32 %v1990_v4, %v1992_v8 }
 0x112   : > { %v1493_v13 = vpop.f32.mrf.mxu0  ;;  %v1533_v14 = vpop.f32.mrf.mxu1 }
 0x113   : > { %v2011_v13 = vld [vmem:[%s2135_s5] ss:$0 sm:$0xff] }
 0x114   : > { %v1996_v18 = vpop.f32.mrf.mxu0  ;;  %v1998_v19 = vpop.f32.mrf.mxu1 }
 0x116   : > { %v1496_v24 = vpop.f32.mrf.mxu0  ;;  %v1536_v28 = vpop.f32.mrf.mxu1 }
 0x118   : > { %v2002_v29 = vpop.f32.mrf.mxu0  ;;  %v2004_v33 = vpop.f32.mrf.mxu1 }
 0x11a   : > { %v1497_v38 = vpop.f32.mrf.mxu0  ;;  %v1537_v42 = vpop.f32.mrf.mxu1 }
 0x11c   : > { %v853_v52 = vpop.f32.mrf.mxu0  ;;  %v1048_v53 = vpop.f32.mrf.mxu1 }
 0x11d   : > { %v1137_v63 = vmax.f32 %v853_v52, %v1048_v53 }
 0x11e   : > { %v1544_v3 = vpop.f32.mrf.mxu0  ;;  %v1584_v14 = vpop.f32.mrf.mxu1 }
 0x11f   : > { %v1155_v24 = vmax.f32 %v1119_v41, %v1137_v63 }
 0x120   : > { %v856_v28 = vpop.f32.mrf.mxu0  ;;  %v1051_v23 = vpop.f32.mrf.mxu1 }
 0x121   : > { %v1180_v38 = vadd.f32 %v2011_v13, %v1155_v24  ;;  %v1138_v42 = vmax.f32 %v856_v28, %v1051_v23 }
 0x122   : > { %v1545_v34 = vpop.f32.mrf.mxu0  ;;  %v1585_v52 = vpop.f32.mrf.mxu1 }
 0x123   : > { %v1198_v53 = vmax.f32 %v1180_v38, 0.0  ;;  %v1156_v39 = vmax.f32 %v1120_v46, %v1138_v42 }
 0x124   : > { %v861_v40 = vpop.f32.mrf.mxu0  ;;  %v1056_v41 = vpop.f32.mrf.mxu1 }
 0x125   : > { %1217 = vst.msk [vmem:[%s2021_s23] sm:$0xff] %vm1216_vm2, %v1198_v53  ;;  %v1181_v23 = vadd.f32 %v2011_v13, %v1156_v39  ;;  %v1139_v34 = vmax.f32 %v861_v40, %v1056_v41 }
 0x126   : > { %v1548_v63 = vpop.f32.mrf.mxu0  ;;  %v1588_v3 = vpop.f32.mrf.mxu1 }
 0x127   : > { %v1199_v14 = vmax.f32 %v1181_v23, 0.0  ;;  %v1157_v24 = vmax.f32 %v1121_v51, %v1139_v34 }
 0x128   : > { %v864_v28 = vpop.f32.mrf.mxu0  ;;  %v1059_v38 = vpop.f32.mrf.mxu1 }
 0x129   : > { %1218 = vst.msk [vmem:[%s2021_s23 + $0x8] sm:$0xff] %vm1216_vm2, %v1199_v14  ;;  %v1182_v44 = vadd.f32 %v2011_v13, %v1157_v24  ;;  %v1140_v45 = vmax.f32 %v864_v28, %v1059_v38 }
 0x12a   : > { %v1549_v46 = vpop.f32.mrf.mxu0  ;;  %v1589_v42 = vpop.f32.mrf.mxu1 }
 0x12b   : > { %v1200_v52 = vmax.f32 %v1182_v44, 0.0  ;;  %v1158_v53 = vmax.f32 %v1122_v56, %v1140_v45 }
 0x12c   : > { %v869_v39 = vpop.f32.mrf.mxu0  ;;  %v1064_v40 = vpop.f32.mrf.mxu1 }
 0x12d   : > { %1219 = vst.msk [vmem:[%s2021_s23 + $0x10] sm:$0xff] %vm1216_vm2, %v1200_v52  ;;  %v1183_v49 = vadd.f32 %v2011_v13, %v1158_v53  ;;  %v1141_v50 = vmax.f32 %v869_v39, %v1064_v40 }
 0x12e   : > { %v1552_v51 = vpop.f32.mrf.mxu0  ;;  %v1592_v41 = vpop.f32.mrf.mxu1 }
 0x12f   : > { %v1201_v23 = vmax.f32 %v1183_v49, 0.0  ;;  %v1159_v34 = vmax.f32 %v1123_v61, %v1141_v50 }
 0x130   : > { %v872_v63 = vpop.f32.mrf.mxu0  ;;  %v1067_v3 = vpop.f32.mrf.mxu1 }
 0x131   : > { %1220 = vst.msk [vmem:[%s2021_s23 + $0x18] sm:$0xff] %vm1216_vm2, %v1201_v23  ;;  %v1184_v54 = vadd.f32 %v2011_v13, %v1159_v34  ;;  %v1142_v55 = vmax.f32 %v872_v63, %v1067_v3 }
 0x132   : > { %v1553_v56 = vpop.f32.mrf.mxu0  ;;  %v1593_v14 = vpop.f32.mrf.mxu1 }
 0x133   : > { %v1202_v24 = vmax.f32 %v1184_v54, 0.0  ;;  %v1160_v28 = vmax.f32 %v1124_v2, %v1142_v55 }
 0x134   : > { %v877_v38 = vpop.f32.mrf.mxu0  ;;  %v1072_v44 = vpop.f32.mrf.mxu1 }
 0x135   : > { %1221 = vst.msk [vmem:[%s2021_s23 + $0x20] sm:$0xff] %vm1216_vm2, %v1202_v24  ;;  %v1185_v59 = vadd.f32 %v2011_v13, %v1160_v28  ;;  %v1143_v60 = vmax.f32 %v877_v38, %v1072_v44 }
 0x136   : > { %v1556_v61 = vpop.f32.mrf.mxu0  ;;  %v1596_v45 = vpop.f32.mrf.mxu1 }
 0x137   : > { %v1203_v46 = vmax.f32 %v1185_v59, 0.0  ;;  %v1161_v42 = vmax.f32 %v1125_v7, %v1143_v60 }
 0x138   : > { %v880_v52 = vpop.f32.mrf.mxu0  ;;  %v1075_v53 = vpop.f32.mrf.mxu1 }
 0x139   : > { %1222 = vst.msk [vmem:[%s2021_s23 + $0x28] sm:$0xff] %vm1216_vm2, %v1203_v46  ;;  %v1186_v0 = vadd.f32 %v2011_v13, %v1161_v42  ;;  %v1144_v1 = vmax.f32 %v880_v52, %v1075_v53 }
 0x13a   : > { %v1557_v2 = vpop.f32.mrf.mxu0  ;;  %v1597_v39 = vpop.f32.mrf.mxu1 }
 0x13b   : > { %v1204_v40 = vmax.f32 %v1186_v0, 0.0  ;;  %v1162_v49 = vmax.f32 %v1126_v12, %v1144_v1 }
 0x13c   : > { %v885_v50 = vpop.f32.mrf.mxu0  ;;  %v1080_v51 = vpop.f32.mrf.mxu1 }
 0x13d   : > { %1223 = vst.msk [vmem:[%s2021_s23 + $0x30] sm:$0xff] %vm1216_vm2, %v1204_v40  ;;  %v1187_v5 = vadd.f32 %v2011_v13, %v1162_v49  ;;  %v1145_v6 = vmax.f32 %v885_v50, %v1080_v51 }
 0x13e   : > { %v1560_v7 = vpop.f32.mrf.mxu0  ;;  %v1600_v41 = vpop.f32.mrf.mxu1 }
 0x13f   : > { %v1205_v23 = vmax.f32 %v1187_v5, 0.0  ;;  %v1163_v34 = vmax.f32 %v1127_v17, %v1145_v6 }
 0x140   : > { %v888_v63 = vpop.f32.mrf.mxu0  ;;  %v1083_v3 = vpop.f32.mrf.mxu1 }
 0x141   : > { %1224 = vst.msk [vmem:[%s2021_s23 + $0x38] sm:$0xff] %vm1216_vm2, %v1205_v23  ;;  %v1188_v10 = vadd.f32 %v2011_v13, %v1163_v34  ;;  %v1146_v11 = vmax.f32 %v888_v63, %v1083_v3 }
 0x142   : > { %v1561_v12 = vpop.f32.mrf.mxu0  ;;  %v1601_v54 = vpop.f32.mrf.mxu1 }
 0x143   : > { %v1206_v55 = vmax.f32 %v1188_v10, 0.0  ;;  %v1164_v56 = vmax.f32 %v1128_v22, %v1146_v11 }
 0x144   : > { %v893_v14 = vpop.f32.mrf.mxu0  ;;  %v1088_v24 = vpop.f32.mrf.mxu1 }
 0x145   : > { %1225 = vst.msk [vmem:[%s2021_s23 + $0x40] sm:$0xff] %vm1216_vm2, %v1206_v55  ;;  %v1189_v15 = vadd.f32 %v2011_v13, %v1164_v56  ;;  %v1147_v16 = vmax.f32 %v893_v14, %v1088_v24  ;;  %v2137_v56 = vmax.f32 %v1996_v18, %v1998_v19 }
 0x146   : > { %v1564_v17 = vpop.f32.mrf.mxu0  ;;  %v1604_v28 = vpop.f32.mrf.mxu1 }
 0x147   : > { %v1207_v38 = vmax.f32 %v1189_v15, 0.0  ;;  %v1165_v44 = vmax.f32 %v1129_v27, %v1147_v16  ;;  %v2138_v28 = vmax.f32 %v2002_v29, %v2004_v33 }
 0x148   : > { %v896_v59 = vpop.f32.mrf.mxu0  ;;  %v1091_v60 = vpop.f32.mrf.mxu1 }
 0x149   : > { %1226 = vst.msk [vmem:[%s2021_s23 + $0x48] sm:$0xff] %vm1216_vm2, %v1207_v38  ;;  %v1190_v20 = vadd.f32 %v2011_v13, %v1165_v44  ;;  %v1148_v21 = vmax.f32 %v896_v59, %v1091_v60 }
 0x14a   : > { %v1565_v22 = vpop.f32.mrf.mxu0  ;;  %v1605_v61 = vpop.f32.mrf.mxu1 }
 0x14b   : > { %v1208_v45 = vmax.f32 %v1190_v20, 0.0  ;;  %v1166_v46 = vmax.f32 %v1130_v32, %v1148_v21 }
 0x14c   : > { %v901_v42 = vpop.f32.mrf.mxu0  ;;  %v1096_v52 = vpop.f32.mrf.mxu1 }
 0x14d   : > { %1227 = vst.msk [vmem:[%s2021_s23 + $0x50] sm:$0xff] %vm1216_vm2, %v1208_v45  ;;  %v1191_v25 = vadd.f32 %v2011_v13, %v1166_v46  ;;  %v1149_v26 = vmax.f32 %v901_v42, %v1096_v52 }
 0x14e   : > { %v1568_v27 = vpop.f32.mrf.mxu0  ;;  %v1608_v53 = vpop.f32.mrf.mxu1 }
 0x14f   : > { %v1209_v0 = vmax.f32 %v1191_v25, 0.0  ;;  %v1167_v1 = vmax.f32 %v1131_v37, %v1149_v26 }
 0x150   : > { %v904_v2 = vpop.f32.mrf.mxu0  ;;  %v1099_v39 = vpop.f32.mrf.mxu1 }
 0x151   : > { %1228 = vst.msk [vmem:[%s2021_s23 + $0x58] sm:$0xff] %vm1216_vm2, %v1209_v0  ;;  %v1192_v30 = vadd.f32 %v2011_v13, %v1167_v1  ;;  %v1150_v31 = vmax.f32 %v904_v2, %v1099_v39 }
 0x152   : > { %v1569_v32 = vpop.f32.mrf.mxu0  ;;  %v1609_v40 = vpop.f32.mrf.mxu1 }
 0x153   : > { %v1210_v49 = vmax.f32 %v1192_v30, 0.0  ;;  %v1168_v50 = vmax.f32 %v1132_v48, %v1150_v31 }
 0x154   : > { %v909_v51 = vpop.f32.mrf.mxu0  ;;  %v1104_v5 = vpop.f32.mrf.mxu1 }
 0x155   : > { %1229 = vst.msk [vmem:[%s2021_s23 + $0x60] sm:$0xff] %vm1216_vm2, %v1210_v49  ;;  %v1193_v35 = vadd.f32 %v2011_v13, %v1168_v50  ;;  %v1151_v36 = vmax.f32 %v909_v51, %v1104_v5 }
 0x156   : > { %v1572_v37 = vpop.f32.mrf.mxu0  ;;  %v1612_v6 = vpop.f32.mrf.mxu1 }
 0x157   : > { %v1211_v7 = vmax.f32 %v1193_v35, 0.0  ;;  %v1169_v41 = vmax.f32 %v1133_v62, %v1151_v36 }
 0x158   : > { %v912_v23 = vpop.f32.mrf.mxu0  ;;  %v1107_v34 = vpop.f32.mrf.mxu1 }
 0x159   : > { %1230 = vst.msk [vmem:[%s2021_s23 + $0x68] sm:$0xff] %vm1216_vm2, %v1211_v7  ;;  %v1194_v43 = vadd.f32 %v2011_v13, %v1169_v41  ;;  %v1152_v47 = vmax.f32 %v912_v23, %v1107_v34 }
 0x15a   : > { %v1573_v48 = vpop.f32.mrf.mxu0  ;;  %v1613_v63 = vpop.f32.mrf.mxu1 }
 0x15b   : > { %v1212_v3 = vmax.f32 %v1194_v43, 0.0  ;;  %v1170_v10 = vmax.f32 %v1134_v9, %v1152_v47 }
 0x15c   : > { %v917_v11 = vpop.f32.mrf.mxu0  ;;  %v1112_v12 = vpop.f32.mrf.mxu1 }
 0x15d   : > { %1231 = vst.msk [vmem:[%s2021_s23 + $0x70] sm:$0xff] %vm1216_vm2, %v1212_v3  ;;  %v1195_v57 = vadd.f32 %v2011_v13, %v1170_v10  ;;  %v1153_v58 = vmax.f32 %v917_v11, %v1112_v12 }
 0x15e   : > { %v1576_v62 = vpop.f32.mrf.mxu0  ;;  %v1616_v54 = vpop.f32.mrf.mxu1 }
 0x15f   : > { %v1213_v55 = vmax.f32 %v1195_v57, 0.0  ;;  %v1171_v14 = vmax.f32 %v2137_v56, %v1153_v58 }
 0x160   : > { %v920_v24 = vpop.f32.mrf.mxu0  ;;  %v1115_v15 = vpop.f32.mrf.mxu1 }
 0x161   : > { %1232 = vst.msk [vmem:[%s2021_s23 + $0x78] sm:$0xff] %vm1216_vm2, %v1213_v55  ;;  %v1196_v4 = vadd.f32 %v2011_v13, %v1171_v14  ;;  %v1154_v8 = vmax.f32 %v920_v24, %v1115_v15 }
 0x162   : > { %v1577_v9 = vpop.f32.mrf.mxu0  ;;  %v1617_v16 = vpop.f32.mrf.mxu1 }
 0x163   : > { %v1214_v17 = vmax.f32 %v1196_v4, 0.0  ;;  %v1172_v38 = vmax.f32 %v2138_v28, %v1154_v8 }
 0x165   : > { %1233 = vst.msk [vmem:[%s2021_s23 + $0x80] sm:$0xff] %vm1216_vm2, %v1214_v17  ;;  %v1197_v44 = vadd.f32 %v2011_v13, %v1172_v38 }
 0x167   : > { %v1215_v18 = vmax.f32 %v1197_v44, 0.0 }
 0x169   : > { %1234 = vst.msk [vmem:[%s2021_s23 + $0x88] sm:$0xff] %vm1216_vm2, %v1215_v18 }
 0x16a PF: > { %s16_s21 = sadd.s32 1, %s1672_s21  }
 0x16b   : > { %p13_p4 = scmp.ge.s32.totalorder %s16_s21, 4  }
 0x16d   :  { %15 = sbr.rel (!%p13_p4) target bundleno = 1 (0x1), region = 83 }

// kernel: supcon_mlp_forward.4
= control target key start
LH: loop header
LB: loop body
LE: loop exit
PB: predicated region body
PF: predicated region fallthrough
CT: control target
= control target key end

     0   :  { %s1483_s21 = smov 0   ;;  %s1830_s0 = inlined_call_operand.vmem [shape: bf16[32,512], index: 0, kind: input, shape index: {}]   ;;  %s1831_s1 = inlined_call_operand.vmem [shape: bf16[32,512], index: 1, kind: input, shape index: {}]   ;;  %s1832_s2 = inlined_call_operand.vmem [shape: bf16[32,512], index: 2, kind: input, shape index: {}]   ;;  %s1833_s3 = inlined_call_operand.vmem [shape: bf16[32,512], index: 3, kind: input, shape index: {}]   ;;  %s1834_s4 = inlined_call_operand.vmem [shape: bf16[512,50], index: 4, kind: input, shape index: {}]   ;;  %s1835_s5 = inlined_call_operand.vmem [shape: f32[1,50], index: 5, kind: input, shape index: {}]   ;;  %s1836_s6 = inlined_call_operand.vmem [shape: f32[32,50], index: 6, kind: output, shape index: {}]  }
   0x1 LB: > { %s1126_s22 = sadd.s32 4294967295, %s1446_s21   ;;  %p1130_p0 = scmp.ge.s32.totalorder %s1446_s21, 1  ;;  %s1446_s21 = sphi %s1483_s21, %s16_s21  }
   0x2   : > { %p250_p1 = scmp.lt.s32.totalorder %s1446_s21, 3 }
   0x4   : > { %p251_p2 = pnand %p1130_p0, %p250_p1 }
   0x5   : > { %s1131_s9 = sshll.u32 (!%p251_p2), %s1126_s22, 1 }
   0x6   : > { %254 = sbr.rel (%p251_p2) target bundleno = 354 (0x162), region = 44  ;;  %p300_p3 = scmp.lt.s32.totalorder (!%p251_p2), %s1131_s9, 3 }
   0xb   : > { %v1494_v0 = vld [vmem:[%s1834_s4 + $0x78] sm:$0xff]   ;;  %v1517_v4 = vld [vmem:[%s1834_s4 + $0x70] sm:$0xff]   ;;  %v1541_v8 = vld [vmem:[%s1834_s4 + $0x68] sm:$0xff]   ;;  %s1838_s9 = smov (!%p300_p3, %s1131_s9), 3  ;;  %vm1031_vm0 = vcmask 408576  }
   0xc   : > { %v1499_v1 = vld [vmem:[%s1834_s4 + $0xf8] sm:$0xff]   ;;  %1200 = vmatprep.subr.bf16.mxu0 %v1494_v0  ;;  %v1523_v5 = vld [vmem:[%s1834_s4 + $0xf0] sm:$0xff]   ;;  %v1547_v9 = vld [vmem:[%s1834_s4 + $0xe8] sm:$0xff]   ;;  %s1656_s10 = sshll.u32 %s1838_s9, 4  ;;  %s1144_s13 = sshll.u32 %s1838_s9, 3 }
   0xd   : > { %v1505_v2 = vld [vmem:[%s1834_s4 + $0x38] sm:$0xff]   ;;  %1222 = vmatprep.subr.bf16.mxu1 %v1499_v1  ;;  %v1529_v6 = vld [vmem:[%s1834_s4 + $0x30] sm:$0xff]   ;;  %v1553_v10 = vld [vmem:[%s1834_s4 + $0x28] sm:$0xff]   ;;  %s304_s18 = scalar_lea.vmem %s1830_s0, %s1656_s10  ;;  %s1697_s27 = scalar_lea.vmem %s1831_s1, %s1656_s10 }
   0xe   : > { %v1511_v3 = vld [vmem:[%s1834_s4 + $0xb8] sm:$0xff]   ;;  %1201 = vmatpush3.bf16.msra.mxu0 %v1505_v2  ;;  %v1535_v7 = vld [vmem:[%s1834_s4 + $0xb0] sm:$0xff]   ;;  %v1559_v11 = vld [vmem:[%s1834_s4 + $0xa8] sm:$0xff]   ;;  %s1707_s30 = scalar_lea.vmem %s1832_s2, %s1656_s10  ;;  %s1718_s11 = scalar_lea.vmem %s1833_s3, %s1656_s10 }
   0xf   : > { %1223 = vmatpush3.bf16.msra.mxu1 %v1511_v3  ;;  %1202 = vmatprep.subr.bf16.mxu0 %v1517_v4  ;;  %v1565_v12 = vld [vmem:[%s1834_s4 + $0x60] sm:$0xff]   ;;  %v1591_v16 = vld [vmem:[%s1834_s4 + $0x58] sm:$0xff]   ;;  %v1615_v20 = vld [vmem:[%s1834_s4 + $0x50] sm:$0xff]   ;;  %s331_s22 = scalar_lea.vmem %s1836_s6, %s1144_s13 }
  0x10   : > { %1224 = vmatprep.subr.bf16.mxu1 %v1523_v5  ;;  %v1571_v13 = vld [vmem:[%s1834_s4 + $0xe0] sm:$0xff]   ;;  %v1597_v17 = vld [vmem:[%s1834_s4 + $0xd8] sm:$0xff]   ;;  %v1621_v21 = vld [vmem:[%s1834_s4 + $0xd0] sm:$0xff]  }
  0x11   : > { %v1577_v14 = vld [vmem:[%s1834_s4 + $0x20] sm:$0xff]   ;;  %v1603_v18 = vld [vmem:[%s1834_s4 + $0x18] sm:$0xff]   ;;  %v1627_v22 = vld [vmem:[%s1834_s4 + $0x10] sm:$0xff]  }
  0x12   : > { %1203 = vmatpush3.bf16.msra.mxu0 %v1529_v6  ;;  %v1583_v15 = vld [vmem:[%s1834_s4 + $0xa0] sm:$0xff]   ;;  %v1609_v19 = vld [vmem:[%s1834_s4 + $0x98] sm:$0xff]   ;;  %v1635_v23 = vld [vmem:[%s1834_s4 + $0x90] sm:$0xff]  }
  0x13   : > { %1225 = vmatpush3.bf16.msra.mxu1 %v1535_v7  ;;  %1204 = vmatprep.subr.bf16.mxu0 %v1541_v8  ;;  %v1641_v24 = vld [vmem:[%s1834_s4 + $0x48] sm:$0xff]   ;;  %v1668_v28 = vld [vmem:[%s1834_s4 + $0x40] sm:$0xff]  }
  0x14   : > { %1226 = vmatprep.subr.bf16.mxu1 %v1547_v9  ;;  %v1647_v25 = vld [vmem:[%s1834_s4 + $0xc8] sm:$0xff]   ;;  %v1674_v29 = vld [vmem:[%s1834_s4 + $0xc0] sm:$0xff]  }
  0x15   : > { %v1653_v26 = vld [vmem:[%s1834_s4 + $0x8] sm:$0xff]   ;;  %v1684_v30 = vld [vmem:[%s1834_s4] sm:$0xff]  }
  0x16   : > { %1205 = vmatpush3.bf16.msra.mxu0 %v1553_v10  ;;  %v1662_v27 = vld [vmem:[%s1834_s4 + $0x88] sm:$0xff]   ;;  %v1690_v31 = vld [vmem:[%s1834_s4 + $0x80] sm:$0xff]  }
  0x17   : > { %1227 = vmatpush3.bf16.msra.mxu1 %v1559_v11  ;;  %1206 = vmatprep.subr.bf16.mxu0 %v1565_v12  ;;  %v1416_v32 = vld [vmem:[%s304_s18] ss:$16 sps:$4 sm:$0xff]   ;;  %v1418_v33 = vld [vmem:[%s304_s18 + $0x4] ss:$16 sps:$4 sm:$0xff]   ;;  %v1419_v34 = vld [vmem:[%s304_s18 + $0x8] ss:$16 sps:$4 sm:$0xff]  }
  0x18   : > { %1228 = vmatprep.subr.bf16.mxu1 %v1571_v13  ;;  %v1421_v35 = vld [vmem:[%s304_s18 + $0xc] ss:$16 sps:$4 sm:$0xff]   ;;  %646 = vmatprep.mubr.bf16.mxu0 %v1418_v33  ;;  %v1424_v36 = vld [vmem:[%s1697_s27 + $0x4] ss:$16 sps:$4 sm:$0xff]   ;;  %v1422_v38 = vld [vmem:[%s1697_s27] ss:$16 sps:$4 sm:$0xff]  }
  0x19   : > { %687 = vmatprep.mubr.bf16.mxu1 %v1421_v35  ;;  %v1427_v37 = vld [vmem:[%s1697_s27 + $0xc] ss:$16 sps:$4 sm:$0xff]   ;;  %v1425_v39 = vld [vmem:[%s1697_s27 + $0x8] ss:$16 sps:$4 sm:$0xff]   ;;  %v1430_v40 = vld [vmem:[%s1707_s30 + $0x4] ss:$16 sps:$4 sm:$0xff]  }
  0x1a   : > { %1207 = vmatpush3.bf16.msra.mxu0 %v1577_v14  ;;  %v1433_v41 = vld [vmem:[%s1707_s30 + $0xc] ss:$16 sps:$4 sm:$0xff]   ;;  %v1428_v42 = vld [vmem:[%s1707_s30] ss:$16 sps:$4 sm:$0xff]   ;;  %v1431_v43 = vld [vmem:[%s1707_s30 + $0x8] ss:$16 sps:$4 sm:$0xff]  }
  0x1b   : > { %1229 = vmatpush3.bf16.msra.mxu1 %v1583_v15  ;;  %1208 = vmatprep.subr.bf16.mxu0 %v1591_v16  ;;  %v1436_v44 = vld [vmem:[%s1718_s11 + $0x4] ss:$16 sps:$4 sm:$0xff]   ;;  %v1439_v45 = vld [vmem:[%s1718_s11 + $0xc] ss:$16 sps:$4 sm:$0xff]   ;;  %v1434_v46 = vld [vmem:[%s1718_s11] ss:$16 sps:$4 sm:$0xff]  }
  0x1c   : > { %1230 = vmatprep.subr.bf16.mxu1 %v1597_v17  ;;  %v1437_v47 = vld [vmem:[%s1718_s11 + $0x8] ss:$16 sps:$4 sm:$0xff]  }
  0x1e   : > { %1209 = vmatpush3.bf16.msra.mxu0 %v1603_v18 }
  0x1f   : > { %1231 = vmatpush3.bf16.msra.mxu1 %v1609_v19  ;;  %1210 = vmatprep.subr.bf16.mxu0 %v1615_v20 }
  0x20   : > { %1232 = vmatprep.subr.bf16.mxu1 %v1621_v21 }
  0x22   : > { %1211 = vmatpush3.bf16.msra.mxu0 %v1627_v22 }
  0x23   : > { %1233 = vmatpush3.bf16.msra.mxu1 %v1635_v23  ;;  %1212 = vmatprep.subr.bf16.mxu0 %v1641_v24 }
  0x24   : > { %1234 = vmatprep.subr.bf16.mxu1 %v1647_v25 }
  0x26   : > { %1213 = vmatpush3.bf16.msra.mxu0 %v1653_v26 }
  0x27   : > { %1235 = vmatpush3.bf16.msra.mxu1 %v1662_v27  ;;  %1214 = vmatprep.subr.bf16.mxu0 %v1668_v28 }
  0x28   : > { %1236 = vmatprep.subr.bf16.mxu1 %v1674_v29 }
  0x2a   : > { %1215 = vmatpush3.bf16.msra.mxu0 %v1684_v30 }
  0x2b   : > { %1237 = vmatpush3.bf16.msra.mxu1 %v1690_v31  ;;  %1244 = vmatprep.subr.bf16.mxu0 %v1494_v0 }
  0x2c   : > { %1266 = vmatprep.subr.bf16.mxu1 %v1499_v1 }
  0x2d   : > { %647 = vmatmul.mubr.bf16.vlgmr.msra.gmra.mxu0 %v1416_v32 }
  0x2e   : > { %688 = vmatmul.mubr.bf16.vlgmr.msra.gmra.mxu1 %v1419_v34  ;;  %1245 = vmatpush3.bf16.msra.mxu0 %v1505_v2 }
  0x2f   : > { %1267 = vmatpush3.bf16.msra.mxu1 %v1511_v3  ;;  %1246 = vmatprep.subr.bf16.mxu0 %v1517_v4 }
  0x30   : > { %1268 = vmatprep.subr.bf16.mxu1 %v1523_v5  ;;  %752 = vmatprep.mubr.bf16.mxu0 %v1424_v36 }
  0x31   : > { %793 = vmatprep.mubr.bf16.mxu1 %v1427_v37 }
  0x32   : > { %1247 = vmatpush3.bf16.msra.mxu0 %v1529_v6 }
  0x33   : > { %1269 = vmatpush3.bf16.msra.mxu1 %v1535_v7  ;;  %1248 = vmatprep.subr.bf16.mxu0 %v1541_v8 }
  0x34   : > { %1270 = vmatprep.subr.bf16.mxu1 %v1547_v9 }
  0x36   : > { %1249 = vmatpush3.bf16.msra.mxu0 %v1553_v10 }
  0x37   : > { %1271 = vmatpush3.bf16.msra.mxu1 %v1559_v11  ;;  %1250 = vmatprep.subr.bf16.mxu0 %v1565_v12 }
  0x38   : > { %1272 = vmatprep.subr.bf16.mxu1 %v1571_v13 }
  0x3a   : > { %1251 = vmatpush3.bf16.msra.mxu0 %v1577_v14 }
  0x3b   : > { %1273 = vmatpush3.bf16.msra.mxu1 %v1583_v15  ;;  %1252 = vmatprep.subr.bf16.mxu0 %v1591_v16 }
  0x3c   : > { %1274 = vmatprep.subr.bf16.mxu1 %v1597_v17 }
  0x3e   : > { %1253 = vmatpush3.bf16.msra.mxu0 %v1603_v18 }
  0x3f   : > { %1275 = vmatpush3.bf16.msra.mxu1 %v1609_v19  ;;  %1254 = vmatprep.subr.bf16.mxu0 %v1615_v20 }
  0x40   : > { %1276 = vmatprep.subr.bf16.mxu1 %v1621_v21 }
  0x42   : > { %1255 = vmatpush3.bf16.msra.mxu0 %v1627_v22 }
  0x43   : > { %1277 = vmatpush3.bf16.msra.mxu1 %v1635_v23  ;;  %1256 = vmatprep.subr.bf16.mxu0 %v1641_v24 }
  0x44   : > { %1278 = vmatprep.subr.bf16.mxu1 %v1647_v25 }
  0x46   : > { %1257 = vmatpush3.bf16.msra.mxu0 %v1653_v26 }
  0x47   : > { %1279 = vmatpush3.bf16.msra.mxu1 %v1662_v27  ;;  %1258 = vmatprep.subr.bf16.mxu0 %v1668_v28 }
  0x48   : > { %1280 = vmatprep.subr.bf16.mxu1 %v1674_v29 }
  0x4a   : > { %1259 = vmatpush3.bf16.msra.mxu0 %v1684_v30 }
  0x4b   : > { %1281 = vmatpush3.bf16.msra.mxu1 %v1690_v31  ;;  %1288 = vmatprep.subr.bf16.mxu0 %v1494_v0 }
  0x4c   : > { %1310 = vmatprep.subr.bf16.mxu1 %v1499_v1 }
  0x4d   : > { %753 = vmatmul.mubr.bf16.vlgmr.msra.gmra.mxu0 %v1422_v38 }
  0x4e   : > { %794 = vmatmul.mubr.bf16.vlgmr.msra.gmra.mxu1 %v1425_v39  ;;  %1289 = vmatpush3.bf16.msra.mxu0 %v1505_v2  ;;  %v1193_v39 = vld [vmem:[%s1835_s5] ss:$0 sm:$0xff] }
  0x4f   : > { %1311 = vmatpush3.bf16.msra.mxu1 %v1511_v3  ;;  %1290 = vmatprep.subr.bf16.mxu0 %v1517_v4 }
  0x50   : > { %1312 = vmatprep.subr.bf16.mxu1 %v1523_v5  ;;  %858 = vmatprep.mubr.bf16.mxu0 %v1430_v40 }
  0x51   : > { %899 = vmatprep.mubr.bf16.mxu1 %v1433_v41 }
  0x52   : > { %1291 = vmatpush3.bf16.msra.mxu0 %v1529_v6 }
  0x53   : > { %1313 = vmatpush3.bf16.msra.mxu1 %v1535_v7  ;;  %1292 = vmatprep.subr.bf16.mxu0 %v1541_v8 }
  0x54   : > { %1314 = vmatprep.subr.bf16.mxu1 %v1547_v9 }
  0x56   : > { %1293 = vmatpush3.bf16.msra.mxu0 %v1553_v10 }
  0x57   : > { %1315 = vmatpush3.bf16.msra.mxu1 %v1559_v11  ;;  %1294 = vmatprep.subr.bf16.mxu0 %v1565_v12 }
  0x58   : > { %1316 = vmatprep.subr.bf16.mxu1 %v1571_v13 }
  0x5a   : > { %1295 = vmatpush3.bf16.msra.mxu0 %v1577_v14 }
  0x5b   : > { %1317 = vmatpush3.bf16.msra.mxu1 %v1583_v15  ;;  %1296 = vmatprep.subr.bf16.mxu0 %v1591_v16 }
  0x5c   : > { %1318 = vmatprep.subr.bf16.mxu1 %v1597_v17 }
  0x5e   : > { %1297 = vmatpush3.bf16.msra.mxu0 %v1603_v18 }
  0x5f   : > { %1319 = vmatpush3.bf16.msra.mxu1 %v1609_v19  ;;  %1298 = vmatprep.subr.bf16.mxu0 %v1615_v20 }
  0x60   : > { %1320 = vmatprep.subr.bf16.mxu1 %v1621_v21 }
  0x62   : > { %1299 = vmatpush3.bf16.msra.mxu0 %v1627_v22 }
  0x63   : > { %1321 = vmatpush3.bf16.msra.mxu1 %v1635_v23  ;;  %1300 = vmatprep.subr.bf16.mxu0 %v1641_v24 }
  0x64   : > { %1322 = vmatprep.subr.bf16.mxu1 %v1647_v25 }
  0x66   : > { %1301 = vmatpush3.bf16.msra.mxu0 %v1653_v26 }
  0x67   : > { %1323 = vmatpush3.bf16.msra.mxu1 %v1662_v27  ;;  %1302 = vmatprep.subr.bf16.mxu0 %v1668_v28 }
  0x68   : > { %1324 = vmatprep.subr.bf16.mxu1 %v1674_v29 }
  0x6a   : > { %1303 = vmatpush3.bf16.msra.mxu0 %v1684_v30 }
  0x6b   : > { %1325 = vmatpush3.bf16.msra.mxu1 %v1690_v31  ;;  %1332 = vmatprep.subr.bf16.mxu0 %v1494_v0 }
  0x6c   : > { %1354 = vmatprep.subr.bf16.mxu1 %v1499_v1 }
  0x6d   : > { %859 = vmatmul.mubr.bf16.vlgmr.msra.gmra.mxu0 %v1428_v42 }
  0x6e   : > { %900 = vmatmul.mubr.bf16.vlgmr.msra.gmra.mxu1 %v1431_v43  ;;  %1333 = vmatpush3.bf16.msra.mxu0 %v1505_v2 }
  0x6f   : > { %1355 = vmatpush3.bf16.msra.mxu1 %v1511_v3  ;;  %1334 = vmatprep.subr.bf16.mxu0 %v1517_v4 }
  0x70   : > { %1356 = vmatprep.subr.bf16.mxu1 %v1523_v5  ;;  %964 = vmatprep.mubr.bf16.mxu0 %v1436_v44 }
  0x71   : > { %1005 = vmatprep.mubr.bf16.mxu1 %v1439_v45 }
  0x72   : > { %1335 = vmatpush3.bf16.msra.mxu0 %v1529_v6 }
  0x73   : > { %1357 = vmatpush3.bf16.msra.mxu1 %v1535_v7  ;;  %1336 = vmatprep.subr.bf16.mxu0 %v1541_v8 }
  0x74   : > { %1358 = vmatprep.subr.bf16.mxu1 %v1547_v9 }
  0x76   : > { %1337 = vmatpush3.bf16.msra.mxu0 %v1553_v10 }
  0x77   : > { %1359 = vmatpush3.bf16.msra.mxu1 %v1559_v11  ;;  %1338 = vmatprep.subr.bf16.mxu0 %v1565_v12 }
  0x78   : > { %1360 = vmatprep.subr.bf16.mxu1 %v1571_v13 }
  0x7a   : > { %1339 = vmatpush3.bf16.msra.mxu0 %v1577_v14 }
  0x7b   : > { %1361 = vmatpush3.bf16.msra.mxu1 %v1583_v15  ;;  %1340 = vmatprep.subr.bf16.mxu0 %v1591_v16 }
  0x7c   : > { %1362 = vmatprep.subr.bf16.mxu1 %v1597_v17 }
  0x7e   : > { %1341 = vmatpush3.bf16.msra.mxu0 %v1603_v18 }
  0x7f   : > { %1363 = vmatpush3.bf16.msra.mxu1 %v1609_v19  ;;  %1342 = vmatprep.subr.bf16.mxu0 %v1615_v20 }
  0x80   : > { %1364 = vmatprep.subr.bf16.mxu1 %v1621_v21 }
  0x82   : > { %1343 = vmatpush3.bf16.msra.mxu0 %v1627_v22 }
  0x83   : > { %1365 = vmatpush3.bf16.msra.mxu1 %v1635_v23  ;;  %1344 = vmatprep.subr.bf16.mxu0 %v1641_v24 }
  0x84   : > { %1366 = vmatprep.subr.bf16.mxu1 %v1647_v25 }
  0x86   : > { %1345 = vmatpush3.bf16.msra.mxu0 %v1653_v26 }
  0x87   : > { %1367 = vmatpush3.bf16.msra.mxu1 %v1662_v27  ;;  %1346 = vmatprep.subr.bf16.mxu0 %v1668_v28 }
  0x88   : > { %1368 = vmatprep.subr.bf16.mxu1 %v1674_v29 }
  0x8a   : > { %1347 = vmatpush3.bf16.msra.mxu0 %v1684_v30 }
  0x8b   : > { %1369 = vmatpush3.bf16.msra.mxu1 %v1690_v31 }
  0x8d   : > { %965 = vmatmul.mubr.bf16.vlgmr.msra.gmra.mxu0 %v1434_v46 }
  0x8e   : > { %1006 = vmatmul.mubr.bf16.vlgmr.msra.gmra.mxu1 %v1437_v47 }
  0xed   : > { %v1216_v48 = vpop.f32.mrf.mxu0 }
  0xee   : > { %v1238_v49 = vpop.f32.mrf.mxu1 }
  0xef   : > { %v1217_v50 = vpop.f32.mrf.mxu0 }
  0xf0   : > { %v1239_v51 = vpop.f32.mrf.mxu1  ;;  %v1218_v11 = vadd.f32 %v1217_v50, %v1216_v48 }
  0xf1   : > { %v1219_v52 = vpop.f32.mrf.mxu0  ;;  %v1240_v12 = vadd.f32 %v1239_v51, %v1238_v49 }
  0xf2   : > { %v1241_v53 = vpop.f32.mrf.mxu1 }
  0xf3   : > { %v1220_v54 = vpop.f32.mrf.mxu0  ;;  %v690_v24 = vadd.f32 %v1240_v12, %v1218_v11 }
  0xf4   : > { %v1242_v55 = vpop.f32.mrf.mxu1  ;;  %v1221_v25 = vadd.f32 %v1220_v54, %v1219_v52 }
  0xf5   : > { %v1243_v26 = vadd.f32 %v1242_v55, %v1241_v53 }
  0xf7   : > { %v693_v40 = vadd.f32 %v1243_v26, %v1221_v25 }
 0x10d   : > { %v1260_v56 = vpop.f32.mrf.mxu0 }
 0x10e   : > { %v1282_v57 = vpop.f32.mrf.mxu1 }
 0x10f   : > { %v1261_v58 = vpop.f32.mrf.mxu0 }
 0x110   : > { %v1283_v59 = vpop.f32.mrf.mxu1  ;;  %v1262_v8 = vadd.f32 %v1261_v58, %v1260_v56 }
 0x111   : > { %v1263_v60 = vpop.f32.mrf.mxu0  ;;  %v1284_v9 = vadd.f32 %v1283_v59, %v1282_v57 }
 0x112   : > { %v1285_v61 = vpop.f32.mrf.mxu1 }
 0x113   : > { %v1264_v62 = vpop.f32.mrf.mxu0  ;;  %v796_v19 = vadd.f32 %v1284_v9, %v1262_v8 }
 0x114   : > { %v1286_v63 = vpop.f32.mrf.mxu1  ;;  %v1265_v20 = vadd.f32 %v1264_v62, %v1263_v60 }
 0x115   : > { %v1287_v21 = vadd.f32 %v1286_v63, %v1285_v61  ;;  %v1014_v35 = vmax.f32 %v690_v24, %v796_v19 }
 0x117   : > { %v799_v36 = vadd.f32 %v1287_v21, %v1265_v20 }
 0x119   : > { %v1015_v44 = vmax.f32 %v693_v40, %v799_v36 }
 0x12d   : > { %v1304_v0 = vpop.f32.mrf.mxu0 }
 0x12e   : > { %v1326_v1 = vpop.f32.mrf.mxu1 }
 0x12f   : > { %v1305_v2 = vpop.f32.mrf.mxu0 }
 0x130   : > { %v1327_v3 = vpop.f32.mrf.mxu1  ;;  %v1306_v14 = vadd.f32 %v1305_v2, %v1304_v0 }
 0x131   : > { %v1307_v4 = vpop.f32.mrf.mxu0  ;;  %v1328_v15 = vadd.f32 %v1327_v3, %v1326_v1 }
 0x132   : > { %v1329_v5 = vpop.f32.mrf.mxu1 }
 0x133   : > { %v1308_v6 = vpop.f32.mrf.mxu0  ;;  %v902_v28 = vadd.f32 %v1328_v15, %v1306_v14 }
 0x134   : > { %v1330_v7 = vpop.f32.mrf.mxu1  ;;  %v1309_v29 = vadd.f32 %v1308_v6, %v1307_v4 }
 0x135   : > { %v1331_v30 = vadd.f32 %v1330_v7, %v1329_v5 }
 0x137   : > { %v905_v41 = vadd.f32 %v1331_v30, %v1309_v29 }
 0x14d   : > { %v1348_v10 = vpop.f32.mrf.mxu0 }
 0x14e   : > { %v1370_v13 = vpop.f32.mrf.mxu1 }
 0x14f   : > { %v1349_v16 = vpop.f32.mrf.mxu0 }
 0x150   : > { %v1350_v17 = vadd.f32 %v1349_v16, %v1348_v10  ;;  %v1371_v18 = vpop.f32.mrf.mxu1 }
 0x151   : > { %v1372_v22 = vadd.f32 %v1371_v18, %v1370_v13  ;;  %v1351_v23 = vpop.f32.mrf.mxu0 }
 0x152   : > { %v1373_v27 = vpop.f32.mrf.mxu1 }
 0x153   : > { %v1008_v31 = vadd.f32 %v1372_v22, %v1350_v17  ;;  %v1352_v32 = vpop.f32.mrf.mxu0 }
 0x154   : > { %v1353_v33 = vadd.f32 %v1352_v32, %v1351_v23  ;;  %v1374_v34 = vpop.f32.mrf.mxu1 }
 0x155   : > { %v1016_v37 = vmax.f32 %v902_v28, %v1008_v31  ;;  %v1375_v38 = vadd.f32 %v1374_v34, %v1373_v27 }
 0x157   : > { %v1018_v42 = vmax.f32 %v1014_v35, %v1016_v37  ;;  %v1011_v43 = vadd.f32 %v1375_v38, %v1353_v33 }
 0x159   : > { %v1027_v45 = vadd.f32 %v1193_v39, %v1018_v42  ;;  %v1017_v46 = vmax.f32 %v905_v41, %v1011_v43 }
 0x15b   : > { %v1029_v47 = vmax.f32 %v1027_v45, 0.0  ;;  %v1019_v48 = vmax.f32 %v1015_v44, %v1017_v46 }
 0x15d   : > { %1032 = vst.msk [vmem:[%s331_s22] sm:$0xff] %vm1031_vm0, %v1029_v47  ;;  %v1028_v49 = vadd.f32 %v1193_v39, %v1019_v48 }
 0x15f   : > { %v1030_v50 = vmax.f32 %v1028_v49, 0.0 }
 0x161   : > { %1033 = vst.msk [vmem:[%s331_s22 + $0x8] sm:$0xff] %vm1031_vm0, %v1030_v50 }
 0x162 PF: > { %s16_s21 = sadd.s32 1, %s1446_s21  }
 0x163   : > { %p13_p4 = scmp.ge.s32.totalorder %s16_s21, 4  }
 0x165   :  { %15 = sbr.rel (!%p13_p4) target bundleno = 1 (0x1), region = 83 }

// kernel: supcon_mlp_forward.5
= control target key start
LH: loop header
LB: loop body
LE: loop exit
PB: predicated region body
PF: predicated region fallthrough
CT: control target
= control target key end

     0   :  { %vm1279_vm0 = vcmask 261120   ;;  %s6271_s1 = inlined_call_operand.vmem [shape: bf16[800,512], index: 1, kind: input, shape index: {}]   ;;  %s6272_s0 = inlined_call_operand.vmem [shape: bf16[8,800], index: 0, kind: input, shape index: {}]   ;;  %s6273_s3 = inlined_call_operand.vmem [shape: bf16[512,512], index: 3, kind: input, shape index: {}]   ;;  %s6274_s2 = inlined_call_operand.vmem [shape: f32[1,512], index: 2, kind: input, shape index: {}]   ;;  %s6275_s7 = inlined_call_operand.vmem [shape: f32[8,512], index: 7, kind: output, shape index: {0}]   ;;  %s6276_s5 = inlined_call_operand.vmem [shape: bf16[512,512], index: 5, kind: input, shape index: {}]   ;;  %s6277_s4 = inlined_call_operand.vmem [shape: f32[1,512], index: 4, kind: input, shape index: {}]   ;;  %s6278_s6 = inlined_call_operand.vmem [shape: f32[1,512], index: 6, kind: input, shape index: {}]   ;;  %s6279_s8 = inlined_call_operand.vmem [shape: f32[8,512], index: 8, kind: output, shape index: {1}]  }
   0x1   :  { %v4017_v0 = vld [vmem:[%s6271_s1 + $0xe4] ss:$16 sps:$4 sm:$0xff]   ;;  %v4021_v2 = vld [vmem:[%s6271_s1 + $0xe0] ss:$16 sps:$4 sm:$0xff]   ;;  %v30_v50 = vld [vmem:[%s6272_s0 + $0x8] sm:$0xff] }
   0x2   :  { %v4019_v1 = vld [vmem:[%s6271_s1 + $0x2e4] ss:$16 sps:$4 sm:$0xff]   ;;  %1283 = vmatprep.subr.bf16.mxu0 %v4017_v0  ;;  %v4022_v3 = vld [vmem:[%s6271_s1 + $0x2e0] ss:$16 sps:$4 sm:$0xff]   ;;  %v4909_v52 = vcombine.high %v30_v50, %v30_v50 }
   0x3   :  { %1324 = vmatprep.subr.bf16.mxu1 %v4019_v1  ;;  %v4023_v4 = vld [vmem:[%s6271_s1 + $0xc4] ss:$16 sps:$4 sm:$0xff]   ;;  %1284 = vmatpush1.bf16.msra.mxu0 %v4021_v2  ;;  %v4027_v6 = vld [vmem:[%s6271_s1 + $0xc0] ss:$16 sps:$4 sm:$0xff]  }
   0x4   :  { %1325 = vmatpush1.bf16.msra.mxu1 %v4022_v3  ;;  %v4025_v5 = vld [vmem:[%s6271_s1 + $0x2c4] ss:$16 sps:$4 sm:$0xff]   ;;  %1285 = vmatprep.subr.bf16.mxu0 %v4023_v4  ;;  %v4028_v7 = vld [vmem:[%s6271_s1 + $0x2c0] ss:$16 sps:$4 sm:$0xff]  }
   0x5   :  { %1326 = vmatprep.subr.bf16.mxu1 %v4025_v5  ;;  %v4029_v8 = vld [vmem:[%s6271_s1 + $0xa4] ss:$16 sps:$4 sm:$0xff]   ;;  %v4033_v10 = vld [vmem:[%s6271_s1 + $0xa0] ss:$16 sps:$4 sm:$0xff]   ;;  %1356 = vmatprep.mubr.bf16.mxu1 %v4909_v52 }
   0x6   :  { %v4031_v9 = vld [vmem:[%s6271_s1 + $0x2a4] ss:$16 sps:$4 sm:$0xff]   ;;  %v4034_v11 = vld [vmem:[%s6271_s1 + $0x2a0] ss:$16 sps:$4 sm:$0xff]  }
   0x7   :  { %1286 = vmatpush1.bf16.msra.mxu0 %v4027_v6  ;;  %v4035_v12 = vld [vmem:[%s6271_s1 + $0x84] ss:$16 sps:$4 sm:$0xff]   ;;  %v4039_v14 = vld [vmem:[%s6271_s1 + $0x80] ss:$16 sps:$4 sm:$0xff]  }
   0x8   :  { %1327 = vmatpush1.bf16.msra.mxu1 %v4028_v7  ;;  %1287 = vmatprep.subr.bf16.mxu0 %v4029_v8  ;;  %v4037_v13 = vld [vmem:[%s6271_s1 + $0x284] ss:$16 sps:$4 sm:$0xff]   ;;  %v4040_v15 = vld [vmem:[%s6271_s1 + $0x280] ss:$16 sps:$4 sm:$0xff]   ;;  %v4966_v7 = vcombine.low %v30_v50, %v30_v50 }
   0x9   :  { %1328 = vmatprep.subr.bf16.mxu1 %v4031_v9  ;;  %v4041_v16 = vld [vmem:[%s6271_s1 + $0x64] ss:$16 sps:$4 sm:$0xff]   ;;  %v4045_v18 = vld [vmem:[%s6271_s1 + $0x60] ss:$16 sps:$4 sm:$0xff]  }
   0xa   :  { %v4043_v17 = vld [vmem:[%s6271_s1 + $0x264] ss:$16 sps:$4 sm:$0xff]   ;;  %v4046_v19 = vld [vmem:[%s6271_s1 + $0x260] ss:$16 sps:$4 sm:$0xff]  }
   0xb   :  { %1288 = vmatpush1.bf16.msra.mxu0 %v4033_v10  ;;  %v4047_v20 = vld [vmem:[%s6271_s1 + $0x44] ss:$16 sps:$4 sm:$0xff]   ;;  %v4051_v22 = vld [vmem:[%s6271_s1 + $0x40] ss:$16 sps:$4 sm:$0xff]  }
   0xc   :  { %1329 = vmatpush1.bf16.msra.mxu1 %v4034_v11  ;;  %1289 = vmatprep.subr.bf16.mxu0 %v4035_v12  ;;  %v4049_v21 = vld [vmem:[%s6271_s1 + $0x244] ss:$16 sps:$4 sm:$0xff]   ;;  %v4052_v23 = vld [vmem:[%s6271_s1 + $0x240] ss:$16 sps:$4 sm:$0xff]  }
   0xd   :  { %1330 = vmatprep.subr.bf16.mxu1 %v4037_v13  ;;  %v4053_v24 = vld [vmem:[%s6271_s1 + $0x24] ss:$16 sps:$4 sm:$0xff]   ;;  %v4057_v26 = vld [vmem:[%s6271_s1 + $0x20] ss:$16 sps:$4 sm:$0xff]  }
   0xe   :  { %v4055_v25 = vld [vmem:[%s6271_s1 + $0x224] ss:$16 sps:$4 sm:$0xff]   ;;  %v4058_v27 = vld [vmem:[%s6271_s1 + $0x220] ss:$16 sps:$4 sm:$0xff]  }
   0xf   :  { %1290 = vmatpush1.bf16.msra.mxu0 %v4039_v14  ;;  %v4059_v28 = vld [vmem:[%s6271_s1 + $0x4] ss:$16 sps:$4 sm:$0xff]   ;;  %v4063_v30 = vld [vmem:[%s6271_s1] ss:$16 sps:$4 sm:$0xff]  }
  0x10   :  { %1331 = vmatpush1.bf16.msra.mxu1 %v4040_v15  ;;  %1291 = vmatprep.subr.bf16.mxu0 %v4041_v16  ;;  %v4061_v29 = vld [vmem:[%s6271_s1 + $0x204] ss:$16 sps:$4 sm:$0xff]   ;;  %v4064_v31 = vld [vmem:[%s6271_s1 + $0x200] ss:$16 sps:$4 sm:$0xff]   ;;  %v4135_v15 = vld [vmem:[%s6271_s1 + $0xec] ss:$16 sps:$4 sm:$0xff]  }
  0x11   :  { %1332 = vmatprep.subr.bf16.mxu1 %v4043_v17  ;;  %v4065_v32 = vld [vmem:[%s6271_s1 + $0x1e4] ss:$16 sps:$4 sm:$0xff]   ;;  %v4069_v34 = vld [vmem:[%s6271_s1 + $0x1e0] ss:$16 sps:$4 sm:$0xff]   ;;  %v4997_v16 = vld [vmem:[%s6272_s0 + $0x18] ss:$0 sps:$4 sm:$0xff]  }
  0x12   :  { %v4067_v33 = vld [vmem:[%s6271_s1 + $0x3e4] ss:$16 sps:$4 sm:$0xff]   ;;  %v4070_v35 = vld [vmem:[%s6271_s1 + $0x3e0] ss:$16 sps:$4 sm:$0xff]   ;;  %v4708_v17 = vmov 0  }
  0x13   :  { %1292 = vmatpush1.bf16.msra.mxu0 %v4045_v18  ;;  %v4071_v36 = vld [vmem:[%s6271_s1 + $0x1c4] ss:$16 sps:$4 sm:$0xff]   ;;  %v4075_v38 = vld [vmem:[%s6271_s1 + $0x1c0] ss:$16 sps:$4 sm:$0xff]  }
  0x14   :  { %1333 = vmatpush1.bf16.msra.mxu1 %v4046_v19  ;;  %1293 = vmatprep.subr.bf16.mxu0 %v4047_v20  ;;  %v4073_v37 = vld [vmem:[%s6271_s1 + $0x3c4] ss:$16 sps:$4 sm:$0xff]   ;;  %v4076_v39 = vld [vmem:[%s6271_s1 + $0x3c0] ss:$16 sps:$4 sm:$0xff]   ;;  %v4133_v19 = vld [vmem:[%s6271_s1 + $0xe8] ss:$16 sps:$4 sm:$0xff]  }
  0x15   :  { %1334 = vmatprep.subr.bf16.mxu1 %v4049_v21  ;;  %v4077_v40 = vld [vmem:[%s6271_s1 + $0x1a4] ss:$16 sps:$4 sm:$0xff]   ;;  %v4081_v42 = vld [vmem:[%s6271_s1 + $0x1a0] ss:$16 sps:$4 sm:$0xff]   ;;  %v4141_v21 = vld [vmem:[%s6271_s1 + $0xcc] ss:$16 sps:$4 sm:$0xff]  }
  0x16   :  { %v4079_v41 = vld [vmem:[%s6271_s1 + $0x3a4] ss:$16 sps:$4 sm:$0xff]   ;;  %v4082_v43 = vld [vmem:[%s6271_s1 + $0x3a0] ss:$16 sps:$4 sm:$0xff]  }
  0x17   :  { %1294 = vmatpush1.bf16.msra.mxu0 %v4051_v22  ;;  %v4083_v44 = vld [vmem:[%s6271_s1 + $0x184] ss:$16 sps:$4 sm:$0xff]   ;;  %v4087_v46 = vld [vmem:[%s6271_s1 + $0x180] ss:$16 sps:$4 sm:$0xff]  }
  0x18   :  { %1335 = vmatpush1.bf16.msra.mxu1 %v4052_v23  ;;  %1295 = vmatprep.subr.bf16.mxu0 %v4053_v24  ;;  %v4085_v45 = vld [vmem:[%s6271_s1 + $0x384] ss:$16 sps:$4 sm:$0xff]   ;;  %v4088_v48 = vld [vmem:[%s6271_s1 + $0x380] ss:$16 sps:$4 sm:$0xff]   ;;  %v4139_v23 = vld [vmem:[%s6271_s1 + $0xc8] ss:$16 sps:$4 sm:$0xff]  }
  0x19   :  { %1336 = vmatprep.subr.bf16.mxu1 %v4055_v25  ;;  %v29_v47 = vld [vmem:[%s6272_s0] sm:$0xff]  ;;  %v4147_v25 = vld [vmem:[%s6271_s1 + $0xac] ss:$16 sps:$4 sm:$0xff]  }
  0x1a   :  { %v4901_v49 = vcombine.high %v29_v47, %v29_v47  ;;  %v4089_v51 = vld [vmem:[%s6271_s1 + $0x164] ss:$16 sps:$4 sm:$0xff]   ;;  %v4093_v54 = vld [vmem:[%s6271_s1 + $0x160] ss:$16 sps:$4 sm:$0xff]   ;;  %v4964_v6 = vcombine.low %v29_v47, %v29_v47  ;;  %v4177_v47 = vld [vmem:[%s6271_s1 + $0xc] ss:$16 sps:$4 sm:$0xff]  }
  0x1b   :  { %1296 = vmatpush1.bf16.msra.mxu0 %v4057_v26  ;;  %v4091_v53 = vld [vmem:[%s6271_s1 + $0x364] ss:$16 sps:$4 sm:$0xff]   ;;  %v4094_v55 = vld [vmem:[%s6271_s1 + $0x360] ss:$16 sps:$4 sm:$0xff]  }
  0x1c   :  { %1337 = vmatpush1.bf16.msra.mxu1 %v4058_v27  ;;  %1297 = vmatprep.subr.bf16.mxu0 %v4059_v28  ;;  %v4095_v56 = vld [vmem:[%s6271_s1 + $0x144] ss:$16 sps:$4 sm:$0xff]   ;;  %v4099_v58 = vld [vmem:[%s6271_s1 + $0x140] ss:$16 sps:$4 sm:$0xff]   ;;  %v4145_v27 = vld [vmem:[%s6271_s1 + $0xa8] ss:$16 sps:$4 sm:$0xff]  }
  0x1d   :  { %1338 = vmatprep.subr.bf16.mxu1 %v4061_v29  ;;  %1315 = vmatprep.mubr.bf16.mxu0 %v4901_v49  ;;  %v4097_v57 = vld [vmem:[%s6271_s1 + $0x344] ss:$16 sps:$4 sm:$0xff]   ;;  %v4100_v59 = vld [vmem:[%s6271_s1 + $0x340] ss:$16 sps:$4 sm:$0xff]   ;;  %v4153_v29 = vld [vmem:[%s6271_s1 + $0x8c] ss:$16 sps:$4 sm:$0xff]  }
  0x1e   :  { %v4101_v60 = vld [vmem:[%s6271_s1 + $0x124] ss:$16 sps:$4 sm:$0xff]   ;;  %v4105_v62 = vld [vmem:[%s6271_s1 + $0x120] ss:$16 sps:$4 sm:$0xff]  }
  0x1f   :  { %1298 = vmatpush1.bf16.msra.mxu0 %v4063_v30  ;;  %v4103_v61 = vld [vmem:[%s6271_s1 + $0x324] ss:$16 sps:$4 sm:$0xff]   ;;  %v4106_v63 = vld [vmem:[%s6271_s1 + $0x320] ss:$16 sps:$4 sm:$0xff]  }
  0x20   :  { %1339 = vmatpush1.bf16.msra.mxu1 %v4064_v31  ;;  %1299 = vmatprep.subr.bf16.mxu0 %v4065_v32  ;;  %v4107_v0 = vld [vmem:[%s6271_s1 + $0x104] ss:$16 sps:$4 sm:$0xff]   ;;  %v4111_v2 = vld [vmem:[%s6271_s1 + $0x100] ss:$16 sps:$4 sm:$0xff]   ;;  %v4151_v31 = vld [vmem:[%s6271_s1 + $0x88] ss:$16 sps:$4 sm:$0xff]  }
  0x21   :  { %1340 = vmatprep.subr.bf16.mxu1 %v4067_v33  ;;  %v4109_v1 = vld [vmem:[%s6271_s1 + $0x304] ss:$16 sps:$4 sm:$0xff]   ;;  %v4112_v3 = vld [vmem:[%s6271_s1 + $0x300] ss:$16 sps:$4 sm:$0xff]   ;;  %v4159_v33 = vld [vmem:[%s6271_s1 + $0x6c] ss:$16 sps:$4 sm:$0xff]  }
  0x22   :  { %v4120_v4 = vld [vmem:[%s6271_s1 + $0x4e4] ss:$16 sps:$4 sm:$0xff]   ;;  %v4118_v8 = vld [vmem:[%s6271_s1 + $0x4e0] ss:$16 sps:$4 sm:$0xff]  }
  0x23   :  { %1300 = vmatpush2.bf16.msra.mxu0 %v4069_v34  ;;  %v4123_v5 = vld [vmem:[%s6271_s1 + $0x624] ss:$16 sps:$4 sm:$0xff]   ;;  %v4121_v9 = vld [vmem:[%s6271_s1 + $0x620] ss:$16 sps:$4 sm:$0xff]  }
  0x24   :  { %1341 = vmatpush2.bf16.msra.mxu1 %v4070_v35  ;;  %1301 = vmatprep.subr.bf16.mxu0 %v4071_v36  ;;  %v4126_v10 = vld [vmem:[%s6271_s1 + $0x4c4] ss:$16 sps:$4 sm:$0xff]   ;;  %v4124_v12 = vld [vmem:[%s6271_s1 + $0x4c0] ss:$16 sps:$4 sm:$0xff]  }
  0x25   :  { %1342 = vmatprep.subr.bf16.mxu1 %v4073_v37  ;;  %v4129_v11 = vld [vmem:[%s6271_s1 + $0x604] ss:$16 sps:$4 sm:$0xff]   ;;  %v4127_v13 = vld [vmem:[%s6271_s1 + $0x600] ss:$16 sps:$4 sm:$0xff]   ;;  %v4157_v37 = vld [vmem:[%s6271_s1 + $0x68] ss:$16 sps:$4 sm:$0xff]  }
  0x26   :  { %v4132_v14 = vld [vmem:[%s6271_s1 + $0x4a4] ss:$16 sps:$4 sm:$0xff]   ;;  %v4130_v18 = vld [vmem:[%s6271_s1 + $0x4a0] ss:$16 sps:$4 sm:$0xff]  }
  0x27   :  { %1302 = vmatpush2.bf16.msra.mxu0 %v4075_v38  ;;  %v4138_v20 = vld [vmem:[%s6271_s1 + $0x484] ss:$16 sps:$4 sm:$0xff]   ;;  %v4136_v22 = vld [vmem:[%s6271_s1 + $0x480] ss:$16 sps:$4 sm:$0xff]  }
  0x28   :  { %1343 = vmatpush2.bf16.msra.mxu1 %v4076_v39  ;;  %1303 = vmatprep.subr.bf16.mxu0 %v4077_v40  ;;  %v4144_v24 = vld [vmem:[%s6271_s1 + $0x464] ss:$16 sps:$4 sm:$0xff]   ;;  %v4142_v26 = vld [vmem:[%s6271_s1 + $0x460] ss:$16 sps:$4 sm:$0xff]   ;;  %v4165_v39 = vld [vmem:[%s6271_s1 + $0x4c] ss:$16 sps:$4 sm:$0xff]  }
  0x29   :  { %1344 = vmatprep.subr.bf16.mxu1 %v4079_v41  ;;  %v4150_v28 = vld [vmem:[%s6271_s1 + $0x444] ss:$16 sps:$4 sm:$0xff]   ;;  %v4148_v30 = vld [vmem:[%s6271_s1 + $0x440] ss:$16 sps:$4 sm:$0xff]   ;;  %v4163_v41 = vld [vmem:[%s6271_s1 + $0x48] ss:$16 sps:$4 sm:$0xff]  }
  0x2a   :  { %v4156_v32 = vld [vmem:[%s6271_s1 + $0x424] ss:$16 sps:$4 sm:$0xff]   ;;  %v4154_v35 = vld [vmem:[%s6271_s1 + $0x420] ss:$16 sps:$4 sm:$0xff]  }
  0x2b   :  { %1304 = vmatpush2.bf16.msra.mxu0 %v4081_v42  ;;  %v5054_v34 = vld [vmem:[%s6272_s0 + $0x10] sm:$0xff] }
  0x2c   :  { %1345 = vmatpush2.bf16.msra.mxu1 %v4082_v43  ;;  %1305 = vmatprep.subr.bf16.mxu0 %v4083_v44  ;;  %v5061_v36 = vcombine.high %v5054_v34, %v5054_v34  ;;  %v4162_v38 = vld [vmem:[%s6271_s1 + $0x404] ss:$16 sps:$4 sm:$0xff]   ;;  %v4160_v40 = vld [vmem:[%s6271_s1 + $0x400] ss:$16 sps:$4 sm:$0xff]   ;;  %v4171_v43 = vld [vmem:[%s6271_s1 + $0x2c] ss:$16 sps:$4 sm:$0xff]  }
  0x2d   :  { %1346 = vmatprep.subr.bf16.mxu1 %v4085_v45  ;;  %v4168_v42 = vld [vmem:[%s6271_s1 + $0x5e4] ss:$16 sps:$4 sm:$0xff]   ;;  %v4166_v44 = vld [vmem:[%s6271_s1 + $0x5e0] ss:$16 sps:$4 sm:$0xff]   ;;  %v4169_v45 = vld [vmem:[%s6271_s1 + $0x28] ss:$16 sps:$4 sm:$0xff]  }
  0x2e   :  { %v4180_v50 = vld [vmem:[%s6271_s1 + $0x5a4] ss:$16 sps:$4 sm:$0xff]  }
  0x2f   :  { %1306 = vmatpush2.bf16.msra.mxu0 %v4087_v46  ;;  %v4174_v46 = vld [vmem:[%s6271_s1 + $0x5c4] ss:$16 sps:$4 sm:$0xff]  }
  0x30   :  { %1347 = vmatpush2.bf16.msra.mxu1 %v4088_v48  ;;  %1307 = vmatprep.subr.bf16.mxu0 %v4089_v51  ;;  %v4172_v48 = vld [vmem:[%s6271_s1 + $0x5c0] ss:$16 sps:$4 sm:$0xff]   ;;  %v4183_v51 = vld [vmem:[%s6271_s1 + $0x1ec] ss:$16 sps:$4 sm:$0xff]  }
  0x31   :  { %1348 = vmatprep.subr.bf16.mxu1 %v4091_v53  ;;  %v4178_v53 = vld [vmem:[%s6271_s1 + $0x5a0] ss:$16 sps:$4 sm:$0xff]  }
  0x33   :  { %1308 = vmatpush2.bf16.msra.mxu0 %v4093_v54  ;;  %v4181_v54 = vld [vmem:[%s6271_s1 + $0x1e8] ss:$16 sps:$4 sm:$0xff]  }
  0x34   :  { %1349 = vmatpush2.bf16.msra.mxu1 %v4094_v55  ;;  %1309 = vmatprep.subr.bf16.mxu0 %v4095_v56  ;;  %v4186_v55 = vld [vmem:[%s6271_s1 + $0x584] ss:$16 sps:$4 sm:$0xff]   ;;  %v4189_v56 = vld [vmem:[%s6271_s1 + $0x1cc] ss:$16 sps:$4 sm:$0xff]  }
  0x35   :  { %1350 = vmatprep.subr.bf16.mxu1 %v4097_v57  ;;  %v4184_v57 = vld [vmem:[%s6271_s1 + $0x580] ss:$16 sps:$4 sm:$0xff]  }
  0x37   :  { %1310 = vmatpush2.bf16.msra.mxu0 %v4099_v58  ;;  %v4187_v58 = vld [vmem:[%s6271_s1 + $0x1c8] ss:$16 sps:$4 sm:$0xff]  }
  0x38   :  { %1351 = vmatpush2.bf16.msra.mxu1 %v4100_v59  ;;  %1311 = vmatprep.subr.bf16.mxu0 %v4101_v60  ;;  %v4192_v59 = vld [vmem:[%s6271_s1 + $0x564] ss:$16 sps:$4 sm:$0xff]   ;;  %v4195_v60 = vld [vmem:[%s6271_s1 + $0x1ac] ss:$16 sps:$4 sm:$0xff]  }
  0x39   :  { %1352 = vmatprep.subr.bf16.mxu1 %v4103_v61  ;;  %v4190_v61 = vld [vmem:[%s6271_s1 + $0x560] ss:$16 sps:$4 sm:$0xff]  }
  0x3b   :  { %1312 = vmatpush2.bf16.msra.mxu0 %v4105_v62  ;;  %v4193_v62 = vld [vmem:[%s6271_s1 + $0x1a8] ss:$16 sps:$4 sm:$0xff]  }
  0x3c   :  { %1353 = vmatpush2.bf16.msra.mxu1 %v4106_v63  ;;  %1313 = vmatprep.subr.bf16.mxu0 %v4107_v0  ;;  %v4198_v63 = vld [vmem:[%s6271_s1 + $0x544] ss:$16 sps:$4 sm:$0xff]   ;;  %v4201_v0 = vld [vmem:[%s6271_s1 + $0x18c] ss:$16 sps:$4 sm:$0xff]  }
  0x3d   :  { %1354 = vmatprep.subr.bf16.mxu1 %v4109_v1  ;;  %v4196_v1 = vld [vmem:[%s6271_s1 + $0x540] ss:$16 sps:$4 sm:$0xff]  }
  0x3f   :  { %1314 = vmatpush2.bf16.msra.mxu0 %v4111_v2  ;;  %v4199_v2 = vld [vmem:[%s6271_s1 + $0x188] ss:$16 sps:$4 sm:$0xff]  }
  0x40   :  { %1355 = vmatpush2.bf16.msra.mxu1 %v4112_v3  ;;  %1365 = vmatprep.subr.bf16.mxu0 %v4120_v4  ;;  %v4204_v3 = vld [vmem:[%s6271_s1 + $0x524] ss:$16 sps:$4 sm:$0xff]   ;;  %v4207_v4 = vld [vmem:[%s6271_s1 + $0x16c] ss:$16 sps:$4 sm:$0xff]  }
  0x41   :  { %1418 = vmatprep.subr.bf16.mxu1 %v4123_v5  ;;  %v4202_v5 = vld [vmem:[%s6271_s1 + $0x520] ss:$16 sps:$4 sm:$0xff]  }
  0x42   :  { %1316 = vmatmul.mubr.bf16.vlgmr.msra.gmra.mxu0 %v4964_v6 }
  0x43   :  { %1357 = vmatmul.mubr.bf16.vlgmr.msra.gmra.mxu1 %v4966_v7  ;;  %1366 = vmatpush1.bf16.msra.mxu0 %v4118_v8  ;;  %v4205_v8 = vld [vmem:[%s6271_s1 + $0x168] ss:$16 sps:$4 sm:$0xff]  }
  0x44   :  { %1419 = vmatpush1.bf16.msra.mxu1 %v4121_v9  ;;  %1367 = vmatprep.subr.bf16.mxu0 %v4126_v10  ;;  %v4210_v9 = vld [vmem:[%s6271_s1 + $0x504] ss:$16 sps:$4 sm:$0xff]   ;;  %v4213_v10 = vld [vmem:[%s6271_s1 + $0x14c] ss:$16 sps:$4 sm:$0xff]  }
  0x45   :  { %1420 = vmatprep.subr.bf16.mxu1 %v4129_v11  ;;  %1438 = vmatprep.mubr.bf16.mxu1 %v4708_v17  ;;  %v4208_v11 = vld [vmem:[%s6271_s1 + $0x500] ss:$16 sps:$4 sm:$0xff]  }
  0x46   :  { %1397 = vmatprep.mubr.bf16.mxu0 %v5061_v36 }
  0x47   :  { %1368 = vmatpush1.bf16.msra.mxu0 %v4124_v12  ;;  %v4211_v12 = vld [vmem:[%s6271_s1 + $0x148] ss:$16 sps:$4 sm:$0xff]  }
  0x48   :  { %1421 = vmatpush1.bf16.msra.mxu1 %v4127_v13  ;;  %1369 = vmatprep.subr.bf16.mxu0 %v4132_v14  ;;  %v4218_v13 = vld [vmem:[%s6271_s1 + $0x12c] ss:$16 sps:$4 sm:$0xff]  }
  0x49   :  { %1447 = vmatprep.subr.bf16.mxu1 %v4135_v15  ;;  %v4221_v14 = vld [vmem:[%s6271_s1 + $0x2ec] ss:$16 sps:$4 sm:$0xff]   ;;  %v5183_v15 = vcombine.low %v5054_v34, %v5054_v34 }
  0x4a   :  { %v4248_v34 = vld [vmem:[%s6271_s1 + $0x24c] ss:$16 sps:$4 sm:$0xff]  }
  0x4b   :  { %3758 = vmatmul.mubr.msk.bf16.vlgmr.msra.gmra.mxu1 %vm1279_vm0, %v4997_v16  ;;  %1370 = vmatpush1.bf16.msra.mxu0 %v4130_v18  ;;  %v4216_v18 = vld [vmem:[%s6271_s1 + $0x128] ss:$16 sps:$4 sm:$0xff]  }
  0x4c   :  { %1448 = vmatpush1.bf16.msra.mxu1 %v4133_v19  ;;  %1371 = vmatprep.subr.bf16.mxu0 %v4138_v20  ;;  %v4219_v19 = vld [vmem:[%s6271_s1 + $0x2e8] ss:$16 sps:$4 sm:$0xff]   ;;  %v4224_v20 = vld [vmem:[%s6271_s1 + $0x10c] ss:$16 sps:$4 sm:$0xff]  }
  0x4d   :  { %1449 = vmatprep.subr.bf16.mxu1 %v4141_v21  ;;  %1479 = vmatprep.mubr.bf16.mxu1 %v4901_v49  ;;  %v4175_v49 = vld [vmem:[%s6271_s1 + $0x8] ss:$16 sps:$4 sm:$0xff]   ;;  %v4227_v21 = vld [vmem:[%s6271_s1 + $0x2cc] ss:$16 sps:$4 sm:$0xff]  }
  0x4f   :  { %1372 = vmatpush1.bf16.msra.mxu0 %v4136_v22  ;;  %v4222_v22 = vld [vmem:[%s6271_s1 + $0x108] ss:$16 sps:$4 sm:$0xff]  }
  0x50   :  { %1450 = vmatpush1.bf16.msra.mxu1 %v4139_v23  ;;  %1373 = vmatprep.subr.bf16.mxu0 %v4144_v24  ;;  %v4225_v23 = vld [vmem:[%s6271_s1 + $0x2c8] ss:$16 sps:$4 sm:$0xff]   ;;  %v4230_v24 = vld [vmem:[%s6271_s1 + $0x2ac] ss:$16 sps:$4 sm:$0xff]  }
  0x51   :  { %1451 = vmatprep.subr.bf16.mxu1 %v4147_v25  ;;  %v4233_v25 = vld [vmem:[%s6271_s1 + $0x4ec] ss:$16 sps:$4 sm:$0xff]  }
  0x53   :  { %1374 = vmatpush1.bf16.msra.mxu0 %v4142_v26  ;;  %v4228_v26 = vld [vmem:[%s6271_s1 + $0x2a8] ss:$16 sps:$4 sm:$0xff]  }
  0x54   :  { %1452 = vmatpush1.bf16.msra.mxu1 %v4145_v27  ;;  %1375 = vmatprep.subr.bf16.mxu0 %v4150_v28  ;;  %v4231_v27 = vld [vmem:[%s6271_s1 + $0x4e8] ss:$16 sps:$4 sm:$0xff]   ;;  %v4236_v28 = vld [vmem:[%s6271_s1 + $0x28c] ss:$16 sps:$4 sm:$0xff]  }
  0x55   :  { %1453 = vmatprep.subr.bf16.mxu1 %v4153_v29  ;;  %v4234_v29 = vld [vmem:[%s6271_s1 + $0x288] ss:$16 sps:$4 sm:$0xff]  }
  0x57   :  { %1376 = vmatpush1.bf16.msra.mxu0 %v4148_v30  ;;  %v4237_v30 = vld [vmem:[%s6271_s1 + $0x4c8] ss:$16 sps:$4 sm:$0xff]  }
  0x58   :  { %1454 = vmatpush1.bf16.msra.mxu1 %v4151_v31  ;;  %1377 = vmatprep.subr.bf16.mxu0 %v4156_v32  ;;  %v4242_v31 = vld [vmem:[%s6271_s1 + $0x26c] ss:$16 sps:$4 sm:$0xff]   ;;  %v4240_v32 = vld [vmem:[%s6271_s1 + $0x268] ss:$16 sps:$4 sm:$0xff]  }
  0x59   :  { %1455 = vmatprep.subr.bf16.mxu1 %v4159_v33  ;;  %v4243_v33 = vld [vmem:[%s6271_s1 + $0x4a8] ss:$16 sps:$4 sm:$0xff]  }
  0x5b   :  { %1378 = vmatpush1.bf16.msra.mxu0 %v4154_v35  ;;  %v4251_v35 = vld [vmem:[%s6271_s1 + $0x48c] ss:$16 sps:$4 sm:$0xff]  }
  0x5c   :  { %1456 = vmatpush1.bf16.msra.mxu1 %v4157_v37  ;;  %1379 = vmatprep.subr.bf16.mxu0 %v4162_v38  ;;  %v4249_v37 = vld [vmem:[%s6271_s1 + $0x488] ss:$16 sps:$4 sm:$0xff]   ;;  %v4254_v38 = vld [vmem:[%s6271_s1 + $0x22c] ss:$16 sps:$4 sm:$0xff]  }
  0x5d   :  { %1457 = vmatprep.subr.bf16.mxu1 %v4165_v39  ;;  %v4257_v39 = vld [vmem:[%s6271_s1 + $0x46c] ss:$16 sps:$4 sm:$0xff]  }
  0x5f   :  { %1380 = vmatpush1.bf16.msra.mxu0 %v4160_v40  ;;  %v4252_v40 = vld [vmem:[%s6271_s1 + $0x228] ss:$16 sps:$4 sm:$0xff]  }
  0x60   :  { %1458 = vmatpush1.bf16.msra.mxu1 %v4163_v41  ;;  %1381 = vmatprep.subr.bf16.mxu0 %v4168_v42  ;;  %v4255_v41 = vld [vmem:[%s6271_s1 + $0x468] ss:$16 sps:$4 sm:$0xff]   ;;  %v4260_v42 = vld [vmem:[%s6271_s1 + $0x20c] ss:$16 sps:$4 sm:$0xff]  }
  0x61   :  { %1459 = vmatprep.subr.bf16.mxu1 %v4171_v43  ;;  %v4263_v43 = vld [vmem:[%s6271_s1 + $0x44c] ss:$16 sps:$4 sm:$0xff]  }
  0x63   :  { %1382 = vmatpush2.bf16.msra.mxu0 %v4166_v44  ;;  %v4258_v44 = vld [vmem:[%s6271_s1 + $0x208] ss:$16 sps:$4 sm:$0xff]  }
  0x64   :  { %1460 = vmatpush1.bf16.msra.mxu1 %v4169_v45  ;;  %1383 = vmatprep.subr.bf16.mxu0 %v4174_v46  ;;  %v4261_v45 = vld [vmem:[%s6271_s1 + $0x448] ss:$16 sps:$4 sm:$0xff]   ;;  %v4266_v46 = vld [vmem:[%s6271_s1 + $0x3ec] ss:$16 sps:$4 sm:$0xff]  }
  0x65   :  { %1461 = vmatprep.subr.bf16.mxu1 %v4177_v47  ;;  %v4269_v47 = vld [vmem:[%s6271_s1 + $0x42c] ss:$16 sps:$4 sm:$0xff]  }
  0x67   :  { %1384 = vmatpush2.bf16.msra.mxu0 %v4172_v48  ;;  %v4264_v48 = vld [vmem:[%s6271_s1 + $0x3e8] ss:$16 sps:$4 sm:$0xff]  }
  0x68   :  { %1462 = vmatpush1.bf16.msra.mxu1 %v4175_v49  ;;  %1385 = vmatprep.subr.bf16.mxu0 %v4180_v50  ;;  %v4267_v49 = vld [vmem:[%s6271_s1 + $0x428] ss:$16 sps:$4 sm:$0xff]   ;;  %v4272_v50 = vld [vmem:[%s6271_s1 + $0x3cc] ss:$16 sps:$4 sm:$0xff]  }
  0x69   :  { %1463 = vmatprep.subr.bf16.mxu1 %v4183_v51  ;;  %v4275_v51 = vld [vmem:[%s6271_s1 + $0x40c] ss:$16 sps:$4 sm:$0xff]  }
  0x6b   :  { %1386 = vmatpush2.bf16.msra.mxu0 %v4178_v53  ;;  %v4270_v53 = vld [vmem:[%s6271_s1 + $0x3c8] ss:$16 sps:$4 sm:$0xff]  }
  0x6c   :  { %1464 = vmatpush2.bf16.msra.mxu1 %v4181_v54  ;;  %1387 = vmatprep.subr.bf16.mxu0 %v4186_v55  ;;  %v4273_v54 = vld [vmem:[%s6271_s1 + $0x408] ss:$16 sps:$4 sm:$0xff]   ;;  %v4278_v55 = vld [vmem:[%s6271_s1 + $0x3ac] ss:$16 sps:$4 sm:$0xff]  }
  0x6d   :  { %1465 = vmatprep.subr.bf16.mxu1 %v4189_v56  ;;  %v4281_v56 = vld [vmem:[%s6271_s1 + $0x5ec] ss:$16 sps:$4 sm:$0xff]  }
  0x6f   :  { %1388 = vmatpush2.bf16.msra.mxu0 %v4184_v57  ;;  %v4276_v57 = vld [vmem:[%s6271_s1 + $0x3a8] ss:$16 sps:$4 sm:$0xff]  }
  0x70   :  { %1466 = vmatpush2.bf16.msra.mxu1 %v4187_v58  ;;  %1389 = vmatprep.subr.bf16.mxu0 %v4192_v59  ;;  %v4279_v58 = vld [vmem:[%s6271_s1 + $0x5e8] ss:$16 sps:$4 sm:$0xff]   ;;  %v4284_v59 = vld [vmem:[%s6271_s1 + $0x38c] ss:$16 sps:$4 sm:$0xff]  }
  0x71   :  { %1467 = vmatprep.subr.bf16.mxu1 %v4195_v60  ;;  %v4287_v60 = vld [vmem:[%s6271_s1 + $0x5cc] ss:$16 sps:$4 sm:$0xff]  }
  0x73   :  { %1390 = vmatpush2.bf16.msra.mxu0 %v4190_v61  ;;  %v4282_v61 = vld [vmem:[%s6271_s1 + $0x388] ss:$16 sps:$4 sm:$0xff]  }
  0x74   :  { %1468 = vmatpush2.bf16.msra.mxu1 %v4193_v62  ;;  %1391 = vmatprep.subr.bf16.mxu0 %v4198_v63  ;;  %v4285_v62 = vld [vmem:[%s6271_s1 + $0x5c8] ss:$16 sps:$4 sm:$0xff]   ;;  %v4290_v63 = vld [vmem:[%s6271_s1 + $0x36c] ss:$16 sps:$4 sm:$0xff]  }
  0x75   :  { %1469 = vmatprep.subr.bf16.mxu1 %v4201_v0  ;;  %v4293_v0 = vld [vmem:[%s6271_s1 + $0x5ac] ss:$16 sps:$4 sm:$0xff]  }
  0x77   :  { %1392 = vmatpush2.bf16.msra.mxu0 %v4196_v1  ;;  %v4288_v1 = vld [vmem:[%s6271_s1 + $0x368] ss:$16 sps:$4 sm:$0xff]  }
  0x78   :  { %1470 = vmatpush2.bf16.msra.mxu1 %v4199_v2  ;;  %1393 = vmatprep.subr.bf16.mxu0 %v4204_v3  ;;  %v4291_v2 = vld [vmem:[%s6271_s1 + $0x5a8] ss:$16 sps:$4 sm:$0xff]   ;;  %v4296_v3 = vld [vmem:[%s6271_s1 + $0x34c] ss:$16 sps:$4 sm:$0xff]  }
  0x79   :  { %1471 = vmatprep.subr.bf16.mxu1 %v4207_v4  ;;  %v4299_v4 = vld [vmem:[%s6271_s1 + $0x58c] ss:$16 sps:$4 sm:$0xff]  }
  0x7b   :  { %1394 = vmatpush2.bf16.msra.mxu0 %v4202_v5  ;;  %v4294_v5 = vld [vmem:[%s6271_s1 + $0x348] ss:$16 sps:$4 sm:$0xff]  }
  0x7c   :  { %1472 = vmatpush2.bf16.msra.mxu1 %v4205_v8  ;;  %1395 = vmatprep.subr.bf16.mxu0 %v4210_v9  ;;  %v4297_v8 = vld [vmem:[%s6271_s1 + $0x588] ss:$16 sps:$4 sm:$0xff]   ;;  %v4302_v9 = vld [vmem:[%s6271_s1 + $0x32c] ss:$16 sps:$4 sm:$0xff]  }
  0x7d   :  { %1473 = vmatprep.subr.bf16.mxu1 %v4213_v10  ;;  %v4305_v10 = vld [vmem:[%s6271_s1 + $0x56c] ss:$16 sps:$4 sm:$0xff]  }
  0x7f   :  { %1396 = vmatpush2.bf16.msra.mxu0 %v4208_v11  ;;  %v4300_v11 = vld [vmem:[%s6271_s1 + $0x328] ss:$16 sps:$4 sm:$0xff]  }
  0x80   :  { %1474 = vmatpush2.bf16.msra.mxu1 %v4211_v12  ;;  %1488 = vmatprep.subr.bf16.mxu0 %v4221_v14  ;;  %v4303_v12 = vld [vmem:[%s6271_s1 + $0x568] ss:$16 sps:$4 sm:$0xff]   ;;  %v4311_v14 = vld [vmem:[%s6271_s1 + $0x54c] ss:$16 sps:$4 sm:$0xff]  }
  0x81   :  { %1475 = vmatprep.subr.bf16.mxu1 %v4218_v13  ;;  %v4308_v13 = vld [vmem:[%s6271_s1 + $0x30c] ss:$16 sps:$4 sm:$0xff]  }
  0x82   :  { %1398 = vmatmul.mubr.bf16.vlgmr.msra.gmra.mxu0 %v5183_v15 }
  0x83   :  { %1489 = vmatpush1.bf16.msra.mxu0 %v4219_v19  ;;  %1520 = vmatprep.mubr.bf16.mxu0 %v4909_v52  ;;  %v4239_v52 = vld [vmem:[%s6271_s1 + $0x4cc] ss:$16 sps:$4 sm:$0xff]   ;;  %v4309_v19 = vld [vmem:[%s6271_s1 + $0x548] ss:$16 sps:$4 sm:$0xff]  }
  0x84   :  { %1476 = vmatpush2.bf16.msra.mxu1 %v4216_v18  ;;  %1490 = vmatprep.subr.bf16.mxu0 %v4227_v21  ;;  %v4306_v18 = vld [vmem:[%s6271_s1 + $0x308] ss:$16 sps:$4 sm:$0xff]   ;;  %v4317_v21 = vld [vmem:[%s6271_s1 + $0x62c] ss:$16 sps:$4 sm:$0xff]  }
  0x85   :  { %1477 = vmatprep.subr.bf16.mxu1 %v4224_v20  ;;  %v4314_v20 = vld [vmem:[%s6271_s1 + $0x52c] ss:$16 sps:$4 sm:$0xff]  }
  0x87   :  { %1491 = vmatpush1.bf16.msra.mxu0 %v4225_v23  ;;  %v4315_v23 = vld [vmem:[%s6271_s1 + $0x628] ss:$16 sps:$4 sm:$0xff]  }
  0x88   :  { %1478 = vmatpush2.bf16.msra.mxu1 %v4222_v22  ;;  %1492 = vmatprep.subr.bf16.mxu0 %v4230_v24  ;;  %v4312_v22 = vld [vmem:[%s6271_s1 + $0x528] ss:$16 sps:$4 sm:$0xff]   ;;  %v4320_v24 = vld [vmem:[%s6271_s1 + $0x50c] ss:$16 sps:$4 sm:$0xff]  }
  0x89   :  { %1529 = vmatprep.subr.bf16.mxu1 %v4233_v25  ;;  %v4323_v25 = vld [vmem:[%s6271_s1 + $0x60c] ss:$16 sps:$4 sm:$0xff]  }
  0x8b   :  { %1480 = vmatmul.mubr.bf16.vlgmr.msra.gmra.mxu1 %v4964_v6  ;;  %1493 = vmatpush1.bf16.msra.mxu0 %v4228_v26  ;;  %v4245_v6 = vld [vmem:[%s6271_s1 + $0x4ac] ss:$16 sps:$4 sm:$0xff]   ;;  %v4318_v26 = vld [vmem:[%s6271_s1 + $0x508] ss:$16 sps:$4 sm:$0xff]  }
  0x8c   :  { %1530 = vmatpush1.bf16.msra.mxu1 %v4231_v27  ;;  %1494 = vmatprep.subr.bf16.mxu0 %v4236_v28  ;;  %v4321_v27 = vld [vmem:[%s6271_s1 + $0x608] ss:$16 sps:$4 sm:$0xff]   ;;  %v4326_v28 = vld [vmem:[%s6273_s3 + $0xe4] ss:$16 sps:$4 sm:$0xff]  }
  0x8d   :  { %1531 = vmatprep.subr.bf16.mxu1 %v4239_v52  ;;  %1561 = vmatprep.mubr.bf16.mxu1 %v5061_v36  ;;  %v4246_v36 = vld [vmem:[%s6271_s1 + $0x248] ss:$16 sps:$4 sm:$0xff]   ;;  %v4329_v52 = vld [vmem:[%s6273_s3 + $0xc4] ss:$16 sps:$4 sm:$0xff]  }
  0x8f   :  { %1495 = vmatpush1.bf16.msra.mxu0 %v4234_v29  ;;  %v4332_v29 = vld [vmem:[%s6273_s3 + $0xa4] ss:$16 sps:$4 sm:$0xff]  }
  0x90   :  { %1532 = vmatpush1.bf16.msra.mxu1 %v4237_v30  ;;  %1496 = vmatprep.subr.bf16.mxu0 %v4242_v31  ;;  %v4330_v30 = vld [vmem:[%s6273_s3 + $0xa0] ss:$16 sps:$4 sm:$0xff]  }
  0x91   :  { %1533 = vmatprep.subr.bf16.mxu1 %v4245_v6  ;;  %v4378_v31 = vld [vmem:[%s6273_s3 + $0x2e0] ss:$16 sps:$4 sm:$0xff]   ;;  %v4380_v6 = vld [vmem:[%s6273_s3 + $0x2e4] ss:$16 sps:$4 sm:$0xff]  }
  0x93   :  { %1497 = vmatpush1.bf16.msra.mxu0 %v4240_v32  ;;  %v4338_v32 = vld [vmem:[%s6273_s3 + $0x64] ss:$16 sps:$4 sm:$0xff]  }
  0x94   :  { %1534 = vmatpush1.bf16.msra.mxu1 %v4243_v33  ;;  %1498 = vmatprep.subr.bf16.mxu0 %v4248_v34  ;;  %v4336_v33 = vld [vmem:[%s6273_s3 + $0x60] ss:$16 sps:$4 sm:$0xff]  }
  0x95   :  { %1535 = vmatprep.subr.bf16.mxu1 %v4251_v35  ;;  %v4384_v34 = vld [vmem:[%s6273_s3 + $0x2c0] ss:$16 sps:$4 sm:$0xff]   ;;  %v4386_v35 = vld [vmem:[%s6273_s3 + $0x2c4] ss:$16 sps:$4 sm:$0xff]  }
  0x97   :  { %1499 = vmatpush1.bf16.msra.mxu0 %v4246_v36  ;;  %v4341_v36 = vld [vmem:[%s6273_s3 + $0x44] ss:$16 sps:$4 sm:$0xff]  }
  0x98   :  { %1536 = vmatpush1.bf16.msra.mxu1 %v4249_v37  ;;  %1500 = vmatprep.subr.bf16.mxu0 %v4254_v38  ;;  %v4339_v37 = vld [vmem:[%s6273_s3 + $0x40] ss:$16 sps:$4 sm:$0xff]  }
  0x99   :  { %1537 = vmatprep.subr.bf16.mxu1 %v4257_v39  ;;  %v4390_v38 = vld [vmem:[%s6273_s3 + $0x2a0] ss:$16 sps:$4 sm:$0xff]   ;;  %v4392_v39 = vld [vmem:[%s6273_s3 + $0x2a4] ss:$16 sps:$4 sm:$0xff]  }
  0x9b   :  { %1501 = vmatpush1.bf16.msra.mxu0 %v4252_v40  ;;  %v4344_v40 = vld [vmem:[%s6273_s3 + $0x24] ss:$16 sps:$4 sm:$0xff]  }
  0x9c   :  { %1538 = vmatpush1.bf16.msra.mxu1 %v4255_v41  ;;  %1502 = vmatprep.subr.bf16.mxu0 %v4260_v42  ;;  %v4342_v41 = vld [vmem:[%s6273_s3 + $0x20] ss:$16 sps:$4 sm:$0xff]  }
  0x9d   :  { %1539 = vmatprep.subr.bf16.mxu1 %v4263_v43  ;;  %v4396_v42 = vld [vmem:[%s6273_s3 + $0x280] ss:$16 sps:$4 sm:$0xff]   ;;  %v4398_v43 = vld [vmem:[%s6273_s3 + $0x284] ss:$16 sps:$4 sm:$0xff]  }
  0x9f   :  { %1503 = vmatpush1.bf16.msra.mxu0 %v4258_v44  ;;  %v4347_v44 = vld [vmem:[%s6273_s3 + $0x4] ss:$16 sps:$4 sm:$0xff]  }
  0xa0   :  { %1540 = vmatpush1.bf16.msra.mxu1 %v4261_v45  ;;  %1504 = vmatprep.subr.bf16.mxu0 %v4266_v46  ;;  %v4345_v45 = vld [vmem:[%s6273_s3] ss:$16 sps:$4 sm:$0xff]  }
  0xa1   :  { %1541 = vmatprep.subr.bf16.mxu1 %v4269_v47  ;;  %v4402_v46 = vld [vmem:[%s6273_s3 + $0x260] ss:$16 sps:$4 sm:$0xff]   ;;  %v4404_v47 = vld [vmem:[%s6273_s3 + $0x264] ss:$16 sps:$4 sm:$0xff]  }
  0xa3   :  { %1505 = vmatpush2.bf16.msra.mxu0 %v4264_v48  ;;  %v4350_v48 = vld [vmem:[%s6273_s3 + $0x1e4] ss:$16 sps:$4 sm:$0xff]  }
  0xa4   :  { %1542 = vmatpush1.bf16.msra.mxu1 %v4267_v49  ;;  %1506 = vmatprep.subr.bf16.mxu0 %v4272_v50  ;;  %v4348_v49 = vld [vmem:[%s6273_s3 + $0x1e0] ss:$16 sps:$4 sm:$0xff]  }
  0xa5   :  { %1543 = vmatprep.subr.bf16.mxu1 %v4275_v51  ;;  %v4408_v50 = vld [vmem:[%s6273_s3 + $0x240] ss:$16 sps:$4 sm:$0xff]   ;;  %v4410_v51 = vld [vmem:[%s6273_s3 + $0x244] ss:$16 sps:$4 sm:$0xff]  }
  0xa7   :  { %1507 = vmatpush2.bf16.msra.mxu0 %v4270_v53  ;;  %v4353_v53 = vld [vmem:[%s6273_s3 + $0x1c4] ss:$16 sps:$4 sm:$0xff]  }
  0xa8   :  { %1544 = vmatpush1.bf16.msra.mxu1 %v4273_v54  ;;  %1508 = vmatprep.subr.bf16.mxu0 %v4278_v55  ;;  %v4351_v54 = vld [vmem:[%s6273_s3 + $0x1c0] ss:$16 sps:$4 sm:$0xff]  }
  0xa9   :  { %1545 = vmatprep.subr.bf16.mxu1 %v4281_v56  ;;  %v4414_v55 = vld [vmem:[%s6273_s3 + $0x220] ss:$16 sps:$4 sm:$0xff]   ;;  %v4416_v56 = vld [vmem:[%s6273_s3 + $0x224] ss:$16 sps:$4 sm:$0xff]  }
  0xab   :  { %1509 = vmatpush2.bf16.msra.mxu0 %v4276_v57  ;;  %v4356_v57 = vld [vmem:[%s6273_s3 + $0x1a4] ss:$16 sps:$4 sm:$0xff]  }
  0xac   :  { %1546 = vmatpush2.bf16.msra.mxu1 %v4279_v58  ;;  %1510 = vmatprep.subr.bf16.mxu0 %v4284_v59  ;;  %v4354_v58 = vld [vmem:[%s6273_s3 + $0x1a0] ss:$16 sps:$4 sm:$0xff]  }
  0xad   :  { %1547 = vmatprep.subr.bf16.mxu1 %v4287_v60  ;;  %v4420_v59 = vld [vmem:[%s6273_s3 + $0x200] ss:$16 sps:$4 sm:$0xff]   ;;  %v4422_v60 = vld [vmem:[%s6273_s3 + $0x204] ss:$16 sps:$4 sm:$0xff]  }
  0xaf   :  { %1511 = vmatpush2.bf16.msra.mxu0 %v4282_v61  ;;  %v4359_v61 = vld [vmem:[%s6273_s3 + $0x184] ss:$16 sps:$4 sm:$0xff]  }
  0xb0   :  { %1548 = vmatpush2.bf16.msra.mxu1 %v4285_v62  ;;  %1512 = vmatprep.subr.bf16.mxu0 %v4290_v63  ;;  %v4357_v62 = vld [vmem:[%s6273_s3 + $0x180] ss:$16 sps:$4 sm:$0xff]  }
  0xb1   :  { %1549 = vmatprep.subr.bf16.mxu1 %v4293_v0  ;;  %v4426_v63 = vld [vmem:[%s6273_s3 + $0x3e0] ss:$16 sps:$4 sm:$0xff]   ;;  %v4428_v0 = vld [vmem:[%s6273_s3 + $0x3e4] ss:$16 sps:$4 sm:$0xff]  }
  0xb3   :  { %1513 = vmatpush2.bf16.msra.mxu0 %v4288_v1  ;;  %v4362_v1 = vld [vmem:[%s6273_s3 + $0x164] ss:$16 sps:$4 sm:$0xff]  }
  0xb4   :  { %1550 = vmatpush2.bf16.msra.mxu1 %v4291_v2  ;;  %1514 = vmatprep.subr.bf16.mxu0 %v4296_v3  ;;  %v4360_v2 = vld [vmem:[%s6273_s3 + $0x160] ss:$16 sps:$4 sm:$0xff]  }
  0xb5   :  { %1551 = vmatprep.subr.bf16.mxu1 %v4299_v4  ;;  %v4432_v3 = vld [vmem:[%s6273_s3 + $0x3c0] ss:$16 sps:$4 sm:$0xff]   ;;  %v4434_v4 = vld [vmem:[%s6273_s3 + $0x3c4] ss:$16 sps:$4 sm:$0xff]  }
  0xb7   :  { %1515 = vmatpush2.bf16.msra.mxu0 %v4294_v5  ;;  %v4365_v5 = vld [vmem:[%s6273_s3 + $0x144] ss:$16 sps:$4 sm:$0xff]  }
  0xb8   :  { %1552 = vmatpush2.bf16.msra.mxu1 %v4297_v8  ;;  %1516 = vmatprep.subr.bf16.mxu0 %v4302_v9  ;;  %v4363_v8 = vld [vmem:[%s6273_s3 + $0x140] ss:$16 sps:$4 sm:$0xff]  }
  0xb9   :  { %1553 = vmatprep.subr.bf16.mxu1 %v4305_v10  ;;  %v4438_v9 = vld [vmem:[%s6273_s3 + $0x3a0] ss:$16 sps:$4 sm:$0xff]   ;;  %v4440_v10 = vld [vmem:[%s6273_s3 + $0x3a4] ss:$16 sps:$4 sm:$0xff]  }
  0xbb   :  { %1517 = vmatpush2.bf16.msra.mxu0 %v4300_v11  ;;  %v4368_v11 = vld [vmem:[%s6273_s3 + $0x124] ss:$16 sps:$4 sm:$0xff]  }
  0xbc   :  { %1554 = vmatpush2.bf16.msra.mxu1 %v4303_v12  ;;  %1518 = vmatprep.subr.bf16.mxu0 %v4308_v13  ;;  %v4366_v12 = vld [vmem:[%s6273_s3 + $0x120] ss:$16 sps:$4 sm:$0xff]  }
  0xbd   :  { %1555 = vmatprep.subr.bf16.mxu1 %v4311_v14  ;;  %v4444_v13 = vld [vmem:[%s6273_s3 + $0x380] ss:$16 sps:$4 sm:$0xff]   ;;  %v4446_v14 = vld [vmem:[%s6273_s3 + $0x384] ss:$16 sps:$4 sm:$0xff]  }
  0xbf   :  { %1519 = vmatpush2.bf16.msra.mxu0 %v4306_v18  ;;  %v4371_v18 = vld [vmem:[%s6273_s3 + $0x104] ss:$16 sps:$4 sm:$0xff]  }
  0xc0   :  { %1556 = vmatpush2.bf16.msra.mxu1 %v4309_v19  ;;  %1582 = vmatprep.subr.bf16.mxu0 %v4317_v21  ;;  %v4369_v21 = vld [vmem:[%s6273_s3 + $0x100] ss:$16 sps:$4 sm:$0xff]  }
  0xc1   :  { %1557 = vmatprep.subr.bf16.mxu1 %v4314_v20 }
  0xc2   :  { %1521 = vmatmul.mubr.bf16.vlgmr.msra.gmra.mxu0 %v4966_v7  ;;  %v4324_v7 = vld [vmem:[%s6273_s3 + $0xe0] ss:$16 sps:$4 sm:$0xff]  }
  0xc3   :  { %1583 = vmatpush1.bf16.msra.mxu0 %v4315_v23  ;;  %1602 = vmatprep.mubr.bf16.mxu0 %v4708_v17  ;;  %v4327_v17 = vld [vmem:[%s6273_s3 + $0xc0] ss:$16 sps:$4 sm:$0xff]  }
  0xc4   :  { %1558 = vmatpush2.bf16.msra.mxu1 %v4312_v22  ;;  %1584 = vmatprep.subr.bf16.mxu0 %v4323_v25  ;;  %v4452_v25 = vld [vmem:[%s6273_s3 + $0x364] ss:$16 sps:$4 sm:$0xff]  }
  0xc5   :  { %1559 = vmatprep.subr.bf16.mxu1 %v4320_v24  ;;  %v4374_v24 = vld [vmem:[%s6273_s3 + $0xec] ss:$16 sps:$4 sm:$0xff]  }
  0xc7   :  { %1585 = vmatpush1.bf16.msra.mxu0 %v4321_v27 }
  0xc8   :  { %1560 = vmatpush2.bf16.msra.mxu1 %v4318_v26  ;;  %2413 = vmatprep.subr.bf16.mxu0 %v4326_v28  ;;  %v4450_v26 = vld [vmem:[%s6273_s3 + $0x360] ss:$16 sps:$4 sm:$0xff]  }
  0xc9   :  { %2454 = vmatprep.subr.bf16.mxu1 %v4380_v6 }
  0xca   :  { %3759 = vmatmul.mubr.msk.bf16.vlgmr.msra.gmra.mxu0 %vm1279_vm0, %v4997_v16  ;;  %v4335_v16 = vld [vmem:[%s6273_s3 + $0x84] ss:$16 sps:$4 sm:$0xff]  }
  0xcb   :  { %1562 = vmatmul.mubr.bf16.vlgmr.msra.gmra.mxu1 %v5183_v15  ;;  %2414 = vmatpush1.bf16.msra.mxu0 %v4324_v7  ;;  %v4333_v15 = vld [vmem:[%s6273_s3 + $0x80] ss:$16 sps:$4 sm:$0xff]  }
  0xcc   :  { %2415 = vmatprep.subr.bf16.mxu0 %v4329_v52  ;;  %2455 = vmatpush1.bf16.msra.mxu1 %v4378_v31  ;;  %v4462_v31 = vld [vmem:[%s6273_s3 + $0x320] ss:$16 sps:$4 sm:$0xff]  }
  0xcd   :  { %2456 = vmatprep.subr.bf16.mxu1 %v4386_v35  ;;  %v4470_v35 = vld [vmem:[%s6273_s3 + $0x2ec] ss:$16 sps:$4 sm:$0xff]  }
  0xcf   :  { %2416 = vmatpush1.bf16.msra.mxu0 %v4327_v17  ;;  %v4456_v17 = vld [vmem:[%s6273_s3 + $0x340] ss:$16 sps:$4 sm:$0xff]  }
  0xd0   :  { %2417 = vmatprep.subr.bf16.mxu0 %v4332_v29  ;;  %2457 = vmatpush1.bf16.msra.mxu1 %v4384_v34  ;;  %v4458_v29 = vld [vmem:[%s6273_s3 + $0x344] ss:$16 sps:$4 sm:$0xff]   ;;  %v4465_v34 = vld [vmem:[%s6273_s3 + $0x300] ss:$16 sps:$4 sm:$0xff]  }
  0xd1   :  { %2458 = vmatprep.subr.bf16.mxu1 %v4392_v39  ;;  %v5610_v39 = vld [vmem:[%s6274_s2] sm:$0xf] }
  0xd3   :  { %2418 = vmatpush1.bf16.msra.mxu0 %v4330_v30 }
  0xd4   :  { %2419 = vmatprep.subr.bf16.mxu0 %v4335_v16  ;;  %2459 = vmatpush1.bf16.msra.mxu1 %v4390_v38 }
  0xd5   :  { %2460 = vmatprep.subr.bf16.mxu1 %v4398_v43 }
  0xd7   :  { %2420 = vmatpush1.bf16.msra.mxu0 %v4333_v15  ;;  %v4464_v15 = vld [vmem:[%s6273_s3 + $0x324] ss:$16 sps:$4 sm:$0xff]  }
  0xd8   :  { %2421 = vmatprep.subr.bf16.mxu0 %v4338_v32  ;;  %2461 = vmatpush1.bf16.msra.mxu1 %v4396_v42 }
  0xd9   :  { %2462 = vmatprep.subr.bf16.mxu1 %v4404_v47 }
  0xdb   :  { %2422 = vmatpush1.bf16.msra.mxu0 %v4336_v33  ;;  %v4467_v33 = vld [vmem:[%s6273_s3 + $0x304] ss:$16 sps:$4 sm:$0xff]  }
  0xdc   :  { %2423 = vmatprep.subr.bf16.mxu0 %v4341_v36  ;;  %2463 = vmatpush1.bf16.msra.mxu1 %v4402_v46  ;;  %v235_v36 = vlaneseq }
  0xdd   :  { %2464 = vmatprep.subr.bf16.mxu1 %v4410_v51 }
  0xdf   :  { %2424 = vmatpush1.bf16.msra.mxu0 %v4339_v37  ;;  %v5602_v37 = vshrl.u32 %v235_v36, 7 }
  0xe0   :  { %2425 = vmatprep.subr.bf16.mxu0 %v4344_v40  ;;  %2465 = vmatpush1.bf16.msra.mxu1 %v4408_v50 }
  0xe1   :  { %2466 = vmatprep.subr.bf16.mxu1 %v4416_v56  ;;  %v5605_v38 = vsub.s32 0, %v5602_v37  ;;  %v5613_v40 = vsub.s32 1, %v5602_v37 }
  0xe3   :  { %2426 = vmatpush1.bf16.msra.mxu0 %v4342_v41  ;;  %v238_v41 = vrot.slane %v5610_v39, %v5605_v38  ;;  %v242_v42 = vrot.slane %v5610_v39, %v5613_v40 }
  0xe4   :  { %2427 = vmatprep.subr.bf16.mxu0 %v4347_v44  ;;  %2467 = vmatpush1.bf16.msra.mxu1 %v4414_v55 }
  0xe5   :  { %2468 = vmatprep.subr.bf16.mxu1 %v4422_v60  ;;  %v4372_v60 = vld [vmem:[%s6273_s3 + $0xe8] ss:$16 sps:$4 sm:$0xff]  }
  0xe7   :  { %2428 = vmatpush1.bf16.msra.mxu0 %v4345_v45 }
  0xe8   :  { %2429 = vmatprep.subr.bf16.mxu0 %v4350_v48  ;;  %2469 = vmatpush1.bf16.msra.mxu1 %v4420_v59 }
  0xe9   :  { %2470 = vmatprep.subr.bf16.mxu1 %v4428_v0 }
  0xeb   :  { %2430 = vmatpush2.bf16.msra.mxu0 %v4348_v49 }
  0xec   :  { %2431 = vmatprep.subr.bf16.mxu0 %v4353_v53  ;;  %2471 = vmatpush2.bf16.msra.mxu1 %v4426_v63  ;;  %v4377_v63 = vld [vmem:[%s6273_s3 + $0xcc] ss:$16 sps:$4 sm:$0xff]  }
  0xed   :  { %2472 = vmatprep.subr.bf16.mxu1 %v4434_v4  ;;  %v4381_v4 = vld [vmem:[%s6273_s3 + $0xa8] ss:$16 sps:$4 sm:$0xff]  }
  0xef   :  { %2432 = vmatpush2.bf16.msra.mxu0 %v4351_v54 }
  0xf0   :  { %2433 = vmatprep.subr.bf16.mxu0 %v4356_v57  ;;  %2473 = vmatpush2.bf16.msra.mxu1 %v4432_v3  ;;  %v4383_v3 = vld [vmem:[%s6273_s3 + $0xac] ss:$16 sps:$4 sm:$0xff]  }
  0xf1   :  { %2474 = vmatprep.subr.bf16.mxu1 %v4440_v10  ;;  %v4393_v10 = vld [vmem:[%s6273_s3 + $0x68] ss:$16 sps:$4 sm:$0xff]  }
  0xf3   :  { %2434 = vmatpush2.bf16.msra.mxu0 %v4354_v58 }
  0xf4   :  { %2435 = vmatprep.subr.bf16.mxu0 %v4359_v61  ;;  %2475 = vmatpush2.bf16.msra.mxu1 %v4438_v9  ;;  %v4395_v9 = vld [vmem:[%s6273_s3 + $0x6c] ss:$16 sps:$4 sm:$0xff]  }
  0xf5   :  { %2476 = vmatprep.subr.bf16.mxu1 %v4446_v14  ;;  %v4405_v14 = vld [vmem:[%s6273_s3 + $0x28] ss:$16 sps:$4 sm:$0xff]  }
  0xf7   :  { %2436 = vmatpush2.bf16.msra.mxu0 %v4357_v62 }
  0xf8   :  { %2437 = vmatprep.subr.bf16.mxu0 %v4362_v1  ;;  %2477 = vmatpush2.bf16.msra.mxu1 %v4444_v13  ;;  %v4375_v1 = vld [vmem:[%s6273_s3 + $0xc8] ss:$16 sps:$4 sm:$0xff]   ;;  %v4407_v13 = vld [vmem:[%s6273_s3 + $0x2c] ss:$16 sps:$4 sm:$0xff]  }
  0xf9   :  { %2478 = vmatprep.subr.bf16.mxu1 %v4452_v25  ;;  %v4429_v25 = vld [vmem:[%s6273_s3 + $0x1a8] ss:$16 sps:$4 sm:$0xff]  }
  0xfb   :  { %2438 = vmatpush2.bf16.msra.mxu0 %v4360_v2 }
  0xfc   :  { %2439 = vmatprep.subr.bf16.mxu0 %v4365_v5  ;;  %2479 = vmatpush2.bf16.msra.mxu1 %v4450_v26  ;;  %v4389_v5 = vld [vmem:[%s6273_s3 + $0x8c] ss:$16 sps:$4 sm:$0xff]  }
  0xfd   :  { %2480 = vmatprep.subr.bf16.mxu1 %v4458_v29  ;;  %v4437_v26 = vld [vmem:[%s6273_s3 + $0x18c] ss:$16 sps:$4 sm:$0xff]   ;;  %v4447_v29 = vld [vmem:[%s6273_s3 + $0x148] ss:$16 sps:$4 sm:$0xff]  }
  0xff   :  { %2440 = vmatpush2.bf16.msra.mxu0 %v4363_v8  ;;  %v4387_v8 = vld [vmem:[%s6273_s3 + $0x88] ss:$16 sps:$4 sm:$0xff]  }
 0x100   :  { %2441 = vmatprep.subr.bf16.mxu0 %v4368_v11  ;;  %2481 = vmatpush2.bf16.msra.mxu1 %v4456_v17  ;;  %v4401_v11 = vld [vmem:[%s6273_s3 + $0x4c] ss:$16 sps:$4 sm:$0xff]   ;;  %v5711_v17 = vsub.s32 2, %v5602_v37 }
 0x101   :  { %2482 = vmatprep.subr.bf16.mxu1 %v4464_v15 }
 0x102   :  { %v1317_v19 = vpop.f32.mrf.mxu0 }
 0x103   :  { %v1358_v20 = vpop.f32.mrf.mxu1  ;;  %2442 = vmatpush2.bf16.msra.mxu0 %v4366_v12  ;;  %v1318_v43 = vadd.f32 %v1317_v19, %v238_v41  ;;  %v4399_v12 = vld [vmem:[%s6273_s3 + $0x48] ss:$16 sps:$4 sm:$0xff]  }
 0x104   :  { %v1319_v22 = vpop.f32.mrf.mxu0  ;;  %2443 = vmatprep.subr.bf16.mxu0 %v4371_v18  ;;  %2483 = vmatpush2.bf16.msra.mxu1 %v4462_v31  ;;  %v4413_v18 = vld [vmem:[%s6273_s3 + $0xc] ss:$16 sps:$4 sm:$0xff]   ;;  %v4411_v19 = vld [vmem:[%s6273_s3 + $0x8] ss:$16 sps:$4 sm:$0xff]   ;;  %v246_v31 = vrot.slane %v5610_v39, %v5711_v17 }
 0x105   :  { %v1360_v23 = vpop.f32.mrf.mxu1  ;;  %2484 = vmatprep.subr.bf16.mxu1 %v4467_v33  ;;  %v1320_v44 = vadd.f32 %v1319_v22, %v242_v42  ;;  %v1359_v45 = vadd.f32 %v1358_v20, %v1318_v43  ;;  %v4419_v20 = vld [vmem:[%s6273_s3 + $0x1ec] ss:$16 sps:$4 sm:$0xff]  }
 0x106   :  { %v1321_v27 = vpop.f32.mrf.mxu0  ;;  %v4425_v22 = vld [vmem:[%s6273_s3 + $0x1cc] ss:$16 sps:$4 sm:$0xff]  }
 0x107   :  { %v1362_v28 = vpop.f32.mrf.mxu1  ;;  %2444 = vmatpush2.bf16.msra.mxu0 %v4369_v21  ;;  %v1361_v47 = vadd.f32 %v1360_v23, %v1320_v44  ;;  %v4417_v21 = vld [vmem:[%s6273_s3 + $0x1e8] ss:$16 sps:$4 sm:$0xff]   ;;  %v4461_v33 = vld [vmem:[%s6273_s3 + $0x10c] ss:$16 sps:$4 sm:$0xff]  }
 0x108   :  { %v1322_v7 = vpop.f32.mrf.mxu0  ;;  %2495 = vmatprep.subr.bf16.mxu0 %v4374_v24  ;;  %2485 = vmatpush2.bf16.msra.mxu1 %v4465_v34  ;;  %v4423_v23 = vld [vmem:[%s6273_s3 + $0x1c8] ss:$16 sps:$4 sm:$0xff]   ;;  %v4431_v24 = vld [vmem:[%s6273_s3 + $0x1ac] ss:$16 sps:$4 sm:$0xff]  }
 0x109   :  { %v1363_v52 = vpop.f32.mrf.mxu1  ;;  %2536 = vmatprep.subr.bf16.mxu1 %v4470_v35  ;;  %v4435_v27 = vld [vmem:[%s6273_s3 + $0x188] ss:$16 sps:$4 sm:$0xff]   ;;  %v4443_v28 = vld [vmem:[%s6273_s3 + $0x16c] ss:$16 sps:$4 sm:$0xff]  }
 0x10a   :  { %v4441_v7 = vld [vmem:[%s6273_s3 + $0x168] ss:$16 sps:$4 sm:$0xff]   ;;  %v4449_v52 = vld [vmem:[%s6273_s3 + $0x14c] ss:$16 sps:$4 sm:$0xff]  }
 0x10b   :  { %v1440_v30 = vpop.f32.mrf.mxu1 }
 0x10d   :  { %v1442_v16 = vpop.f32.mrf.mxu1 }
 0x10f   :  { %v1444_v6 = vpop.f32.mrf.mxu1 }
 0x110   :  { %v4453_v6 = vld [vmem:[%s6273_s3 + $0x128] ss:$16 sps:$4 sm:$0xff]  }
 0x111   :  { %v1445_v32 = vpop.f32.mrf.mxu1 }
 0x142   :  { %v1399_v46 = vpop.f32.mrf.mxu0 }
 0x143   :  { %v1400_v48 = vadd.f32 %v1399_v46, %v1359_v45 }
 0x144   :  { %v1401_v49 = vpop.f32.mrf.mxu0 }
 0x145   :  { %v1441_v50 = vadd.f32 %v1440_v30, %v1400_v48  ;;  %v1402_v51 = vadd.f32 %v1401_v49, %v1361_v47  ;;  %v4455_v30 = vld [vmem:[%s6273_s3 + $0x12c] ss:$16 sps:$4 sm:$0xff]  }
 0x146   :  { %v1403_v53 = vpop.f32.mrf.mxu0 }
 0x147   :  { %v1611_v54 = vmax.f32 %v1441_v50, 0.0  ;;  %v1443_v55 = vadd.f32 %v1442_v16, %v1402_v51  ;;  %v5720_v16 = vsub.s32 3, %v5602_v37  ;;  %v4459_v37 = vld [vmem:[%s6273_s3 + $0x108] ss:$16 sps:$4 sm:$0xff]  }
 0x148   :  { %v1404_v56 = vpop.f32.mrf.mxu0 }
 0x149   :  { %1615 = vst [vmem:[%s6275_s7] sm:$0xff] %v1611_v54  ;;  %v1612_v57 = vmax.f32 %v1443_v55, 0.0  ;;  %v5630_v61 = vpack.c.bf16 %v1611_v54, %v1611_v54  ;;  %v250_v34 = vrot.slane %v5610_v39, %v5720_v16 }
 0x14b   :  { %v5622_v58 = vpop.f32.mrf.mxu1  ;;  %1616 = vst [vmem:[%s6275_s7 + $0x8] sm:$0xff] %v1612_v57  ;;  %v1620_v59 = vpack.c.bf16 %v1612_v57, %v1612_v57 }
 0x14c   :  { %v1482_v36 = vadd.f32 %v5622_v58, %v246_v31  ;;  %v4542_v31 = vld [vmem:[%s6276_s5 + $0x1e4] ss:$16 sps:$4 sm:$0xff]  }
 0x14d   :  { %v5632_v62 = vpop.f32.mrf.mxu1  ;;  %2445 = vmatprep.mubr.bf16.mxu0 %v1620_v59 }
 0x14e   :  { %2446 = vmatmul.mubr.bf16.vlgmr.msra.gmra.mxu0 %v5630_v61  ;;  %v1484_v42 = vadd.f32 %v5632_v62, %v250_v34  ;;  %v4473_v62 = vld [vmem:[%s6273_s3 + $0x2cc] ss:$16 sps:$4 sm:$0xff]   ;;  %v4545_v34 = vld [vmem:[%s6276_s5 + $0x1c4] ss:$16 sps:$4 sm:$0xff]  }
 0x14f   :  { %v1485_v0 = vpop.f32.mrf.mxu1  ;;  %2496 = vmatpush1.bf16.msra.mxu0 %v4372_v60  ;;  %2527 = vmatprep.mubr.bf16.mxu0 %v1620_v59  ;;  %v4468_v60 = vld [vmem:[%s6273_s3 + $0x2e8] ss:$16 sps:$4 sm:$0xff]  }
 0x150   :  { %2497 = vmatprep.subr.bf16.mxu0 %v4377_v63  ;;  %v4516_v63 = vld [vmem:[%s6276_s5 + $0xe0] ss:$16 sps:$4 sm:$0xff]   ;;  %v4518_v0 = vld [vmem:[%s6276_s5 + $0xe4] ss:$16 sps:$4 sm:$0xff]  }
 0x151   :  { %v1486_v2 = vpop.f32.mrf.mxu1 }
 0x152   :  { %v4521_v2 = vld [vmem:[%s6276_s5 + $0xc4] ss:$16 sps:$4 sm:$0xff]  }
 0x153   :  { %2498 = vmatpush1.bf16.msra.mxu0 %v4375_v1  ;;  %v4471_v1 = vld [vmem:[%s6273_s3 + $0x2c8] ss:$16 sps:$4 sm:$0xff]  }
 0x154   :  { %2499 = vmatprep.subr.bf16.mxu0 %v4383_v3  ;;  %v4476_v3 = vld [vmem:[%s6273_s3 + $0x2ac] ss:$16 sps:$4 sm:$0xff]  }
 0x157   :  { %2500 = vmatpush1.bf16.msra.mxu0 %v4381_v4  ;;  %v4519_v4 = vld [vmem:[%s6276_s5 + $0xc0] ss:$16 sps:$4 sm:$0xff]  }
 0x158   :  { %2501 = vmatprep.subr.bf16.mxu0 %v4389_v5  ;;  %v4524_v5 = vld [vmem:[%s6276_s5 + $0xa4] ss:$16 sps:$4 sm:$0xff]  }
 0x15b   :  { %2502 = vmatpush1.bf16.msra.mxu0 %v4387_v8  ;;  %v4474_v8 = vld [vmem:[%s6273_s3 + $0x2a8] ss:$16 sps:$4 sm:$0xff]  }
 0x15c   :  { %2503 = vmatprep.subr.bf16.mxu0 %v4395_v9  ;;  %v4479_v9 = vld [vmem:[%s6273_s3 + $0x28c] ss:$16 sps:$4 sm:$0xff]  }
 0x15f   :  { %2504 = vmatpush1.bf16.msra.mxu0 %v4393_v10  ;;  %v4522_v10 = vld [vmem:[%s6276_s5 + $0xa0] ss:$16 sps:$4 sm:$0xff]  }
 0x160   :  { %2505 = vmatprep.subr.bf16.mxu0 %v4401_v11  ;;  %v4527_v11 = vld [vmem:[%s6276_s5 + $0x84] ss:$16 sps:$4 sm:$0xff]  }
 0x163   :  { %2506 = vmatpush1.bf16.msra.mxu0 %v4399_v12  ;;  %v4477_v12 = vld [vmem:[%s6273_s3 + $0x288] ss:$16 sps:$4 sm:$0xff]  }
 0x164   :  { %2507 = vmatprep.subr.bf16.mxu0 %v4407_v13  ;;  %v4482_v13 = vld [vmem:[%s6273_s3 + $0x26c] ss:$16 sps:$4 sm:$0xff]  }
 0x167   :  { %2508 = vmatpush1.bf16.msra.mxu0 %v4405_v14  ;;  %v4525_v14 = vld [vmem:[%s6276_s5 + $0x80] ss:$16 sps:$4 sm:$0xff]  }
 0x168   :  { %2509 = vmatprep.subr.bf16.mxu0 %v4413_v18  ;;  %v4530_v18 = vld [vmem:[%s6276_s5 + $0x64] ss:$16 sps:$4 sm:$0xff]  }
 0x16b   :  { %2510 = vmatpush1.bf16.msra.mxu0 %v4411_v19  ;;  %v4480_v19 = vld [vmem:[%s6273_s3 + $0x268] ss:$16 sps:$4 sm:$0xff]  }
 0x16c   :  { %2511 = vmatprep.subr.bf16.mxu0 %v4419_v20  ;;  %v4485_v20 = vld [vmem:[%s6273_s3 + $0x24c] ss:$16 sps:$4 sm:$0xff]  }
 0x16f   :  { %2512 = vmatpush2.bf16.msra.mxu0 %v4417_v21  ;;  %v4528_v21 = vld [vmem:[%s6276_s5 + $0x60] ss:$16 sps:$4 sm:$0xff]  }
 0x170   :  { %2513 = vmatprep.subr.bf16.mxu0 %v4425_v22  ;;  %v4533_v22 = vld [vmem:[%s6276_s5 + $0x44] ss:$16 sps:$4 sm:$0xff]  }
 0x173   :  { %2514 = vmatpush2.bf16.msra.mxu0 %v4423_v23  ;;  %v4483_v23 = vld [vmem:[%s6273_s3 + $0x248] ss:$16 sps:$4 sm:$0xff]  }
 0x174   :  { %2515 = vmatprep.subr.bf16.mxu0 %v4431_v24  ;;  %v4488_v24 = vld [vmem:[%s6273_s3 + $0x22c] ss:$16 sps:$4 sm:$0xff]  }
 0x177   :  { %2516 = vmatpush2.bf16.msra.mxu0 %v4429_v25  ;;  %v4531_v25 = vld [vmem:[%s6276_s5 + $0x40] ss:$16 sps:$4 sm:$0xff]  }
 0x178   :  { %2517 = vmatprep.subr.bf16.mxu0 %v4437_v26  ;;  %v4536_v26 = vld [vmem:[%s6276_s5 + $0x24] ss:$16 sps:$4 sm:$0xff]  }
 0x17b   :  { %2518 = vmatpush2.bf16.msra.mxu0 %v4435_v27  ;;  %v4486_v27 = vld [vmem:[%s6273_s3 + $0x228] ss:$16 sps:$4 sm:$0xff]  }
 0x17c   :  { %2519 = vmatprep.subr.bf16.mxu0 %v4443_v28  ;;  %v4491_v28 = vld [vmem:[%s6273_s3 + $0x20c] ss:$16 sps:$4 sm:$0xff]  }
 0x17f   :  { %2520 = vmatpush2.bf16.msra.mxu0 %v4441_v7  ;;  %v4534_v7 = vld [vmem:[%s6276_s5 + $0x20] ss:$16 sps:$4 sm:$0xff]  }
 0x180   :  { %2521 = vmatprep.subr.bf16.mxu0 %v4449_v52  ;;  %v4539_v52 = vld [vmem:[%s6276_s5 + $0x4] ss:$16 sps:$4 sm:$0xff]  }
 0x182   :  { %v1522_v15 = vpop.f32.mrf.mxu0 }
 0x183   :  { %2522 = vmatpush2.bf16.msra.mxu0 %v4447_v29  ;;  %v1523_v43 = vadd.f32 %v1522_v15, %v1482_v36  ;;  %v4489_v29 = vld [vmem:[%s6273_s3 + $0x208] ss:$16 sps:$4 sm:$0xff]   ;;  %v4537_v15 = vld [vmem:[%s6276_s5] ss:$16 sps:$4 sm:$0xff]   ;;  %v4500_v36 = vld [vmem:[%s6273_s3 + $0x3ac] ss:$16 sps:$4 sm:$0xff]  }
 0x184   :  { %v1524_v32 = vpop.f32.mrf.mxu0  ;;  %2523 = vmatprep.subr.bf16.mxu0 %v4455_v30  ;;  %v4494_v30 = vld [vmem:[%s6273_s3 + $0x3ec] ss:$16 sps:$4 sm:$0xff]  }
 0x185   :  { %v1525_v46 = vadd.f32 %v1524_v32, %v1484_v42  ;;  %v4497_v32 = vld [vmem:[%s6273_s3 + $0x3cc] ss:$16 sps:$4 sm:$0xff]   ;;  %v4498_v42 = vld [vmem:[%s6273_s3 + $0x3a8] ss:$16 sps:$4 sm:$0xff]  }
 0x186   :  { %v1526_v35 = vpop.f32.mrf.mxu0 }
 0x187   :  { %2524 = vmatpush2.bf16.msra.mxu0 %v4453_v6  ;;  %v4492_v6 = vld [vmem:[%s6273_s3 + $0x3e8] ss:$16 sps:$4 sm:$0xff]  }
 0x188   :  { %v1527_v41 = vpop.f32.mrf.mxu0  ;;  %2525 = vmatprep.subr.bf16.mxu0 %v4461_v33  ;;  %v4540_v33 = vld [vmem:[%s6276_s5 + $0x1e0] ss:$16 sps:$4 sm:$0xff]   ;;  %v4495_v35 = vld [vmem:[%s6273_s3 + $0x3c8] ss:$16 sps:$4 sm:$0xff]  }
 0x189   :  { %v4548_v41 = vld [vmem:[%s6276_s5 + $0x1a4] ss:$16 sps:$4 sm:$0xff]  }
 0x18a   :  { %v1604_v45 = vpop.f32.mrf.mxu0 }
 0x18b   :  { %v1563_v44 = vpop.f32.mrf.mxu1  ;;  %2526 = vmatpush2.bf16.msra.mxu0 %v4459_v37  ;;  %v4543_v37 = vld [vmem:[%s6276_s5 + $0x1c0] ss:$16 sps:$4 sm:$0xff]  }
 0x18c   :  { %v1564_v47 = vadd.f32 %v1563_v44, %v1523_v43  ;;  %v1606_v39 = vpop.f32.mrf.mxu0  ;;  %3375 = vmatprep.subr.bf16.mxu0 %v4518_v0  ;;  %v4503_v43 = vld [vmem:[%s6273_s3 + $0x38c] ss:$16 sps:$4 sm:$0xff]   ;;  %v4546_v44 = vld [vmem:[%s6276_s5 + $0x1a0] ss:$16 sps:$4 sm:$0xff]  }
 0x18d   :  { %v1565_v48 = vpop.f32.mrf.mxu1  ;;  %v4561_v0 = vld [vmem:[%s6276_s5 + $0x100] ss:$16 sps:$4 sm:$0xff]  }
 0x18e   :  { %v1605_v49 = vadd.f32 %v1604_v45, %v1564_v47  ;;  %v1566_v50 = vadd.f32 %v1565_v48, %v1525_v46  ;;  %2528 = vmatmul.mubr.bf16.vlgmr.msra.gmra.mxu0 %v5630_v61  ;;  %v1608_v53 = vpop.f32.mrf.mxu0  ;;  %v4551_v45 = vld [vmem:[%s6276_s5 + $0x184] ss:$16 sps:$4 sm:$0xff]   ;;  %v4501_v46 = vld [vmem:[%s6273_s3 + $0x388] ss:$16 sps:$4 sm:$0xff]   ;;  %v4506_v47 = vld [vmem:[%s6273_s3 + $0x36c] ss:$16 sps:$4 sm:$0xff]  }
 0x18f   :  { %v1567_v51 = vpop.f32.mrf.mxu1  ;;  %3376 = vmatpush1.bf16.msra.mxu0 %v4516_v63  ;;  %v4549_v48 = vld [vmem:[%s6276_s5 + $0x180] ss:$16 sps:$4 sm:$0xff]   ;;  %v4510_v53 = vld [vmem:[%s6273_s3 + $0x328] ss:$16 sps:$4 sm:$0xff]   ;;  %v4563_v63 = vld [vmem:[%s6276_s5 + $0x104] ss:$16 sps:$4 sm:$0xff]  }
 0x190   :  { %v1613_v54 = vmax.f32 %v1605_v49, 0.0  ;;  %v1607_v55 = vadd.f32 %v1606_v39, %v1566_v50  ;;  %v1609_v57 = vpop.f32.mrf.mxu0  ;;  %3377 = vmatprep.subr.bf16.mxu0 %v4521_v2  ;;  %v4504_v39 = vld [vmem:[%s6273_s3 + $0x368] ss:$16 sps:$4 sm:$0xff]   ;;  %v4509_v49 = vld [vmem:[%s6273_s3 + $0x34c] ss:$16 sps:$4 sm:$0xff]  }
 0x191   :  { %v1568_v56 = vpop.f32.mrf.mxu1  ;;  %v4507_v50 = vld [vmem:[%s6273_s3 + $0x348] ss:$16 sps:$4 sm:$0xff]   ;;  %v4512_v51 = vld [vmem:[%s6273_s3 + $0x32c] ss:$16 sps:$4 sm:$0xff]   ;;  %v4552_v57 = vld [vmem:[%s6276_s5 + $0x160] ss:$16 sps:$4 sm:$0xff]  }
 0x192   :  { %1617 = vst [vmem:[%s6275_s7 + $0x10] sm:$0xff] %v1613_v54  ;;  %v1614_v58 = vmax.f32 %v1607_v55, 0.0  ;;  %v5747_v61 = vpack.c.bf16 %v1613_v54, %v1613_v54  ;;  %v4515_v54 = vld [vmem:[%s6273_s3 + $0x30c] ss:$16 sps:$4 sm:$0xff]   ;;  %v4554_v55 = vld [vmem:[%s6276_s5 + $0x164] ss:$16 sps:$4 sm:$0xff]  }
 0x193   :  { %3378 = vmatpush1.bf16.msra.mxu0 %v4519_v4  ;;  %v4513_v56 = vld [vmem:[%s6273_s3 + $0x308] ss:$16 sps:$4 sm:$0xff]   ;;  %v4569_v2 = vld [vmem:[%s6276_s5 + $0xec] ss:$16 sps:$4 sm:$0xff]   ;;  %v4572_v4 = vld [vmem:[%s6276_s5 + $0x2c4] ss:$16 sps:$4 sm:$0xff]  }
 0x194   :  { %1618 = vst [vmem:[%s6275_s7 + $0x18] sm:$0xff] %v1614_v58  ;;  %v1622_v59 = vpack.c.bf16 %v1614_v58, %v1614_v58  ;;  %3379 = vmatprep.subr.bf16.mxu0 %v4524_v5  ;;  %v4557_v58 = vld [vmem:[%s6276_s5 + $0x144] ss:$16 sps:$4 sm:$0xff]   ;;  %v4576_v5 = vld [vmem:[%s6276_s5 + $0x2a0] ss:$16 sps:$4 sm:$0xff]  }
 0x196   :  { %2486 = vmatprep.mubr.bf16.mxu1 %v1622_v59 }
 0x197   :  { %2487 = vmatmul.mubr.bf16.vlgmr.msra.gmra.mxu1 %v5747_v61  ;;  %3380 = vmatpush1.bf16.msra.mxu0 %v4522_v10  ;;  %v4584_v10 = vld [vmem:[%s6276_s5 + $0x284] ss:$16 sps:$4 sm:$0xff]  }
 0x198   :  { %2537 = vmatpush1.bf16.msra.mxu1 %v4468_v60  ;;  %2568 = vmatprep.mubr.bf16.mxu1 %v1622_v59  ;;  %v4555_v59 = vld [vmem:[%s6276_s5 + $0x140] ss:$16 sps:$4 sm:$0xff]   ;;  %v4560_v60 = vld [vmem:[%s6276_s5 + $0x124] ss:$16 sps:$4 sm:$0xff]  }
 0x199   :  { %2538 = vmatprep.subr.bf16.mxu1 %v4473_v62  ;;  %3381 = vmatprep.subr.bf16.mxu0 %v4527_v11  ;;  %v4558_v62 = vld [vmem:[%s6276_s5 + $0x120] ss:$16 sps:$4 sm:$0xff]  }
 0x19a   :  { %v4588_v11 = vld [vmem:[%s6276_s5 + $0x260] ss:$16 sps:$4 sm:$0xff]  }
 0x19b   :  { %3382 = vmatpush1.bf16.msra.mxu0 %v4525_v14  ;;  %v4596_v14 = vld [vmem:[%s6276_s5 + $0x244] ss:$16 sps:$4 sm:$0xff]  }
 0x19c   :  { %2539 = vmatpush1.bf16.msra.mxu1 %v4471_v1  ;;  %3383 = vmatprep.subr.bf16.mxu0 %v4530_v18  ;;  %v4566_v1 = vld [vmem:[%s6276_s5 + $0x2e4] ss:$16 sps:$4 sm:$0xff]   ;;  %v4600_v18 = vld [vmem:[%s6276_s5 + $0x220] ss:$16 sps:$4 sm:$0xff]  }
 0x19d   :  { %2540 = vmatprep.subr.bf16.mxu1 %v4476_v3  ;;  %v4570_v3 = vld [vmem:[%s6276_s5 + $0x2c0] ss:$16 sps:$4 sm:$0xff]  }
 0x19f   :  { %3384 = vmatpush1.bf16.msra.mxu0 %v4528_v21  ;;  %v4608_v21 = vld [vmem:[%s6276_s5 + $0x204] ss:$16 sps:$4 sm:$0xff]  }
 0x1a0   :  { %2541 = vmatpush1.bf16.msra.mxu1 %v4474_v8  ;;  %3385 = vmatprep.subr.bf16.mxu0 %v4533_v22  ;;  %v4578_v8 = vld [vmem:[%s6276_s5 + $0x2a4] ss:$16 sps:$4 sm:$0xff]   ;;  %v4612_v22 = vld [vmem:[%s6276_s5 + $0x3e0] ss:$16 sps:$4 sm:$0xff]  }
 0x1a1   :  { %2542 = vmatprep.subr.bf16.mxu1 %v4479_v9  ;;  %v4582_v9 = vld [vmem:[%s6276_s5 + $0x280] ss:$16 sps:$4 sm:$0xff]  }
 0x1a3   :  { %3386 = vmatpush1.bf16.msra.mxu0 %v4531_v25  ;;  %v4620_v25 = vld [vmem:[%s6276_s5 + $0x3c4] ss:$16 sps:$4 sm:$0xff]  }
 0x1a4   :  { %2543 = vmatpush1.bf16.msra.mxu1 %v4477_v12  ;;  %3387 = vmatprep.subr.bf16.mxu0 %v4536_v26  ;;  %v4590_v12 = vld [vmem:[%s6276_s5 + $0x264] ss:$16 sps:$4 sm:$0xff]   ;;  %v4624_v26 = vld [vmem:[%s6276_s5 + $0x3a0] ss:$16 sps:$4 sm:$0xff]  }
 0x1a5   :  { %2544 = vmatprep.subr.bf16.mxu1 %v4482_v13  ;;  %v4594_v13 = vld [vmem:[%s6276_s5 + $0x240] ss:$16 sps:$4 sm:$0xff]  }
 0x1a7   :  { %3388 = vmatpush1.bf16.msra.mxu0 %v4534_v7  ;;  %v4632_v7 = vld [vmem:[%s6276_s5 + $0x384] ss:$16 sps:$4 sm:$0xff]  }
 0x1a8   :  { %2545 = vmatpush1.bf16.msra.mxu1 %v4480_v19  ;;  %3389 = vmatprep.subr.bf16.mxu0 %v4539_v52  ;;  %v4602_v19 = vld [vmem:[%s6276_s5 + $0x224] ss:$16 sps:$4 sm:$0xff]   ;;  %v4636_v52 = vld [vmem:[%s6276_s5 + $0x360] ss:$16 sps:$4 sm:$0xff]  }
 0x1a9   :  { %2546 = vmatprep.subr.bf16.mxu1 %v4485_v20  ;;  %v4606_v20 = vld [vmem:[%s6276_s5 + $0x200] ss:$16 sps:$4 sm:$0xff]  }
 0x1ab   :  { %3390 = vmatpush1.bf16.msra.mxu0 %v4537_v15 }
 0x1ac   :  { %2547 = vmatpush1.bf16.msra.mxu1 %v4483_v23  ;;  %3391 = vmatprep.subr.bf16.mxu0 %v4542_v31  ;;  %v4614_v23 = vld [vmem:[%s6276_s5 + $0x3e4] ss:$16 sps:$4 sm:$0xff]   ;;  %v4642_v31 = vld [vmem:[%s6276_s5 + $0x340] ss:$16 sps:$4 sm:$0xff]  }
 0x1ad   :  { %2548 = vmatprep.subr.bf16.mxu1 %v4488_v24  ;;  %v4618_v24 = vld [vmem:[%s6276_s5 + $0x3c0] ss:$16 sps:$4 sm:$0xff]  }
 0x1af   :  { %3392 = vmatpush2.bf16.msra.mxu0 %v4540_v33 }
 0x1b0   :  { %2549 = vmatpush1.bf16.msra.mxu1 %v4486_v27  ;;  %3393 = vmatprep.subr.bf16.mxu0 %v4545_v34  ;;  %v4626_v27 = vld [vmem:[%s6276_s5 + $0x3a4] ss:$16 sps:$4 sm:$0xff]  }
 0x1b1   :  { %2550 = vmatprep.subr.bf16.mxu1 %v4491_v28  ;;  %v4630_v28 = vld [vmem:[%s6276_s5 + $0x380] ss:$16 sps:$4 sm:$0xff]   ;;  %v4650_v34 = vld [vmem:[%s6276_s5 + $0x324] ss:$16 sps:$4 sm:$0xff]  }
 0x1b3   :  { %3394 = vmatpush2.bf16.msra.mxu0 %v4543_v37  ;;  %v4654_v37 = vld [vmem:[%s6276_s5 + $0x300] ss:$16 sps:$4 sm:$0xff]  }
 0x1b4   :  { %2551 = vmatpush1.bf16.msra.mxu1 %v4489_v29  ;;  %3395 = vmatprep.subr.bf16.mxu0 %v4548_v41  ;;  %v4638_v29 = vld [vmem:[%s6276_s5 + $0x364] ss:$16 sps:$4 sm:$0xff]   ;;  %v4662_v41 = vld [vmem:[%s6276_s5 + $0x2ec] ss:$16 sps:$4 sm:$0xff]  }
 0x1b5   :  { %2552 = vmatprep.subr.bf16.mxu1 %v4494_v30 }
 0x1b7   :  { %3396 = vmatpush2.bf16.msra.mxu0 %v4546_v44 }
 0x1b8   :  { %2553 = vmatpush2.bf16.msra.mxu1 %v4492_v6  ;;  %3397 = vmatprep.subr.bf16.mxu0 %v4551_v45  ;;  %v4644_v6 = vld [vmem:[%s6276_s5 + $0x344] ss:$16 sps:$4 sm:$0xff]  }
 0x1b9   :  { %2554 = vmatprep.subr.bf16.mxu1 %v4497_v32 }
 0x1bb   :  { %3398 = vmatpush2.bf16.msra.mxu0 %v4549_v48 }
 0x1bc   :  { %2555 = vmatpush2.bf16.msra.mxu1 %v4495_v35  ;;  %3399 = vmatprep.subr.bf16.mxu0 %v4554_v55  ;;  %v4648_v35 = vld [vmem:[%s6276_s5 + $0x320] ss:$16 sps:$4 sm:$0xff]  }
 0x1bd   :  { %2556 = vmatprep.subr.bf16.mxu1 %v4500_v36  ;;  %v4656_v36 = vld [vmem:[%s6276_s5 + $0x304] ss:$16 sps:$4 sm:$0xff]  }
 0x1bf   :  { %3400 = vmatpush2.bf16.msra.mxu0 %v4552_v57 }
 0x1c0   :  { %2557 = vmatpush2.bf16.msra.mxu1 %v4498_v42  ;;  %3401 = vmatprep.subr.bf16.mxu0 %v4557_v58  ;;  %v6042_v42 = vld [vmem:[%s6277_s4] sm:$0xf] }
 0x1c1   :  { %2558 = vmatprep.subr.bf16.mxu1 %v4503_v43  ;;  %v1756_v45 = vrot.slane %v6042_v42, %v5605_v38 }
 0x1c3   :  { %3402 = vmatpush2.bf16.msra.mxu0 %v4555_v59 }
 0x1c4   :  { %2559 = vmatpush2.bf16.msra.mxu1 %v4501_v46  ;;  %3403 = vmatprep.subr.bf16.mxu0 %v4560_v60  ;;  %v4567_v60 = vld [vmem:[%s6276_s5 + $0xe8] ss:$16 sps:$4 sm:$0xff]  }
 0x1c5   :  { %2560 = vmatprep.subr.bf16.mxu1 %v4506_v47  ;;  %v1760_v47 = vrot.slane %v6042_v42, %v5613_v40 }
 0x1c7   :  { %3404 = vmatpush2.bf16.msra.mxu0 %v4558_v62 }
 0x1c8   :  { %2561 = vmatpush2.bf16.msra.mxu1 %v4504_v39  ;;  %3405 = vmatprep.subr.bf16.mxu0 %v4563_v63  ;;  %v4575_v63 = vld [vmem:[%s6276_s5 + $0xcc] ss:$16 sps:$4 sm:$0xff]  }
 0x1c9   :  { %2562 = vmatprep.subr.bf16.mxu1 %v4509_v49 }
 0x1cb   :  { %3406 = vmatpush2.bf16.msra.mxu0 %v4561_v0  ;;  %v4573_v0 = vld [vmem:[%s6276_s5 + $0xc8] ss:$16 sps:$4 sm:$0xff]  }
 0x1cc   :  { %2563 = vmatpush2.bf16.msra.mxu1 %v4507_v50  ;;  %3457 = vmatprep.subr.bf16.mxu0 %v4569_v2  ;;  %v4587_v2 = vld [vmem:[%s6276_s5 + $0x8c] ss:$16 sps:$4 sm:$0xff]  }
 0x1cd   :  { %2564 = vmatprep.subr.bf16.mxu1 %v4512_v51 }
 0x1d0   :  { %2565 = vmatpush2.bf16.msra.mxu1 %v4510_v53 }
 0x1d1   :  { %2566 = vmatprep.subr.bf16.mxu1 %v4515_v54 }
 0x1d4   :  { %2567 = vmatpush2.bf16.msra.mxu1 %v4513_v56 }
 0x1d5   :  { %3416 = vmatprep.subr.bf16.mxu1 %v4566_v1  ;;  %v4579_v1 = vld [vmem:[%s6276_s5 + $0xa8] ss:$16 sps:$4 sm:$0xff]  }
 0x1d7   :  { %2569 = vmatmul.mubr.bf16.vlgmr.msra.gmra.mxu1 %v5747_v61  ;;  %v4564_v61 = vld [vmem:[%s6276_s5 + $0x2e0] ss:$16 sps:$4 sm:$0xff]  }
 0x1d8   :  { %3417 = vmatpush1.bf16.msra.mxu1 %v4564_v61  ;;  %v4581_v61 = vld [vmem:[%s6276_s5 + $0xac] ss:$16 sps:$4 sm:$0xff]  }
 0x1d9   :  { %3418 = vmatprep.subr.bf16.mxu1 %v4572_v4  ;;  %v4593_v4 = vld [vmem:[%s6276_s5 + $0x6c] ss:$16 sps:$4 sm:$0xff]  }
 0x1dc   :  { %3419 = vmatpush1.bf16.msra.mxu1 %v4570_v3  ;;  %v4585_v3 = vld [vmem:[%s6276_s5 + $0x88] ss:$16 sps:$4 sm:$0xff]  }
 0x1dd   :  { %3420 = vmatprep.subr.bf16.mxu1 %v4578_v8  ;;  %v4599_v8 = vld [vmem:[%s6276_s5 + $0x4c] ss:$16 sps:$4 sm:$0xff]  }
 0x1e0   :  { %3421 = vmatpush1.bf16.msra.mxu1 %v4576_v5  ;;  %v4591_v5 = vld [vmem:[%s6276_s5 + $0x68] ss:$16 sps:$4 sm:$0xff]  }
 0x1e1   :  { %3422 = vmatprep.subr.bf16.mxu1 %v4584_v10  ;;  %v4605_v10 = vld [vmem:[%s6276_s5 + $0x2c] ss:$16 sps:$4 sm:$0xff]  }
 0x1e4   :  { %3423 = vmatpush1.bf16.msra.mxu1 %v4582_v9  ;;  %v4597_v9 = vld [vmem:[%s6276_s5 + $0x48] ss:$16 sps:$4 sm:$0xff]  }
 0x1e5   :  { %3424 = vmatprep.subr.bf16.mxu1 %v4590_v12  ;;  %v4611_v12 = vld [vmem:[%s6276_s5 + $0xc] ss:$16 sps:$4 sm:$0xff]  }
 0x1e8   :  { %3425 = vmatpush1.bf16.msra.mxu1 %v4588_v11  ;;  %v4603_v11 = vld [vmem:[%s6276_s5 + $0x28] ss:$16 sps:$4 sm:$0xff]  }
 0x1e9   :  { %3426 = vmatprep.subr.bf16.mxu1 %v4596_v14  ;;  %v4617_v14 = vld [vmem:[%s6276_s5 + $0x1ec] ss:$16 sps:$4 sm:$0xff]  }
 0x1ec   :  { %3427 = vmatpush1.bf16.msra.mxu1 %v4594_v13  ;;  %v4609_v13 = vld [vmem:[%s6276_s5 + $0x8] ss:$16 sps:$4 sm:$0xff]  }
 0x1ed   :  { %3428 = vmatprep.subr.bf16.mxu1 %v4602_v19  ;;  %v4623_v19 = vld [vmem:[%s6276_s5 + $0x1cc] ss:$16 sps:$4 sm:$0xff]  }
 0x1f0   :  { %3429 = vmatpush1.bf16.msra.mxu1 %v4600_v18  ;;  %v4615_v18 = vld [vmem:[%s6276_s5 + $0x1e8] ss:$16 sps:$4 sm:$0xff]  }
 0x1f1   :  { %3430 = vmatprep.subr.bf16.mxu1 %v4608_v21  ;;  %v4629_v21 = vld [vmem:[%s6276_s5 + $0x1ac] ss:$16 sps:$4 sm:$0xff]  }
 0x1f4   :  { %3431 = vmatpush1.bf16.msra.mxu1 %v4606_v20  ;;  %v4621_v20 = vld [vmem:[%s6276_s5 + $0x1c8] ss:$16 sps:$4 sm:$0xff]  }
 0x1f5   :  { %3432 = vmatprep.subr.bf16.mxu1 %v4614_v23  ;;  %v4635_v23 = vld [vmem:[%s6276_s5 + $0x18c] ss:$16 sps:$4 sm:$0xff]  }
 0x1f8   :  { %3433 = vmatpush2.bf16.msra.mxu1 %v4612_v22  ;;  %v4627_v22 = vld [vmem:[%s6276_s5 + $0x1a8] ss:$16 sps:$4 sm:$0xff]  }
 0x1f9   :  { %3434 = vmatprep.subr.bf16.mxu1 %v4620_v25  ;;  %v4641_v25 = vld [vmem:[%s6276_s5 + $0x16c] ss:$16 sps:$4 sm:$0xff]  }
 0x1fc   :  { %3435 = vmatpush2.bf16.msra.mxu1 %v4618_v24  ;;  %v4633_v24 = vld [vmem:[%s6276_s5 + $0x188] ss:$16 sps:$4 sm:$0xff]  }
 0x1fd   :  { %3436 = vmatprep.subr.bf16.mxu1 %v4626_v27  ;;  %v4647_v27 = vld [vmem:[%s6276_s5 + $0x14c] ss:$16 sps:$4 sm:$0xff]  }
 0x200   :  { %3437 = vmatpush2.bf16.msra.mxu1 %v4624_v26  ;;  %v4639_v26 = vld [vmem:[%s6276_s5 + $0x168] ss:$16 sps:$4 sm:$0xff]  }
 0x201   :  { %3438 = vmatprep.subr.bf16.mxu1 %v4632_v7  ;;  %v4645_v7 = vld [vmem:[%s6276_s5 + $0x148] ss:$16 sps:$4 sm:$0xff]  }
 0x204   :  { %3439 = vmatpush2.bf16.msra.mxu1 %v4630_v28  ;;  %v1764_v28 = vrot.slane %v6042_v42, %v5711_v17 }
 0x205   :  { %3440 = vmatprep.subr.bf16.mxu1 %v4638_v29  ;;  %v1768_v29 = vrot.slane %v6042_v42, %v5720_v16 }
 0x208   :  { %3441 = vmatpush2.bf16.msra.mxu1 %v4636_v52  ;;  %v4653_v52 = vld [vmem:[%s6276_s5 + $0x12c] ss:$16 sps:$4 sm:$0xff]  }
 0x209   :  { %3442 = vmatprep.subr.bf16.mxu1 %v4644_v6  ;;  %v4659_v6 = vld [vmem:[%s6276_s5 + $0x10c] ss:$16 sps:$4 sm:$0xff]  }
 0x20c   :  { %3443 = vmatpush2.bf16.msra.mxu1 %v4642_v31 }
 0x20d   :  { %3444 = vmatprep.subr.bf16.mxu1 %v4650_v34 }
 0x20e   :  { %v2447_v30 = vpop.f32.mrf.mxu0 }
 0x20f   :  { %v2448_v39 = vadd.f32 %v2447_v30, %v1756_v45 }
 0x210   :  { %v2449_v15 = vpop.f32.mrf.mxu0  ;;  %3445 = vmatpush2.bf16.msra.mxu1 %v4648_v35 }
 0x211   :  { %3446 = vmatprep.subr.bf16.mxu1 %v4656_v36  ;;  %v2450_v50 = vadd.f32 %v2449_v15, %v1760_v47  ;;  %v4651_v15 = vld [vmem:[%s6276_s5 + $0x128] ss:$16 sps:$4 sm:$0xff]   ;;  %v4665_v47 = vld [vmem:[%s6276_s5 + $0x2cc] ss:$16 sps:$4 sm:$0xff]  }
 0x212   :  { %v2451_v32 = vpop.f32.mrf.mxu0  ;;  %v4657_v36 = vld [vmem:[%s6276_s5 + $0x108] ss:$16 sps:$4 sm:$0xff]  }
 0x214   :  { %v2452_v33 = vpop.f32.mrf.mxu0  ;;  %3447 = vmatpush2.bf16.msra.mxu1 %v4654_v37 }
 0x215   :  { %3498 = vmatprep.subr.bf16.mxu1 %v4662_v41 }
 0x24e   :  { %v6044_v43 = vpop.f32.mrf.mxu0 }
 0x24f   :  { %v2530_v30 = vadd.f32 %v6044_v43, %v1764_v28 }
 0x250   :  { %v6046_v44 = vpop.f32.mrf.mxu0 }
 0x251   :  { %v2532_v32 = vadd.f32 %v6046_v44, %v1768_v29 }
 0x252   :  { %v2533_v46 = vpop.f32.mrf.mxu0 }
 0x253   :  { %v4660_v46 = vld [vmem:[%s6276_s5 + $0x2e8] ss:$16 sps:$4 sm:$0xff]  }
 0x254   :  { %v2534_v48 = vpop.f32.mrf.mxu0 }
 0x255   :  { %v4663_v48 = vld [vmem:[%s6276_s5 + $0x2c8] ss:$16 sps:$4 sm:$0xff]  }
 0x257   :  { %v2488_v49 = vpop.f32.mrf.mxu1 }
 0x258   :  { %v2489_v51 = vadd.f32 %v2488_v49, %v2448_v39  ;;  %v4668_v39 = vld [vmem:[%s6276_s5 + $0x2ac] ss:$16 sps:$4 sm:$0xff]   ;;  %v4666_v49 = vld [vmem:[%s6276_s5 + $0x2a8] ss:$16 sps:$4 sm:$0xff]  }
 0x259   :  { %v2490_v53 = vpop.f32.mrf.mxu1 }
 0x25a   :  { %v2491_v54 = vadd.f32 %v2490_v53, %v2450_v50  ;;  %v2577_v55 = vmax.f32 %v2489_v51, 0.0  ;;  %v4671_v50 = vld [vmem:[%s6276_s5 + $0x28c] ss:$16 sps:$4 sm:$0xff]   ;;  %v4669_v51 = vld [vmem:[%s6276_s5 + $0x288] ss:$16 sps:$4 sm:$0xff]  }
 0x25b   :  { %v2492_v56 = vpop.f32.mrf.mxu1  ;;  %v4674_v53 = vld [vmem:[%s6276_s5 + $0x26c] ss:$16 sps:$4 sm:$0xff]  }
 0x25c   :  { %v2578_v57 = vmax.f32 %v2491_v54, 0.0  ;;  %v6055_v62 = vpack.c.bf16 %v2577_v55, %v2577_v55  ;;  %v4672_v54 = vld [vmem:[%s6276_s5 + $0x268] ss:$16 sps:$4 sm:$0xff]   ;;  %v4677_v55 = vld [vmem:[%s6276_s5 + $0x24c] ss:$16 sps:$4 sm:$0xff]  }
 0x25d   :  { %v2493_v58 = vpop.f32.mrf.mxu1  ;;  %v4675_v56 = vld [vmem:[%s6276_s5 + $0x248] ss:$16 sps:$4 sm:$0xff]  }
 0x25e   :  { %v2582_v59 = vpack.c.bf16 %v2578_v57, %v2578_v57  ;;  %v4680_v57 = vld [vmem:[%s6276_s5 + $0x22c] ss:$16 sps:$4 sm:$0xff]   ;;  %v4678_v58 = vld [vmem:[%s6276_s5 + $0x228] ss:$16 sps:$4 sm:$0xff]  }
 0x260   :  { %3407 = vmatprep.mubr.bf16.mxu0 %v2582_v59 }
 0x261   :  { %3408 = vmatmul.mubr.bf16.vlgmr.msra.gmra.mxu0 %v6055_v62 }
 0x262   :  { %3458 = vmatpush1.bf16.msra.mxu0 %v4567_v60  ;;  %3489 = vmatprep.mubr.bf16.mxu0 %v2582_v59  ;;  %v4683_v59 = vld [vmem:[%s6276_s5 + $0x20c] ss:$16 sps:$4 sm:$0xff]   ;;  %v4681_v60 = vld [vmem:[%s6276_s5 + $0x208] ss:$16 sps:$4 sm:$0xff]  }
 0x263   :  { %3459 = vmatprep.subr.bf16.mxu0 %v4575_v63  ;;  %v4684_v63 = vld [vmem:[%s6276_s5 + $0x3e8] ss:$16 sps:$4 sm:$0xff]  }
 0x266   :  { %3460 = vmatpush1.bf16.msra.mxu0 %v4573_v0  ;;  %v4689_v0 = vld [vmem:[%s6276_s5 + $0x3cc] ss:$16 sps:$4 sm:$0xff]  }
 0x267   :  { %3461 = vmatprep.subr.bf16.mxu0 %v4581_v61  ;;  %v4687_v61 = vld [vmem:[%s6276_s5 + $0x3c8] ss:$16 sps:$4 sm:$0xff]  }
 0x26a   :  { %3462 = vmatpush1.bf16.msra.mxu0 %v4579_v1  ;;  %v4692_v1 = vld [vmem:[%s6276_s5 + $0x3ac] ss:$16 sps:$4 sm:$0xff]  }
 0x26b   :  { %3463 = vmatprep.subr.bf16.mxu0 %v4587_v2  ;;  %v4690_v2 = vld [vmem:[%s6276_s5 + $0x3a8] ss:$16 sps:$4 sm:$0xff]  }
 0x26e   :  { %3464 = vmatpush1.bf16.msra.mxu0 %v4585_v3  ;;  %v4695_v3 = vld [vmem:[%s6276_s5 + $0x38c] ss:$16 sps:$4 sm:$0xff]  }
 0x26f   :  { %3465 = vmatprep.subr.bf16.mxu0 %v4593_v4  ;;  %v4693_v4 = vld [vmem:[%s6276_s5 + $0x388] ss:$16 sps:$4 sm:$0xff]  }
 0x272   :  { %3466 = vmatpush1.bf16.msra.mxu0 %v4591_v5  ;;  %v4698_v5 = vld [vmem:[%s6276_s5 + $0x36c] ss:$16 sps:$4 sm:$0xff]  }
 0x273   :  { %3467 = vmatprep.subr.bf16.mxu0 %v4599_v8  ;;  %v4696_v8 = vld [vmem:[%s6276_s5 + $0x368] ss:$16 sps:$4 sm:$0xff]  }
 0x276   :  { %3468 = vmatpush1.bf16.msra.mxu0 %v4597_v9  ;;  %v4701_v9 = vld [vmem:[%s6276_s5 + $0x34c] ss:$16 sps:$4 sm:$0xff]  }
 0x277   :  { %3469 = vmatprep.subr.bf16.mxu0 %v4605_v10  ;;  %v4699_v10 = vld [vmem:[%s6276_s5 + $0x348] ss:$16 sps:$4 sm:$0xff]  }
 0x27a   :  { %3470 = vmatpush1.bf16.msra.mxu0 %v4603_v11  ;;  %v4704_v11 = vld [vmem:[%s6276_s5 + $0x32c] ss:$16 sps:$4 sm:$0xff]  }
 0x27b   :  { %3471 = vmatprep.subr.bf16.mxu0 %v4611_v12  ;;  %v4702_v12 = vld [vmem:[%s6276_s5 + $0x328] ss:$16 sps:$4 sm:$0xff]  }
 0x27e   :  { %3472 = vmatpush1.bf16.msra.mxu0 %v4609_v13  ;;  %v4707_v13 = vld [vmem:[%s6276_s5 + $0x30c] ss:$16 sps:$4 sm:$0xff]  }
 0x27f   :  { %3473 = vmatprep.subr.bf16.mxu0 %v4617_v14  ;;  %v4705_v14 = vld [vmem:[%s6276_s5 + $0x308] ss:$16 sps:$4 sm:$0xff]  }
 0x282   :  { %3474 = vmatpush2.bf16.msra.mxu0 %v4615_v18 }
 0x283   :  { %3475 = vmatprep.subr.bf16.mxu0 %v4623_v19 }
 0x286   :  { %3476 = vmatpush2.bf16.msra.mxu0 %v4621_v20 }
 0x287   :  { %3477 = vmatprep.subr.bf16.mxu0 %v4629_v21 }
 0x28a   :  { %3478 = vmatpush2.bf16.msra.mxu0 %v4627_v22  ;;  %v2713_v22 = vld [vmem:[%s6278_s6] sm:$0xf] }
 0x28b   :  { %3479 = vmatprep.subr.bf16.mxu0 %v4635_v23  ;;  %v2718_v23 = vrot.slane %v2713_v22, %v5605_v38 }
 0x28e   :  { %3480 = vmatpush2.bf16.msra.mxu0 %v4633_v24  ;;  %v2722_v24 = vrot.slane %v2713_v22, %v5613_v40 }
 0x28f   :  { %3481 = vmatprep.subr.bf16.mxu0 %v4641_v25 }
 0x292   :  { %3482 = vmatpush2.bf16.msra.mxu0 %v4639_v26 }
 0x293   :  { %3483 = vmatprep.subr.bf16.mxu0 %v4647_v27 }
 0x296   :  { %3484 = vmatpush2.bf16.msra.mxu0 %v4645_v7 }
 0x297   :  { %v2570_v31 = vpop.f32.mrf.mxu1  ;;  %3485 = vmatprep.subr.bf16.mxu0 %v4653_v52 }
 0x298   :  { %v2571_v33 = vadd.f32 %v2570_v31, %v2530_v30 }
 0x299   :  { %v2572_v34 = vpop.f32.mrf.mxu1 }
 0x29a   :  { %v2573_v35 = vadd.f32 %v2572_v34, %v2532_v32  ;;  %3486 = vmatpush2.bf16.msra.mxu0 %v4651_v15  ;;  %v2579_v37 = vmax.f32 %v2571_v33, 0.0  ;;  %v2730_v32 = vrot.slane %v2713_v22, %v5720_v16 }
 0x29b   :  { %v2574_v41 = vpop.f32.mrf.mxu1  ;;  %3487 = vmatprep.subr.bf16.mxu0 %v4659_v6  ;;  %v2726_v6 = vrot.slane %v2713_v22, %v5711_v17 }
 0x29c   :  { %v2580_v42 = vmax.f32 %v2573_v35, 0.0  ;;  %v6157_v44 = vpack.c.bf16 %v2579_v37, %v2579_v37 }
 0x29d   :  { %v2575_v43 = vpop.f32.mrf.mxu1 }
 0x29e   :  { %v2584_v45 = vpack.c.bf16 %v2580_v42, %v2580_v42  ;;  %3488 = vmatpush2.bf16.msra.mxu0 %v4657_v36 }
 0x2a0   :  { %3448 = vmatprep.mubr.bf16.mxu1 %v2584_v45 }
 0x2a1   :  { %3449 = vmatmul.mubr.bf16.vlgmr.msra.gmra.mxu1 %v6157_v44  ;;  %3490 = vmatmul.mubr.bf16.vlgmr.msra.gmra.mxu0 %v6055_v62  ;;  %v4686_v62 = vld [vmem:[%s6276_s5 + $0x3ec] ss:$16 sps:$4 sm:$0xff]  }
 0x2a2   :  { %3499 = vmatpush1.bf16.msra.mxu1 %v4660_v46  ;;  %3530 = vmatprep.mubr.bf16.mxu1 %v2584_v45 }
 0x2a3   :  { %3500 = vmatprep.subr.bf16.mxu1 %v4665_v47 }
 0x2a6   :  { %3501 = vmatpush1.bf16.msra.mxu1 %v4663_v48 }
 0x2a7   :  { %3502 = vmatprep.subr.bf16.mxu1 %v4668_v39 }
 0x2aa   :  { %3503 = vmatpush1.bf16.msra.mxu1 %v4666_v49 }
 0x2ab   :  { %3504 = vmatprep.subr.bf16.mxu1 %v4671_v50 }
 0x2ae   :  { %3505 = vmatpush1.bf16.msra.mxu1 %v4669_v51 }
 0x2af   :  { %3506 = vmatprep.subr.bf16.mxu1 %v4674_v53 }
 0x2b2   :  { %3507 = vmatpush1.bf16.msra.mxu1 %v4672_v54 }
 0x2b3   :  { %3508 = vmatprep.subr.bf16.mxu1 %v4677_v55 }
 0x2b6   :  { %3509 = vmatpush1.bf16.msra.mxu1 %v4675_v56 }
 0x2b7   :  { %3510 = vmatprep.subr.bf16.mxu1 %v4680_v57 }
 0x2ba   :  { %3511 = vmatpush1.bf16.msra.mxu1 %v4678_v58 }
 0x2bb   :  { %3512 = vmatprep.subr.bf16.mxu1 %v4683_v59 }
 0x2be   :  { %3513 = vmatpush1.bf16.msra.mxu1 %v4681_v60 }
 0x2bf   :  { %3514 = vmatprep.subr.bf16.mxu1 %v4686_v62 }
 0x2c2   :  { %3515 = vmatpush2.bf16.msra.mxu1 %v4684_v63 }
 0x2c3   :  { %3516 = vmatprep.subr.bf16.mxu1 %v4689_v0 }
 0x2c6   :  { %3517 = vmatpush2.bf16.msra.mxu1 %v4687_v61 }
 0x2c7   :  { %3518 = vmatprep.subr.bf16.mxu1 %v4692_v1 }
 0x2ca   :  { %3519 = vmatpush2.bf16.msra.mxu1 %v4690_v2 }
 0x2cb   :  { %3520 = vmatprep.subr.bf16.mxu1 %v4695_v3 }
 0x2ce   :  { %3521 = vmatpush2.bf16.msra.mxu1 %v4693_v4 }
 0x2cf   :  { %3522 = vmatprep.subr.bf16.mxu1 %v4698_v5 }
 0x2d2   :  { %3523 = vmatpush2.bf16.msra.mxu1 %v4696_v8 }
 0x2d3   :  { %3524 = vmatprep.subr.bf16.mxu1 %v4701_v9 }
 0x2d6   :  { %3525 = vmatpush2.bf16.msra.mxu1 %v4699_v10 }
 0x2d7   :  { %3526 = vmatprep.subr.bf16.mxu1 %v4704_v11 }
 0x2da   :  { %3527 = vmatpush2.bf16.msra.mxu1 %v4702_v12 }
 0x2db   :  { %3528 = vmatprep.subr.bf16.mxu1 %v4707_v13 }
 0x2de   :  { %3529 = vmatpush2.bf16.msra.mxu1 %v4705_v14 }
 0x2e1   :  { %3531 = vmatmul.mubr.bf16.vlgmr.msra.gmra.mxu1 %v6157_v44 }
 0x321   :  { %v3409_v18 = vpop.f32.mrf.mxu0 }
 0x322   :  { %v3410_v25 = vadd.f32 %v3409_v18, %v2718_v23 }
 0x323   :  { %v3411_v19 = vpop.f32.mrf.mxu0 }
 0x324   :  { %v3412_v28 = vadd.f32 %v3411_v19, %v2722_v24 }
 0x325   :  { %v3413_v20 = vpop.f32.mrf.mxu0 }
 0x327   :  { %v3414_v21 = vpop.f32.mrf.mxu0 }
 0x361   :  { %v3450_v26 = vpop.f32.mrf.mxu1  ;;  %v3491_v27 = vpop.f32.mrf.mxu0 }
 0x362   :  { %v3451_v7 = vadd.f32 %v3450_v26, %v3410_v25  ;;  %v3492_v33 = vadd.f32 %v3491_v27, %v2726_v6 }
 0x363   :  { %v3452_v52 = vpop.f32.mrf.mxu1  ;;  %v3493_v29 = vpop.f32.mrf.mxu0 }
 0x364   :  { %3539 = vst [vmem:[%s6279_s8] sm:$0xff] %v3451_v7  ;;  %v3453_v30 = vadd.f32 %v3452_v52, %v3412_v28  ;;  %v3494_v35 = vadd.f32 %v3493_v29, %v2730_v32 }
 0x365   :  { %v3454_v15 = vpop.f32.mrf.mxu1  ;;  %v3495_v31 = vpop.f32.mrf.mxu0 }
 0x366   :  { %3540 = vst [vmem:[%s6279_s8 + $0x8] sm:$0xff] %v3453_v30 }
 0x367   :  { %v3455_v38 = vpop.f32.mrf.mxu1  ;;  %v3496_v40 = vpop.f32.mrf.mxu0 }
 0x3a1   :  { %v3532_v34 = vpop.f32.mrf.mxu1 }
 0x3a2   :  { %v3533_v36 = vadd.f32 %v3532_v34, %v3492_v33 }
 0x3a3   :  { %v3534_v37 = vpop.f32.mrf.mxu1 }
 0x3a4   :  { %3541 = vst [vmem:[%s6279_s8 + $0x10] sm:$0xff] %v3533_v36  ;;  %v3535_v41 = vadd.f32 %v3534_v37, %v3494_v35 }
 0x3a5   :  { %v3536_v42 = vpop.f32.mrf.mxu1 }
 0x3a6   :  { %3542 = vst [vmem:[%s6279_s8 + $0x18] sm:$0xff] %v3535_v41 }
 0x3a7   :  { %v3537_v43 = vpop.f32.mrf.mxu1 }

</bundles_post_ra>
